<compile_context>
chip_gen: v7x
topology: tpu7x:2x2x1
jax: 0.10.0
libtpu: 0.0.40
codegen_flags: <defaults>
</compile_context>

<pallas_src>
import jax
import jax.numpy as jnp
from jax import lax
from jax.experimental import pallas as pl
from jax.experimental.pallas import tpu as pltpu

# ---- small, module-consistent dimensions (scaled down from 768/600/31199) ----
TX, BN, TY = 8, 32, 4         # source length, batch, target length
BATCH_TILE = 16               # batch rows per grid tile ("parallel" axis)
EC = 128                      # bert_enc
WEMB = 128                    # dim_wemb
DDEC = 128                    # dim_dec
DATT = 128                    # dim_att
VOCAB = 256                   # trg_words_n (tied embedding / logit table)
SRC_VOCAB = 64
V_TILE = 128                  # vocab tile for the online log-sum-exp


# ---------------------------------------------------------------------------
# Fused decoder kernel: grid = (batch_tile, decode_step).
# ---------------------------------------------------------------------------
def _fused_decoder_kernel(ctx_ref, xm_ref, yemb_ref, ytgt_ref, ymask_ref,
                          w_h0_ref, b_h0_ref, w_c0_ref, b_c0_ref,
                          w_att1_ref, b_att1_ref, w_att2_ref, b_att2_ref,
                          w_lstm_ref, b_lstm_ref, w_read_ref, b_read_ref,
                          embT_ref, b_logit_ref,
                          loss_out_ref,
                          actx_sc, ay_sc, ht_sc, ct_sc, loss_sc):
    step = pl.program_id(1)
    last_step = pl.num_programs(1) - 1

    BT, Tx, Ec = ctx_ref.shape
    Ty, _, W = yemb_ref.shape
    D = ht_sc.shape[1]
    V = embT_ref.shape[1]

    ctx = ctx_ref[...]                           # (BT, Tx, Ec) f32, batch-major
    xm = xm_ref[...]                             # (BT, Tx)     f32

    # ---- one-time work per batch tile: init states + loop-invariant proj ----
    @pl.when(step == 0)
    def _init():
        inv_cnt = pl.reciprocal(jnp.sum(xm, axis=1, keepdims=True), approx=True)
        ctx_mean = jnp.sum(ctx * xm[:, :, None], axis=1) * inv_cnt        # (BT, Ec)
        # f32 matmuls for h0/c0 (once per tile; keeps the recurrence seed accurate)
        ht_sc[...] = jnp.tanh(
            jnp.dot(ctx_mean, w_h0_ref[...], preferred_element_type=jnp.float32)
            + b_h0_ref[...])
        ct_sc[...] = jnp.tanh(
            jnp.dot(ctx_mean, w_c0_ref[...], preferred_element_type=jnp.float32)
            + b_c0_ref[...])
        # ctx @ W_att1[:Ec]  (loop-invariant over Ty)
        a_ctx = jnp.dot(ctx.reshape(BT * Tx, Ec).astype(jnp.bfloat16),
                        w_att1_ref[:Ec, :], preferred_element_type=jnp.float32)
        actx_sc[...] = a_ctx.reshape(BT, Tx, actx_sc.shape[2])
        # yemb @ W_att1[Ec:Ec+W] for ALL Ty steps at once (large-M MXU push)
        a_y = jnp.dot(yemb_ref[...].reshape(Ty * BT, W),
                      w_att1_ref[Ec:Ec + W, :], preferred_element_type=jnp.float32)
        ay_sc[...] = a_y.reshape(Ty, BT, ay_sc.shape[2])
        loss_sc[...] = jnp.zeros_like(loss_sc)
        loss_out_ref[...] = jnp.zeros_like(loss_out_ref)

    yemb = yemb_ref[step]                        # (BT, W) bf16, teacher-forced prev
    htm = ht_sc[...]
    ctm = ct_sc[...]
    ht_bf = htm.astype(jnp.bfloat16)

    # ---- attention over the source (batch-major) ----------------------------
    a_h = jnp.dot(ht_bf, w_att1_ref[Ec + W:, :], preferred_element_type=jnp.float32)
    pre = actx_sc[...] + (ay_sc[step] + a_h + b_att1_ref[...])[:, None, :]
    att1 = jnp.tanh(pre.astype(jnp.bfloat16))                  # bf16 EUP path
    att2 = jnp.sum(att1 * w_att2_ref[...][None], axis=-1) + b_att2_ref[...]
    att2 = att2 * xm
    att2 = att2 - jnp.max(att2)                  # single scalar shift (softmax-invariant)
    alpha = jnp.exp(att2) * xm
    alpha = alpha * pl.reciprocal(
        jnp.sum(alpha, axis=1, keepdims=True) + 1e-15, approx=True)
    ctx_t = jnp.sum(alpha[:, :, None] * ctx, axis=1)           # (BT, Ec) f32
    ctx_bf = ctx_t.astype(jnp.bfloat16)

    # ---- LSTM cell: three dots against aligned views of stacked weights -----
    gates = (jnp.dot(yemb, w_lstm_ref[:W, :], preferred_element_type=jnp.float32)
             + jnp.dot(ctx_bf, w_lstm_ref[W:W + Ec, :], preferred_element_type=jnp.float32)
             + jnp.dot(ht_bf, w_lstm_ref[W + Ec:, :], preferred_element_type=jnp.float32)
             + b_lstm_ref[...])
    i_g = jax.nn.sigmoid(gates[:, :D])
    f_g = jax.nn.sigmoid(gates[:, D:2 * D])
    g_g = jnp.tanh(gates[:, 2 * D:3 * D])
    o_g = jax.nn.sigmoid(gates[:, 3 * D:])
    ct = f_g * ctm + i_g * g_g
    ht = o_g * jnp.tanh(ct)
    ht_sc[...] = ht
    ct_sc[...] = ct
    ht_bf2 = ht.astype(jnp.bfloat16)

    # ---- readout + maxout ----------------------------------------------------
    read = (jnp.dot(ctx_bf, w_read_ref[:Ec, :], preferred_element_type=jnp.float32)
            + jnp.dot(ht_bf2, w_read_ref[Ec:Ec + D, :], preferred_element_type=jnp.float32)
            + jnp.dot(yemb, w_read_ref[Ec + D:, :], preferred_element_type=jnp.float32)
            + b_read_ref[...])
    read_max = jnp.maximum(read[:, :W], read[:, W:]).astype(jnp.bfloat16)

    # ---- per-step target / mask from lane-packed (BT, Ty) blocks -------------
    sel = lax.broadcasted_iota(jnp.int32, (BT, Ty), 1) == step
    tgt = jnp.sum(jnp.where(sel, ytgt_ref[...], 0), axis=1, keepdims=True)    # (BT,1) i32
    ym = jnp.sum(jnp.where(sel, ymask_ref[...], 0.0), axis=1, keepdims=True)  # (BT,1) f32

    # ---- vocab-tiled tied logits with online LSE (f32 accuracy path) ---------
    # TODO(synk): at real vocab (~31k) embT / b_logit should be streamed from HBM
    # (pl.ANY + manual double-buffer) instead of being held resident in VMEM.
    m_run = jnp.full((BT, 1), -jnp.inf, dtype=jnp.float32)
    s_run = jnp.zeros((BT, 1), dtype=jnp.float32)
    picked = jnp.zeros((BT, 1), dtype=jnp.float32)
    for t in range(V // V_TILE):
        sl = slice(t * V_TILE, (t + 1) * V_TILE)
        logit_t = (jnp.dot(read_max, embT_ref[:, sl],
                           preferred_element_type=jnp.float32)
                   + b_logit_ref[:, sl])                                      # (BT, VT)
        col = lax.broadcasted_iota(jnp.int32, (BT, V_TILE), 1) + t * V_TILE
        picked += jnp.sum(jnp.where(col == tgt, logit_t, 0.0), axis=1, keepdims=True)
        m_new = jnp.maximum(m_run, jnp.max(logit_t, axis=1, keepdims=True))
        s_run = (s_run * jnp.exp(m_run - m_new)
                 + jnp.sum(jnp.exp(logit_t - m_new), axis=1, keepdims=True))
        m_run = m_new
    lse = jnp.log(s_run) + m_run
    nll = lse - picked                                                        # (BT, 1)
    loss_sc[...] += jnp.sum(nll * ym, axis=0, keepdims=True)

    @pl.when(step == last_step)
    def _finalize():
        loss_out_ref[...] = jnp.broadcast_to(loss_sc[...], loss_out_ref.shape)


# ---------------------------------------------------------------------------
# Forward pass (mirrors BertAttNMT.forward teacher-forced loss computation).
# ---------------------------------------------------------------------------
def forward(p, x_data, x_mask, x_segm, y_data, y_mask, batch_tile=BATCH_TILE):
    # TODO(synk): BertModel.from_pretrained('bert-base-uncased') has no Pallas
    # equivalent; replaced by a deterministic synthetic token+segment embedding
    # encoder producing ctx of shape (Tx, Bn, Ec).
    ctx = jnp.tanh(p["tok_table"][x_data] + p["seg_table"][x_segm])   # (Tx, Bn, Ec)
    Tx, Bn, Ec = ctx.shape
    Ty = y_data.shape[0]
    W = p["emb"].shape[1]
    D = p["w_h0"].shape[1]
    V = p["emb"].shape[0]

    BT = batch_tile
    assert Bn % BT == 0 and BT % 8 == 0
    nbt = Bn // BT
    assert V % V_TILE == 0

    bf = lambda a: a.astype(jnp.bfloat16)

    # Batch-major layouts (batch on sublanes; no trailing-1 padded dims).
    ctx_bm = jnp.transpose(ctx, (1, 0, 2))               # (Bn, Tx, Ec) f32
    xm_bm = x_mask.T                                     # (Bn, Tx)     f32
    ytgt_bm = y_data.T.astype(jnp.int32)                 # (Bn, Ty)     i32
    ymask_bm = y_mask.T                                  # (Bn, Ty)     f32

    # Teacher forcing: previous-token embeddings for all steps, gathered once.
    y_prev = jnp.concatenate([jnp.zeros((1, Bn), jnp.int32), y_data[:-1]], axis=0)
    yemb_all = bf(p["emb"][y_prev])                      # (Ty, Bn, W)

    # Stacked weights (built once; all in-kernel split offsets are 128-aligned).
    # TODO(synk): real checkpoints need the readout columns de-interleaved
    # (view(B, W, 2).max) to match this [w_re | w_ro] split, and the stacking
    # offsets padded to the sublane pack when Ec/W/D are not multiples of 16.
    w_lstm = bf(jnp.concatenate([p["w_ih"], p["w_hh"]], axis=0))       # (W+Ec+D, 4D)
    w_read = bf(jnp.concatenate([p["w_re"], p["w_ro"]], axis=1))       # (Ec+D+W, 2W)
    b_read = jnp.concatenate([p["b_re"], p["b_ro"]], axis=1)           # (1, 2W)
    embT = bf(p["emb"].T)                                # (W, V): MXU-native (K, N)

    args = (ctx_bm, xm_bm, yemb_all, ytgt_bm, ymask_bm,
            p["w_h0"], p["b_h0"], p["w_c0"], p["b_c0"],
            bf(p["w_att1"]), p["b_att1"], p["w_att2"], p["b_att2"],
            w_lstm, p["b_lstm"], w_read, b_read,
            embT, p["b_logit"])

    def cspec(shape):
        nd = len(shape)
        return pl.BlockSpec(shape, lambda b, t, nd=nd: (0,) * nd)

    # NOTE: constant-index weight blocks would ideally be single-buffered
    # (pipeline_mode=pl.Buffered(1)) or staged once from pl.ANY to halve their
    # resident VMEM footprint at full scale; left default-buffered here.
    in_specs = [
        pl.BlockSpec((BT, Tx, Ec), lambda b, t: (b, 0, 0)),   # ctx (batch tiled)
        pl.BlockSpec((BT, Tx), lambda b, t: (b, 0)),          # source mask
        pl.BlockSpec((Ty, BT, W), lambda b, t: (0, b, 0)),    # prev-token embeddings
        pl.BlockSpec((BT, Ty), lambda b, t: (b, 0)),          # targets
        pl.BlockSpec((BT, Ty), lambda b, t: (b, 0)),          # target mask
    ] + [cspec(a.shape) for a in args[5:]]

    partials = pl.pallas_call(
        _fused_decoder_kernel,
        out_shape=jax.ShapeDtypeStruct((nbt * 8, 128), jnp.float32),
        grid_spec=pltpu.PrefetchScalarGridSpec(
            num_scalar_prefetch=0,
            grid=(nbt, Ty),
            in_specs=in_specs,
            out_specs=pl.BlockSpec((8, 128), lambda b, t: (b, 0)),
            scratch_shapes=[
                pltpu.VMEM((BT, Tx, p["w_att1"].shape[1]), jnp.float32),  # ctx @ Watt1
                pltpu.VMEM((Ty, BT, p["w_att1"].shape[1]), jnp.float32),  # yemb @ Watt1
                pltpu.VMEM((BT, D), jnp.float32),                         # ht carry
                pltpu.VMEM((BT, D), jnp.float32),                         # ct carry
                pltpu.VMEM((1, 1), jnp.float32),                          # loss acc
            ]),
        compiler_params=pltpu.CompilerParams(
            dimension_semantics=("parallel", "arbitrary"),
            # leave headroom below the 64 MiB v7x per-TC VMEM capacity
            vmem_limit_bytes=48 * 1024 * 1024),
    )(*args)

    # One partial loss per batch tile lives in row 0 of each (8,128) block.
    return jnp.sum(partials[::8, 0]) / Bn


# ---------------------------------------------------------------------------
# Pure-JAX f32 reference (same math, concatenation form) for correctness check.
# ---------------------------------------------------------------------------
def ref_forward(p, x_data, x_mask, x_segm, y_data, y_mask):
    ctx = jnp.tanh(p["tok_table"][x_data] + p["seg_table"][x_segm])
    xm = x_mask
    Tx, Bn, Ec = ctx.shape
    ctx_mean = jnp.sum(ctx * xm[:, :, None], axis=0) / jnp.sum(xm, axis=0)[:, None]
    ht = jnp.tanh(ctx_mean @ p["w_h0"] + p["b_h0"])
    ct = jnp.tanh(ctx_mean @ p["w_c0"] + p["b_c0"])
    Ty, _ = y_data.shape
    W = p["emb"].shape[1]
    D = ht.shape[1]
    yt = jnp.zeros((Bn,), dtype=jnp.int32)
    loss = 0.0
    for yi in range(Ty):
        yemb = p["emb"][yt]
        att_in = jnp.concatenate(
            [ctx, jnp.broadcast_to(yemb[None], (Tx, Bn, W)),
             jnp.broadcast_to(ht[None], (Tx, Bn, D))], axis=2)
        att1 = jnp.tanh(att_in @ p["w_att1"] + p["b_att1"])
        att2 = jnp.sum(att1 * p["w_att2"][None], axis=-1) + p["b_att2"][0, 0]
        att2 = att2 * xm
        att2 = att2 - jnp.max(att2)
        alpha = jnp.exp(att2) * xm
        alpha = alpha / (jnp.sum(alpha, axis=0, keepdims=True) + 1e-15)
        ctx_t = jnp.sum(alpha[:, :, None] * ctx, axis=0)
        dec_in = jnp.concatenate([yemb, ctx_t], axis=1)
        gates = dec_in @ p["w_ih"] + ht @ p["w_hh"] + p["b_lstm"]
        i_g = jax.nn.sigmoid(gates[:, :D]); f_g = jax.nn.sigmoid(gates[:, D:2*D])
        g_g = jnp.tanh(gates[:, 2*D:3*D]); o_g = jax.nn.sigmoid(gates[:, 3*D:])
        ct = f_g * ct + i_g * g_g
        ht = o_g * jnp.tanh(ct)
        readin = jnp.concatenate([ctx_t, ht, yemb], axis=1)
        read_max = jnp.maximum(readin @ p["w_re"] + p["b_re"],
                               readin @ p["w_ro"] + p["b_ro"])
        logit = read_max @ p["emb"].T + p["b_logit"]
        logp = jax.nn.log_softmax(logit, axis=1)
        nll = -jnp.take_along_axis(logp, y_data[yi][:, None], axis=1)[:, 0]
        loss = loss + jnp.sum(nll * y_mask[yi]) / Bn
        yt = y_data[yi]
    return loss


def make_params(key):
    ks = jax.random.split(key, 20)
    s = 0.05
    n = lambda k, shp: jax.random.normal(k, shp, jnp.float32) * s
    return {
        "tok_table": n(ks[0], (SRC_VOCAB, EC)),
        "seg_table": n(ks[1], (2, EC)),
        "emb":       n(ks[2], (VOCAB, WEMB)),        # dec_emb.weight == logitout.weight
        "w_h0": n(ks[3], (EC, DDEC)),   "b_h0": n(ks[4], (1, DDEC)),
        "w_c0": n(ks[5], (EC, DDEC)),   "b_c0": n(ks[6], (1, DDEC)),
        "w_att1": n(ks[7], (EC + WEMB + DDEC, DATT)), "b_att1": n(ks[8], (1, DATT)),
        "w_att2": n(ks[9], (1, DATT)),  "b_att2": n(ks[10], (1, 1)),
        "w_ih": n(ks[11], (WEMB + EC, 4 * DDEC)),
        "w_hh": n(ks[12], (DDEC, 4 * DDEC)),
        "b_lstm": n(ks[13], (1, 4 * DDEC)),           # b_ih + b_hh folded together
        "w_re": n(ks[14], (EC + DDEC + WEMB, WEMB)),  # even maxout columns
        "w_ro": n(ks[15], (EC + DDEC + WEMB, WEMB)),  # odd  maxout columns
        "b_re": n(ks[16], (1, WEMB)), "b_ro": n(ks[17], (1, WEMB)),
        "b_logit": n(ks[18], (1, VOCAB)),
    }


if __name__ == "__main__":
    key = jax.random.PRNGKey(0)
    kp, k1, k2, k3, k4, k5 = jax.random.split(key, 6)
    params = make_params(kp)

    x_data = jax.random.randint(k1, (TX, BN), 0, SRC_VOCAB, dtype=jnp.int32)
    x_segm = jax.random.randint(k2, (TX, BN), 0, 2, dtype=jnp.int32)
    x_mask = (jax.random.uniform(k3, (TX, BN)) < 0.8).astype(jnp.float32)
    x_mask = x_mask.at[0].set(1.0)                     # ensure nonzero mask sums
    y_data = jax.random.randint(k4, (TY, BN), 0, VOCAB, dtype=jnp.int32)
    y_mask = (jax.random.uniform(k5, (TY, BN)) < 0.9).astype(jnp.float32)

    loss = jax.jit(forward)(params, x_data, x_mask, x_segm, y_data, y_mask)
    jax.block_until_ready(loss)

    loss_ref = ref_forward(params, x_data, x_mask, x_segm, y_data, y_mask)
    jax.block_until_ready(loss_ref)

    assert jnp.isfinite(loss), "non-finite loss"
    rel = abs(float(loss) - float(loss_ref)) / max(1.0, abs(float(loss_ref)))
    assert rel <= 2e-2, f"mismatch: pallas={float(loss)} ref={float(loss_ref)}"
    print("KERNEL_OK")
</pallas_src>

<mosaic_0001>
module attributes {stable_mosaic.version = 11 : i64} {
  func.func @_fused_decoder_kernel(%arg0: i32, %arg1: i32, %arg2: memref<16x8x128xf32, #tpu.memory_space<vmem>>, %arg3: memref<16x8xf32, #tpu.memory_space<vmem>>, %arg4: memref<4x16x128xbf16, #tpu.memory_space<vmem>>, %arg5: memref<16x4xi32, #tpu.memory_space<vmem>>, %arg6: memref<16x4xf32, #tpu.memory_space<vmem>>, %arg7: memref<128x128xf32, #tpu.memory_space<vmem>>, %arg8: memref<1x128xf32, #tpu.memory_space<vmem>>, %arg9: memref<128x128xf32, #tpu.memory_space<vmem>>, %arg10: memref<1x128xf32, #tpu.memory_space<vmem>>, %arg11: memref<384x128xbf16, #tpu.memory_space<vmem>>, %arg12: memref<1x128xf32, #tpu.memory_space<vmem>>, %arg13: memref<1x128xf32, #tpu.memory_space<vmem>>, %arg14: memref<1x1xf32, #tpu.memory_space<vmem>>, %arg15: memref<384x512xbf16, #tpu.memory_space<vmem>>, %arg16: memref<1x512xf32, #tpu.memory_space<vmem>>, %arg17: memref<384x256xbf16, #tpu.memory_space<vmem>>, %arg18: memref<1x256xf32, #tpu.memory_space<vmem>>, %arg19: memref<128x256xbf16, #tpu.memory_space<vmem>>, %arg20: memref<1x256xf32, #tpu.memory_space<vmem>>, %arg21: memref<8x128xf32, #tpu.memory_space<vmem>>, %arg22: memref<16x8x128xf32, #tpu.memory_space<vmem>>, %arg23: memref<4x16x128xf32, #tpu.memory_space<vmem>>, %arg24: memref<16x128xf32, #tpu.memory_space<vmem>>, %arg25: memref<16x128xf32, #tpu.memory_space<vmem>>, %arg26: memref<1x1xf32, #tpu.memory_space<vmem>>) attributes {dimension_semantics = [#tpu.dimension_semantics<parallel>, #tpu.dimension_semantics<arbitrary>], iteration_bounds = array<i64: 2, 4>, scalar_prefetch = 0 : i64, scratch_operands = 5 : i64, tpu.core_type = #tpu.core_type<tc>, window_params = [{transform_indices = @transform_0, window_bounds = array<i64: 16, 8, 128>}, {transform_indices = @transform_1, window_bounds = array<i64: 16, 8>}, {transform_indices = @transform_2, window_bounds = array<i64: 4, 16, 128>}, {transform_indices = @transform_3, window_bounds = array<i64: 16, 4>}, {transform_indices = @transform_4, window_bounds = array<i64: 16, 4>}, {pipeline_mode = #tpu.pipeline_mode<synchronous>, transform_indices = @transform_5, window_bounds = array<i64: 128, 128>}, {pipeline_mode = #tpu.pipeline_mode<synchronous>, transform_indices = @transform_6, window_bounds = array<i64: 1, 128>}, {pipeline_mode = #tpu.pipeline_mode<synchronous>, transform_indices = @transform_7, window_bounds = array<i64: 128, 128>}, {pipeline_mode = #tpu.pipeline_mode<synchronous>, transform_indices = @transform_8, window_bounds = array<i64: 1, 128>}, {pipeline_mode = #tpu.pipeline_mode<synchronous>, transform_indices = @transform_9, window_bounds = array<i64: 384, 128>}, {pipeline_mode = #tpu.pipeline_mode<synchronous>, transform_indices = @transform_10, window_bounds = array<i64: 1, 128>}, {pipeline_mode = #tpu.pipeline_mode<synchronous>, transform_indices = @transform_11, window_bounds = array<i64: 1, 128>}, {pipeline_mode = #tpu.pipeline_mode<synchronous>, transform_indices = @transform_12, window_bounds = array<i64: 1, 1>}, {pipeline_mode = #tpu.pipeline_mode<synchronous>, transform_indices = @transform_13, window_bounds = array<i64: 384, 512>}, {pipeline_mode = #tpu.pipeline_mode<synchronous>, transform_indices = @transform_14, window_bounds = array<i64: 1, 512>}, {pipeline_mode = #tpu.pipeline_mode<synchronous>, transform_indices = @transform_15, window_bounds = array<i64: 384, 256>}, {pipeline_mode = #tpu.pipeline_mode<synchronous>, transform_indices = @transform_16, window_bounds = array<i64: 1, 256>}, {pipeline_mode = #tpu.pipeline_mode<synchronous>, transform_indices = @transform_17, window_bounds = array<i64: 128, 256>}, {pipeline_mode = #tpu.pipeline_mode<synchronous>, transform_indices = @transform_18, window_bounds = array<i64: 1, 256>}, {transform_indices = @transform_19, window_bounds = array<i64: 8, 128>}]} {
    %c0 = arith.constant 0 : index
    %c0_0 = arith.constant 0 : index
    %c0_1 = arith.constant 0 : index
    %0 = vector.load %arg2[%c0, %c0_0, %c0_1] : memref<16x8x128xf32, #tpu.memory_space<vmem>>, vector<16x8x128xf32>
    %c0_2 = arith.constant 0 : index
    %c0_3 = arith.constant 0 : index
    %1 = vector.load %arg3[%c0_2, %c0_3] : memref<16x8xf32, #tpu.memory_space<vmem>>, vector<16x8xf32>
    %c0_i32 = arith.constant 0 : i32
    %2 = arith.cmpi eq, %arg1, %c0_i32 : i32
    %3 = arith.extui %2 : i1 to i32
    %c0_i32_4 = arith.constant 0 : i32
    %4 = arith.cmpi ne, %3, %c0_i32_4 : i32
    scf.if %4 {
      %cst_92 = arith.constant dense<0.000000e+00> : vector<16xf32>
      %192 = vector.multi_reduction <add>, %1, %cst_92 [1] : vector<16x8xf32> to vector<16xf32>
      %193 = vector.shape_cast %192 : vector<16xf32> to vector<16x1xf32>
      %194 = tpu.reciprocal %193 {approx = true} : vector<16x1xf32> -> vector<16x1xf32>
      %195 = vector.shape_cast %1 : vector<16x8xf32> to vector<16x8x1xf32>
      %196 = vector.broadcast %195 : vector<16x8x1xf32> to vector<16x8x128xf32>
      %197 = arith.mulf %0, %196 : vector<16x8x128xf32>
      %cst_93 = arith.constant dense<0.000000e+00> : vector<16x128xf32>
      %198 = vector.multi_reduction <add>, %197, %cst_93 [1] : vector<16x8x128xf32> to vector<16x128xf32>
      %199 = vector.broadcast %194 : vector<16x1xf32> to vector<16x128xf32>
      %200 = arith.mulf %198, %199 : vector<16x128xf32>
      %c0_94 = arith.constant 0 : index
      %c0_95 = arith.constant 0 : index
      %201 = vector.load %arg7[%c0_94, %c0_95] : memref<128x128xf32, #tpu.memory_space<vmem>>, vector<128x128xf32>
      %cst_96 = arith.constant dense<0.000000e+00> : vector<16x128xf32>
      %202 = tpu.matmul %200, %201, %cst_96 {dimension_numbers = #tpu.dot_dimension_numbers<[1], [0], [0], [1], [0, 0, 1, 1], [], []>} : vector<16x128xf32>, vector<128x128xf32>, vector<16x128xf32> -> vector<16x128xf32>
      %c0_97 = arith.constant 0 : index
      %c0_98 = arith.constant 0 : index
      %203 = vector.load %arg8[%c0_97, %c0_98] : memref<1x128xf32, #tpu.memory_space<vmem>>, vector<1x128xf32>
      %204 = vector.broadcast %203 : vector<1x128xf32> to vector<16x128xf32>
      %205 = arith.addf %202, %204 : vector<16x128xf32>
      %206 = math.tanh %205 : vector<16x128xf32>
      %c0_99 = arith.constant 0 : index
      %c0_100 = arith.constant 0 : index
      %207 = vector.load %arg24[%c0_99, %c0_100] : memref<16x128xf32, #tpu.memory_space<vmem>>, vector<16x128xf32>
      tpu.vector_store %arg24[%c0_99, %c0_100], %206 {strides = array<i32>} : memref<16x128xf32, #tpu.memory_space<vmem>>, vector<16x128xf32>,
      %c0_101 = arith.constant 0 : index
      %c0_102 = arith.constant 0 : index
      %208 = vector.load %arg9[%c0_101, %c0_102] : memref<128x128xf32, #tpu.memory_space<vmem>>, vector<128x128xf32>
      %cst_103 = arith.constant dense<0.000000e+00> : vector<16x128xf32>
      %209 = tpu.matmul %200, %208, %cst_103 {dimension_numbers = #tpu.dot_dimension_numbers<[1], [0], [0], [1], [0, 0, 1, 1], [], []>} : vector<16x128xf32>, vector<128x128xf32>, vector<16x128xf32> -> vector<16x128xf32>
      %c0_104 = arith.constant 0 : index
      %c0_105 = arith.constant 0 : index
      %210 = vector.load %arg10[%c0_104, %c0_105] : memref<1x128xf32, #tpu.memory_space<vmem>>, vector<1x128xf32>
      %211 = vector.broadcast %210 : vector<1x128xf32> to vector<16x128xf32>
      %212 = arith.addf %209, %211 : vector<16x128xf32>
      %213 = math.tanh %212 : vector<16x128xf32>
      %c0_106 = arith.constant 0 : index
      %c0_107 = arith.constant 0 : index
      %214 = vector.load %arg25[%c0_106, %c0_107] : memref<16x128xf32, #tpu.memory_space<vmem>>, vector<16x128xf32>
      tpu.vector_store %arg25[%c0_106, %c0_107], %213 {strides = array<i32>} : memref<16x128xf32, #tpu.memory_space<vmem>>, vector<16x128xf32>,
      %215 = vector.shape_cast %0 : vector<16x8x128xf32> to vector<128x128xf32>
      %216 = arith.truncf %215 : vector<128x128xf32> to vector<128x128xbf16>
      %c0_108 = arith.constant 0 : index
      %c0_109 = arith.constant 0 : index
      %217 = vector.load %arg11[%c0_108, %c0_109] : memref<384x128xbf16, #tpu.memory_space<vmem>>, vector<128x128xbf16>
      %cst_110 = arith.constant dense<0.000000e+00> : vector<128x128xf32>
      %218 = tpu.matmul %216, %217, %cst_110 {dimension_numbers = #tpu.dot_dimension_numbers<[1], [0], [0], [1], [0, 0, 1, 1], [], []>} : vector<128x128xbf16>, vector<128x128xbf16>, vector<128x128xf32> -> vector<128x128xf32>
      %219 = vector.shape_cast %218 : vector<128x128xf32> to vector<16x8x128xf32>
      %c0_111 = arith.constant 0 : index
      %c0_112 = arith.constant 0 : index
      %c0_113 = arith.constant 0 : index
      %220 = vector.load %arg22[%c0_111, %c0_112, %c0_113] : memref<16x8x128xf32, #tpu.memory_space<vmem>>, vector<16x8x128xf32>
      tpu.vector_store %arg22[%c0_111, %c0_112, %c0_113], %219 {strides = array<i32>} : memref<16x8x128xf32, #tpu.memory_space<vmem>>, vector<16x8x128xf32>,
      %c0_114 = arith.constant 0 : index
      %c0_115 = arith.constant 0 : index
      %c0_116 = arith.constant 0 : index
      %221 = vector.load %arg4[%c0_114, %c0_115, %c0_116] : memref<4x16x128xbf16, #tpu.memory_space<vmem>>, vector<4x16x128xbf16>
      %222 = vector.shape_cast %221 : vector<4x16x128xbf16> to vector<64x128xbf16>
      %c128_117 = arith.constant 128 : index
      %c0_118 = arith.constant 0 : index
      %223 = vector.load %arg11[%c128_117, %c0_118] : memref<384x128xbf16, #tpu.memory_space<vmem>>, vector<128x128xbf16>
      %cst_119 = arith.constant dense<0.000000e+00> : vector<64x128xf32>
      %224 = tpu.matmul %222, %223, %cst_119 {dimension_numbers = #tpu.dot_dimension_numbers<[1], [0], [0], [1], [0, 0, 1, 1], [], []>} : vector<64x128xbf16>, vector<128x128xbf16>, vector<64x128xf32> -> vector<64x128xf32>
      %225 = vector.shape_cast %224 : vector<64x128xf32> to vector<4x16x128xf32>
      %c0_120 = arith.constant 0 : index
      %c0_121 = arith.constant 0 : index
      %c0_122 = arith.constant 0 : index
      %226 = vector.load %arg23[%c0_120, %c0_121, %c0_122] : memref<4x16x128xf32, #tpu.memory_space<vmem>>, vector<4x16x128xf32>
      tpu.vector_store %arg23[%c0_120, %c0_121, %c0_122], %225 {strides = array<i32>} : memref<4x16x128xf32, #tpu.memory_space<vmem>>, vector<4x16x128xf32>,
      %cst_123 = arith.constant 0.000000e+00 : f32
      %227 = vector.broadcast %cst_123 : f32 to vector<1x1xf32>
      %c0_124 = arith.constant 0 : index
      %c0_125 = arith.constant 0 : index
      %228 = vector.load %arg26[%c0_124, %c0_125] : memref<1x1xf32, #tpu.memory_space<vmem>>, vector<1x1xf32>
      tpu.vector_store %arg26[%c0_124, %c0_125], %227 {strides = array<i32>} : memref<1x1xf32, #tpu.memory_space<vmem>>, vector<1x1xf32>,
      %cst_126 = arith.constant 0.000000e+00 : f32
      %229 = vector.broadcast %cst_126 : f32 to vector<8x128xf32>
      %c0_127 = arith.constant 0 : index
      %c0_128 = arith.constant 0 : index
      %230 = vector.load %arg21[%c0_127, %c0_128] : memref<8x128xf32, #tpu.memory_space<vmem>>, vector<8x128xf32>
      tpu.vector_store %arg21[%c0_127, %c0_128], %229 {strides = array<i32>} : memref<8x128xf32, #tpu.memory_space<vmem>>, vector<8x128xf32>,
    } else {
    }
    %5 = arith.index_cast %arg1 : i32 to index
    %c0_5 = arith.constant 0 : index
    %c0_6 = arith.constant 0 : index
    %6 = vector.load %arg4[%5, %c0_5, %c0_6] : memref<4x16x128xbf16, #tpu.memory_space<vmem>>, vector<1x16x128xbf16>
    %7 = vector.shape_cast %6 : vector<1x16x128xbf16> to vector<16x128xbf16>
    %c0_7 = arith.constant 0 : index
    %c0_8 = arith.constant 0 : index
    %8 = vector.load %arg24[%c0_7, %c0_8] : memref<16x128xf32, #tpu.memory_space<vmem>>, vector<16x128xf32>
    %c0_9 = arith.constant 0 : index
    %c0_10 = arith.constant 0 : index
    %9 = vector.load %arg25[%c0_9, %c0_10] : memref<16x128xf32, #tpu.memory_space<vmem>>, vector<16x128xf32>
    %10 = arith.truncf %8 : vector<16x128xf32> to vector<16x128xbf16>
    %c256 = arith.constant 256 : index
    %c0_11 = arith.constant 0 : index
    %11 = vector.load %arg11[%c256, %c0_11] : memref<384x128xbf16, #tpu.memory_space<vmem>>, vector<128x128xbf16>
    %cst = arith.constant dense<0.000000e+00> : vector<16x128xf32>
    %12 = tpu.matmul %10, %11, %cst {dimension_numbers = #tpu.dot_dimension_numbers<[1], [0], [0], [1], [0, 0, 1, 1], [], []>} : vector<16x128xbf16>, vector<128x128xbf16>, vector<16x128xf32> -> vector<16x128xf32>
    %c0_12 = arith.constant 0 : index
    %c0_13 = arith.constant 0 : index
    %c0_14 = arith.constant 0 : index
    %13 = vector.load %arg22[%c0_12, %c0_13, %c0_14] : memref<16x8x128xf32, #tpu.memory_space<vmem>>, vector<16x8x128xf32>
    %14 = arith.index_cast %arg1 : i32 to index
    %c0_15 = arith.constant 0 : index
    %c0_16 = arith.constant 0 : index
    %15 = vector.load %arg23[%14, %c0_15, %c0_16] : memref<4x16x128xf32, #tpu.memory_space<vmem>>, vector<1x16x128xf32>
    %16 = vector.shape_cast %15 : vector<1x16x128xf32> to vector<16x128xf32>
    %17 = arith.addf %16, %12 : vector<16x128xf32>
    %c0_17 = arith.constant 0 : index
    %c0_18 = arith.constant 0 : index
    %18 = vector.load %arg12[%c0_17, %c0_18] : memref<1x128xf32, #tpu.memory_space<vmem>>, vector<1x128xf32>
    %19 = vector.broadcast %18 : vector<1x128xf32> to vector<16x128xf32>
    %20 = arith.addf %17, %19 : vector<16x128xf32>
    %21 = vector.shape_cast %20 : vector<16x128xf32> to vector<16x1x128xf32>
    %22 = vector.broadcast %21 : vector<16x1x128xf32> to vector<16x8x128xf32>
    %23 = arith.addf %13, %22 : vector<16x8x128xf32>
    %24 = arith.truncf %23 : vector<16x8x128xf32> to vector<16x8x128xbf16>
    %25 = math.tanh %24 : vector<16x8x128xbf16>
    %c0_19 = arith.constant 0 : index
    %c0_20 = arith.constant 0 : index
    %26 = vector.load %arg13[%c0_19, %c0_20] : memref<1x128xf32, #tpu.memory_space<vmem>>, vector<1x128xf32>
    %27 = vector.shape_cast %26 : vector<1x128xf32> to vector<1x1x128xf32>
    %28 = arith.extf %25 : vector<16x8x128xbf16> to vector<16x8x128xf32>
    %29 = vector.broadcast %27 : vector<1x1x128xf32> to vector<16x8x128xf32>
    %30 = arith.mulf %28, %29 : vector<16x8x128xf32>
    %cst_21 = arith.constant dense<0.000000e+00> : vector<16x8xf32>
    %31 = vector.multi_reduction <add>, %30, %cst_21 [2] : vector<16x8x128xf32> to vector<16x8xf32>
    %c0_22 = arith.constant 0 : index
    %c0_23 = arith.constant 0 : index
    %32 = vector.load %arg14[%c0_22, %c0_23] : memref<1x1xf32, #tpu.memory_space<vmem>>, vector<1x1xf32>
    %33 = vector.broadcast %32 : vector<1x1xf32> to vector<16x8xf32>
    %34 = arith.addf %31, %33 : vector<16x8xf32>
    %35 = arith.mulf %34, %1 : vector<16x8xf32>
    %36 = vector.shape_cast %35 : vector<16x8xf32> to vector<1x16x8xf32>
    %cst_24 = arith.constant dense<0xFF800000> : vector<1xf32>
    %37 = vector.multi_reduction <maximumf>, %36, %cst_24 [1, 2] : vector<1x16x8xf32> to vector<1xf32>
    %38 = vector.shape_cast %37 : vector<1xf32> to vector<1x1x1xf32>
    %39 = vector.extract %38[0, 0, 0] : f32 from vector<1x1x1xf32>
    %40 = vector.broadcast %39 : f32 to vector<16x8xf32>
    %41 = arith.subf %35, %40 : vector<16x8xf32>
    %42 = math.exp %41 : vector<16x8xf32>
    %43 = arith.mulf %42, %1 : vector<16x8xf32>
    %cst_25 = arith.constant dense<0.000000e+00> : vector<16xf32>
    %44 = vector.multi_reduction <add>, %43, %cst_25 [1] : vector<16x8xf32> to vector<16xf32>
    %45 = vector.shape_cast %44 : vector<16xf32> to vector<16x1xf32>
    %cst_26 = arith.constant 1.000000e-15 : f32
    %46 = vector.broadcast %cst_26 : f32 to vector<16x1xf32>
    %47 = arith.addf %45, %46 : vector<16x1xf32>
    %48 = tpu.reciprocal %47 {approx = true} : vector<16x1xf32> -> vector<16x1xf32>
    %49 = vector.broadcast %48 : vector<16x1xf32> to vector<16x8xf32>
    %50 = arith.mulf %43, %49 : vector<16x8xf32>
    %51 = vector.shape_cast %50 : vector<16x8xf32> to vector<16x8x1xf32>
    %52 = vector.broadcast %51 : vector<16x8x1xf32> to vector<16x8x128xf32>
    %53 = arith.mulf %52, %0 : vector<16x8x128xf32>
    %cst_27 = arith.constant dense<0.000000e+00> : vector<16x128xf32>
    %54 = vector.multi_reduction <add>, %53, %cst_27 [1] : vector<16x8x128xf32> to vector<16x128xf32>
    %55 = arith.truncf %54 : vector<16x128xf32> to vector<16x128xbf16>
    %c0_28 = arith.constant 0 : index
    %c0_29 = arith.constant 0 : index
    %56 = vector.load %arg15[%c0_28, %c0_29] : memref<384x512xbf16, #tpu.memory_space<vmem>>, vector<128x512xbf16>
    %cst_30 = arith.constant dense<0.000000e+00> : vector<16x512xf32>
    %57 = tpu.matmul %7, %56, %cst_30 {dimension_numbers = #tpu.dot_dimension_numbers<[1], [0], [0], [1], [0, 0, 1, 1], [], []>} : vector<16x128xbf16>, vector<128x512xbf16>, vector<16x512xf32> -> vector<16x512xf32>
    %c128 = arith.constant 128 : index
    %c0_31 = arith.constant 0 : index
    %58 = vector.load %arg15[%c128, %c0_31] : memref<384x512xbf16, #tpu.memory_space<vmem>>, vector<128x512xbf16>
    %cst_32 = arith.constant dense<0.000000e+00> : vector<16x512xf32>
    %59 = tpu.matmul %55, %58, %cst_32 {dimension_numbers = #tpu.dot_dimension_numbers<[1], [0], [0], [1], [0, 0, 1, 1], [], []>} : vector<16x128xbf16>, vector<128x512xbf16>, vector<16x512xf32> -> vector<16x512xf32>
    %60 = arith.addf %57, %59 : vector<16x512xf32>
    %c256_33 = arith.constant 256 : index
    %c0_34 = arith.constant 0 : index
    %61 = vector.load %arg15[%c256_33, %c0_34] : memref<384x512xbf16, #tpu.memory_space<vmem>>, vector<128x512xbf16>
    %cst_35 = arith.constant dense<0.000000e+00> : vector<16x512xf32>
    %62 = tpu.matmul %10, %61, %cst_35 {dimension_numbers = #tpu.dot_dimension_numbers<[1], [0], [0], [1], [0, 0, 1, 1], [], []>} : vector<16x128xbf16>, vector<128x512xbf16>, vector<16x512xf32> -> vector<16x512xf32>
    %63 = arith.addf %60, %62 : vector<16x512xf32>
    %c0_36 = arith.constant 0 : index
    %c0_37 = arith.constant 0 : index
    %64 = vector.load %arg16[%c0_36, %c0_37] : memref<1x512xf32, #tpu.memory_space<vmem>>, vector<1x512xf32>
    %65 = vector.broadcast %64 : vector<1x512xf32> to vector<16x512xf32>
    %66 = arith.addf %63, %65 : vector<16x512xf32>
    %67 = vector.extract_strided_slice %66 {offsets = [0, 0], sizes = [16, 128], strides = [1, 1]} : vector<16x512xf32> to vector<16x128xf32>
    %68 = arith.negf %67 : vector<16x128xf32>
    %69 = math.exp %68 : vector<16x128xf32>
    %cst_38 = arith.constant 1.000000e+00 : f32
    %70 = vector.broadcast %cst_38 : f32 to vector<16x128xf32>
    %71 = arith.addf %70, %69 : vector<16x128xf32>
    %72 = arith.divf %70, %71 : vector<16x128xf32>
    %73 = vector.extract_strided_slice %66 {offsets = [0, 128], sizes = [16, 128], strides = [1, 1]} : vector<16x512xf32> to vector<16x128xf32>
    %74 = arith.negf %73 : vector<16x128xf32>
    %75 = math.exp %74 : vector<16x128xf32>
    %cst_39 = arith.constant 1.000000e+00 : f32
    %76 = vector.broadcast %cst_39 : f32 to vector<16x128xf32>
    %77 = arith.addf %76, %75 : vector<16x128xf32>
    %78 = arith.divf %76, %77 : vector<16x128xf32>
    %79 = vector.extract_strided_slice %66 {offsets = [0, 256], sizes = [16, 128], strides = [1, 1]} : vector<16x512xf32> to vector<16x128xf32>
    %80 = math.tanh %79 : vector<16x128xf32>
    %81 = vector.extract_strided_slice %66 {offsets = [0, 384], sizes = [16, 128], strides = [1, 1]} : vector<16x512xf32> to vector<16x128xf32>
    %82 = arith.negf %81 : vector<16x128xf32>
    %83 = math.exp %82 : vector<16x128xf32>
    %cst_40 = arith.constant 1.000000e+00 : f32
    %84 = vector.broadcast %cst_40 : f32 to vector<16x128xf32>
    %85 = arith.addf %84, %83 : vector<16x128xf32>
    %86 = arith.divf %84, %85 : vector<16x128xf32>
    %87 = arith.mulf %78, %9 : vector<16x128xf32>
    %88 = arith.mulf %72, %80 : vector<16x128xf32>
    %89 = arith.addf %87, %88 : vector<16x128xf32>
    %90 = math.tanh %89 : vector<16x128xf32>
    %91 = arith.mulf %86, %90 : vector<16x128xf32>
    %c0_41 = arith.constant 0 : index
    %c0_42 = arith.constant 0 : index
    %92 = vector.load %arg24[%c0_41, %c0_42] : memref<16x128xf32, #tpu.memory_space<vmem>>, vector<16x128xf32>
    tpu.vector_store %arg24[%c0_41, %c0_42], %91 {strides = array<i32>} : memref<16x128xf32, #tpu.memory_space<vmem>>, vector<16x128xf32>,
    %c0_43 = arith.constant 0 : index
    %c0_44 = arith.constant 0 : index
    %93 = vector.load %arg25[%c0_43, %c0_44] : memref<16x128xf32, #tpu.memory_space<vmem>>, vector<16x128xf32>
    tpu.vector_store %arg25[%c0_43, %c0_44], %89 {strides = array<i32>} : memref<16x128xf32, #tpu.memory_space<vmem>>, vector<16x128xf32>,
    %94 = arith.truncf %91 : vector<16x128xf32> to vector<16x128xbf16>
    %c0_45 = arith.constant 0 : index
    %c0_46 = arith.constant 0 : index
    %95 = vector.load %arg17[%c0_45, %c0_46] : memref<384x256xbf16, #tpu.memory_space<vmem>>, vector<128x256xbf16>
    %cst_47 = arith.constant dense<0.000000e+00> : vector<16x256xf32>
    %96 = tpu.matmul %55, %95, %cst_47 {dimension_numbers = #tpu.dot_dimension_numbers<[1], [0], [0], [1], [0, 0, 1, 1], [], []>} : vector<16x128xbf16>, vector<128x256xbf16>, vector<16x256xf32> -> vector<16x256xf32>
    %c128_48 = arith.constant 128 : index
    %c0_49 = arith.constant 0 : index
    %97 = vector.load %arg17[%c128_48, %c0_49] : memref<384x256xbf16, #tpu.memory_space<vmem>>, vector<128x256xbf16>
    %cst_50 = arith.constant dense<0.000000e+00> : vector<16x256xf32>
    %98 = tpu.matmul %94, %97, %cst_50 {dimension_numbers = #tpu.dot_dimension_numbers<[1], [0], [0], [1], [0, 0, 1, 1], [], []>} : vector<16x128xbf16>, vector<128x256xbf16>, vector<16x256xf32> -> vector<16x256xf32>
    %99 = arith.addf %96, %98 : vector<16x256xf32>
    %c256_51 = arith.constant 256 : index
    %c0_52 = arith.constant 0 : index
    %100 = vector.load %arg17[%c256_51, %c0_52] : memref<384x256xbf16, #tpu.memory_space<vmem>>, vector<128x256xbf16>
    %cst_53 = arith.constant dense<0.000000e+00> : vector<16x256xf32>
    %101 = tpu.matmul %7, %100, %cst_53 {dimension_numbers = #tpu.dot_dimension_numbers<[1], [0], [0], [1], [0, 0, 1, 1], [], []>} : vector<16x128xbf16>, vector<128x256xbf16>, vector<16x256xf32> -> vector<16x256xf32>
    %102 = arith.addf %99, %101 : vector<16x256xf32>
    %c0_54 = arith.constant 0 : index
    %c0_55 = arith.constant 0 : index
    %103 = vector.load %arg18[%c0_54, %c0_55] : memref<1x256xf32, #tpu.memory_space<vmem>>, vector<1x256xf32>
    %104 = vector.broadcast %103 : vector<1x256xf32> to vector<16x256xf32>
    %105 = arith.addf %102, %104 : vector<16x256xf32>
    %106 = vector.extract_strided_slice %105 {offsets = [0, 0], sizes = [16, 128], strides = [1, 1]} : vector<16x256xf32> to vector<16x128xf32>
    %107 = vector.extract_strided_slice %105 {offsets = [0, 128], sizes = [16, 128], strides = [1, 1]} : vector<16x256xf32> to vector<16x128xf32>
    %108 = arith.maximumf %106, %107 : vector<16x128xf32>
    %109 = arith.truncf %108 : vector<16x128xf32> to vector<16x128xbf16>
    %110 = tpu.iota {dimensions = array<i32: 1>} : vector<16x4xi32>
    %111 = vector.broadcast %arg1 : i32 to vector<16x4xi32>
    %112 = arith.cmpi eq, %110, %111 : vector<16x4xi32>
    %c0_56 = arith.constant 0 : index
    %c0_57 = arith.constant 0 : index
    %113 = vector.load %arg5[%c0_56, %c0_57] : memref<16x4xi32, #tpu.memory_space<vmem>>, vector<16x4xi32>
    %c0_i32_58 = arith.constant 0 : i32
    %114 = vector.broadcast %c0_i32_58 : i32 to vector<16x4xi32>
    %115 = arith.select %112, %113, %114 : vector<16x4xi1>, vector<16x4xi32>
    %cst_59 = arith.constant dense<0> : vector<16xi32>
    %116 = vector.multi_reduction <add>, %115, %cst_59 [1] : vector<16x4xi32> to vector<16xi32>
    %117 = vector.shape_cast %116 : vector<16xi32> to vector<16x1xi32>
    %c0_60 = arith.constant 0 : index
    %c0_61 = arith.constant 0 : index
    %118 = vector.load %arg6[%c0_60, %c0_61] : memref<16x4xf32, #tpu.memory_space<vmem>>, vector<16x4xf32>
    %cst_62 = arith.constant 0.000000e+00 : f32
    %119 = vector.broadcast %cst_62 : f32 to vector<16x4xf32>
    %120 = arith.select %112, %118, %119 : vector<16x4xi1>, vector<16x4xf32>
    %cst_63 = arith.constant dense<0.000000e+00> : vector<16xf32>
    %121 = vector.multi_reduction <add>, %120, %cst_63 [1] : vector<16x4xf32> to vector<16xf32>
    %122 = vector.shape_cast %121 : vector<16xf32> to vector<16x1xf32>
    %cst_64 = arith.constant 0xFF800000 : f32
    %123 = vector.broadcast %cst_64 : f32 to vector<16x1xf32>
    %cst_65 = arith.constant 0.000000e+00 : f32
    %124 = vector.broadcast %cst_65 : f32 to vector<16x1xf32>
    %cst_66 = arith.constant 0.000000e+00 : f32
    %125 = vector.broadcast %cst_66 : f32 to vector<16x1xf32>
    %c0_67 = arith.constant 0 : index
    %c0_68 = arith.constant 0 : index
    %126 = vector.load %arg19[%c0_67, %c0_68] : memref<128x256xbf16, #tpu.memory_space<vmem>>, vector<128x128xbf16>
    %cst_69 = arith.constant dense<0.000000e+00> : vector<16x128xf32>
    %127 = tpu.matmul %109, %126, %cst_69 {dimension_numbers = #tpu.dot_dimension_numbers<[1], [0], [0], [1], [0, 0, 1, 1], [], []>} : vector<16x128xbf16>, vector<128x128xbf16>, vector<16x128xf32> -> vector<16x128xf32>
    %c0_70 = arith.constant 0 : index
    %c0_71 = arith.constant 0 : index
    %128 = vector.load %arg20[%c0_70, %c0_71] : memref<1x256xf32, #tpu.memory_space<vmem>>, vector<1x128xf32>
    %129 = vector.broadcast %128 : vector<1x128xf32> to vector<16x128xf32>
    %130 = arith.addf %127, %129 : vector<16x128xf32>
    %131 = tpu.iota {dimensions = array<i32: 1>} : vector<16x128xi32>
    %c0_i32_72 = arith.constant 0 : i32
    %132 = vector.broadcast %c0_i32_72 : i32 to vector<16x128xi32>
    %133 = arith.addi %131, %132 : vector<16x128xi32>
    %134 = vector.broadcast %117 : vector<16x1xi32> to vector<16x128xi32>
    %135 = arith.cmpi eq, %133, %134 : vector<16x128xi32>
    %cst_73 = arith.constant 0.000000e+00 : f32
    %136 = vector.broadcast %cst_73 : f32 to vector<16x128xf32>
    %137 = arith.select %135, %130, %136 : vector<16x128xi1>, vector<16x128xf32>
    %cst_74 = arith.constant dense<0.000000e+00> : vector<16xf32>
    %138 = vector.multi_reduction <add>, %137, %cst_74 [1] : vector<16x128xf32> to vector<16xf32>
    %139 = vector.shape_cast %138 : vector<16xf32> to vector<16x1xf32>
    %140 = arith.addf %125, %139 : vector<16x1xf32>
    %cst_75 = arith.constant dense<0xFF800000> : vector<16xf32>
    %141 = vector.multi_reduction <maximumf>, %130, %cst_75 [1] : vector<16x128xf32> to vector<16xf32>
    %142 = vector.shape_cast %141 : vector<16xf32> to vector<16x1xf32>
    %143 = arith.maximumf %123, %142 : vector<16x1xf32>
    %144 = arith.subf %123, %143 : vector<16x1xf32>
    %145 = math.exp %144 : vector<16x1xf32>
    %146 = arith.mulf %124, %145 : vector<16x1xf32>
    %147 = vector.broadcast %143 : vector<16x1xf32> to vector<16x128xf32>
    %148 = arith.subf %130, %147 : vector<16x128xf32>
    %149 = math.exp %148 : vector<16x128xf32>
    %cst_76 = arith.constant dense<0.000000e+00> : vector<16xf32>
    %150 = vector.multi_reduction <add>, %149, %cst_76 [1] : vector<16x128xf32> to vector<16xf32>
    %151 = vector.shape_cast %150 : vector<16xf32> to vector<16x1xf32>
    %152 = arith.addf %146, %151 : vector<16x1xf32>
    %c0_77 = arith.constant 0 : index
    %c128_78 = arith.constant 128 : index
    %153 = vector.load %arg19[%c0_77, %c128_78] : memref<128x256xbf16, #tpu.memory_space<vmem>>, vector<128x128xbf16>
    %cst_79 = arith.constant dense<0.000000e+00> : vector<16x128xf32>
    %154 = tpu.matmul %109, %153, %cst_79 {dimension_numbers = #tpu.dot_dimension_numbers<[1], [0], [0], [1], [0, 0, 1, 1], [], []>} : vector<16x128xbf16>, vector<128x128xbf16>, vector<16x128xf32> -> vector<16x128xf32>
    %c0_80 = arith.constant 0 : index
    %c128_81 = arith.constant 128 : index
    %155 = vector.load %arg20[%c0_80, %c128_81] : memref<1x256xf32, #tpu.memory_space<vmem>>, vector<1x128xf32>
    %156 = vector.broadcast %155 : vector<1x128xf32> to vector<16x128xf32>
    %157 = arith.addf %154, %156 : vector<16x128xf32>
    %158 = tpu.iota {dimensions = array<i32: 1>} : vector<16x128xi32>
    %c128_i32 = arith.constant 128 : i32
    %159 = vector.broadcast %c128_i32 : i32 to vector<16x128xi32>
    %160 = arith.addi %158, %159 : vector<16x128xi32>
    %161 = vector.broadcast %117 : vector<16x1xi32> to vector<16x128xi32>
    %162 = arith.cmpi eq, %160, %161 : vector<16x128xi32>
    %cst_82 = arith.constant 0.000000e+00 : f32
    %163 = vector.broadcast %cst_82 : f32 to vector<16x128xf32>
    %164 = arith.select %162, %157, %163 : vector<16x128xi1>, vector<16x128xf32>
    %cst_83 = arith.constant dense<0.000000e+00> : vector<16xf32>
    %165 = vector.multi_reduction <add>, %164, %cst_83 [1] : vector<16x128xf32> to vector<16xf32>
    %166 = vector.shape_cast %165 : vector<16xf32> to vector<16x1xf32>
    %167 = arith.addf %140, %166 : vector<16x1xf32>
    %cst_84 = arith.constant dense<0xFF800000> : vector<16xf32>
    %168 = vector.multi_reduction <maximumf>, %157, %cst_84 [1] : vector<16x128xf32> to vector<16xf32>
    %169 = vector.shape_cast %168 : vector<16xf32> to vector<16x1xf32>
    %170 = arith.maximumf %143, %169 : vector<16x1xf32>
    %171 = arith.subf %143, %170 : vector<16x1xf32>
    %172 = math.exp %171 : vector<16x1xf32>
    %173 = arith.mulf %152, %172 : vector<16x1xf32>
    %174 = vector.broadcast %170 : vector<16x1xf32> to vector<16x128xf32>
    %175 = arith.subf %157, %174 : vector<16x128xf32>
    %176 = math.exp %175 : vector<16x128xf32>
    %cst_85 = arith.constant dense<0.000000e+00> : vector<16xf32>
    %177 = vector.multi_reduction <add>, %176, %cst_85 [1] : vector<16x128xf32> to vector<16xf32>
    %178 = vector.shape_cast %177 : vector<16xf32> to vector<16x1xf32>
    %179 = arith.addf %173, %178 : vector<16x1xf32>
    %180 = math.log %179 : vector<16x1xf32>
    %181 = arith.addf %180, %170 : vector<16x1xf32>
    %182 = arith.subf %181, %167 : vector<16x1xf32>
    %c0_86 = arith.constant 0 : index
    %c0_87 = arith.constant 0 : index
    %183 = vector.load %arg26[%c0_86, %c0_87] : memref<1x1xf32, #tpu.memory_space<vmem>>, vector<1x1xf32>
    %184 = arith.mulf %182, %122 : vector<16x1xf32>
    %cst_88 = arith.constant dense<0.000000e+00> : vector<1xf32>
    %185 = vector.multi_reduction <add>, %184, %cst_88 [0] : vector<16x1xf32> to vector<1xf32>
    %186 = vector.shape_cast %185 : vector<1xf32> to vector<1x1xf32>
    %187 = arith.addf %183, %186 : vector<1x1xf32>
    %c0_89 = arith.constant 0 : index
    %c0_90 = arith.constant 0 : index
    %188 = vector.load %arg26[%c0_89, %c0_90] : memref<1x1xf32, #tpu.memory_space<vmem>>, vector<1x1xf32>
    tpu.vector_store %arg26[%c0_89, %c0_90], %187 {strides = array<i32>} : memref<1x1xf32, #tpu.memory_space<vmem>>, vector<1x1xf32>,
    %c3_i32 = arith.constant 3 : i32
    %189 = arith.cmpi eq, %arg1, %c3_i32 : i32
    %190 = arith.extui %189 : i1 to i32
    %c0_i32_91 = arith.constant 0 : i32
    %191 = arith.cmpi ne, %190, %c0_i32_91 : i32
    scf.if %191 {
      %c0_92 = arith.constant 0 : index
      %c0_93 = arith.constant 0 : index
      %192 = vector.load %arg26[%c0_92, %c0_93] : memref<1x1xf32, #tpu.memory_space<vmem>>, vector<1x1xf32>
      %193 = vector.shape_cast %192 : vector<1x1xf32> to vector<1x1xf32>
      %194 = vector.broadcast %193 : vector<1x1xf32> to vector<8x128xf32>
      %c0_94 = arith.constant 0 : index
      %c0_95 = arith.constant 0 : index
      %195 = vector.load %arg21[%c0_94, %c0_95] : memref<8x128xf32, #tpu.memory_space<vmem>>, vector<8x128xf32>
      tpu.vector_store %arg21[%c0_94, %c0_95], %194 {strides = array<i32>} : memref<8x128xf32, #tpu.memory_space<vmem>>, vector<8x128xf32>,
    } else {
    }
    return
  }
  func.func @transform_0(%arg0: i32, %arg1: i32) -> (i32, i32, i32) {
    %c0_i32 = arith.constant 0 : i32
    %c0_i32_0 = arith.constant 0 : i32
    %c0_i32_1 = arith.constant 0 : i32
    return %arg0, %c0_i32, %c0_i32_0 : i32, i32, i32
  }
  func.func @transform_1(%arg0: i32, %arg1: i32) -> (i32, i32) {
    %c0_i32 = arith.constant 0 : i32
    %c0_i32_0 = arith.constant 0 : i32
    return %arg0, %c0_i32 : i32, i32
  }
  func.func @transform_2(%arg0: i32, %arg1: i32) -> (i32, i32, i32) {
    %c0_i32 = arith.constant 0 : i32
    %c0_i32_0 = arith.constant 0 : i32
    %c0_i32_1 = arith.constant 0 : i32
    return %c0_i32, %arg0, %c0_i32_0 : i32, i32, i32
  }
  func.func @transform_3(%arg0: i32, %arg1: i32) -> (i32, i32) {
    %c0_i32 = arith.constant 0 : i32
    %c0_i32_0 = arith.constant 0 : i32
    return %arg0, %c0_i32 : i32, i32
  }
  func.func @transform_4(%arg0: i32, %arg1: i32) -> (i32, i32) {
    %c0_i32 = arith.constant 0 : i32
    %c0_i32_0 = arith.constant 0 : i32
    return %arg0, %c0_i32 : i32, i32
  }
  func.func @transform_5(%arg0: i32, %arg1: i32) -> (i32, i32) {
    %c0_i32 = arith.constant 0 : i32
    %c0_i32_0 = arith.constant 0 : i32
    %c0_i32_1 = arith.constant 0 : i32
    return %c0_i32, %c0_i32_0 : i32, i32
  }
  func.func @transform_6(%arg0: i32, %arg1: i32) -> (i32, i32) {
    %c0_i32 = arith.constant 0 : i32
    %c0_i32_0 = arith.constant 0 : i32
    %c0_i32_1 = arith.constant 0 : i32
    return %c0_i32, %c0_i32_0 : i32, i32
  }
  func.func @transform_7(%arg0: i32, %arg1: i32) -> (i32, i32) {
    %c0_i32 = arith.constant 0 : i32
    %c0_i32_0 = arith.constant 0 : i32
    %c0_i32_1 = arith.constant 0 : i32
    return %c0_i32, %c0_i32_0 : i32, i32
  }
  func.func @transform_8(%arg0: i32, %arg1: i32) -> (i32, i32) {
    %c0_i32 = arith.constant 0 : i32
    %c0_i32_0 = arith.constant 0 : i32
    %c0_i32_1 = arith.constant 0 : i32
    return %c0_i32, %c0_i32_0 : i32, i32
  }
  func.func @transform_9(%arg0: i32, %arg1: i32) -> (i32, i32) {
    %c0_i32 = arith.constant 0 : i32
    %c0_i32_0 = arith.constant 0 : i32
    %c0_i32_1 = arith.constant 0 : i32
    return %c0_i32, %c0_i32_0 : i32, i32
  }
  func.func @transform_10(%arg0: i32, %arg1: i32) -> (i32, i32) {
    %c0_i32 = arith.constant 0 : i32
    %c0_i32_0 = arith.constant 0 : i32
    %c0_i32_1 = arith.constant 0 : i32
    return %c0_i32, %c0_i32_0 : i32, i32
  }
  func.func @transform_11(%arg0: i32, %arg1: i32) -> (i32, i32) {
    %c0_i32 = arith.constant 0 : i32
    %c0_i32_0 = arith.constant 0 : i32
    %c0_i32_1 = arith.constant 0 : i32
    return %c0_i32, %c0_i32_0 : i32, i32
  }
  func.func @transform_12(%arg0: i32, %arg1: i32) -> (i32, i32) {
    %c0_i32 = arith.constant 0 : i32
    %c0_i32_0 = arith.constant 0 : i32
    %c0_i32_1 = arith.constant 0 : i32
    return %c0_i32, %c0_i32_0 : i32, i32
  }
  func.func @transform_13(%arg0: i32, %arg1: i32) -> (i32, i32) {
    %c0_i32 = arith.constant 0 : i32
    %c0_i32_0 = arith.constant 0 : i32
    %c0_i32_1 = arith.constant 0 : i32
    return %c0_i32, %c0_i32_0 : i32, i32
  }
  func.func @transform_14(%arg0: i32, %arg1: i32) -> (i32, i32) {
    %c0_i32 = arith.constant 0 : i32
    %c0_i32_0 = arith.constant 0 : i32
    %c0_i32_1 = arith.constant 0 : i32
    return %c0_i32, %c0_i32_0 : i32, i32
  }
  func.func @transform_15(%arg0: i32, %arg1: i32) -> (i32, i32) {
    %c0_i32 = arith.constant 0 : i32
    %c0_i32_0 = arith.constant 0 : i32
    %c0_i32_1 = arith.constant 0 : i32
    return %c0_i32, %c0_i32_0 : i32, i32
  }
  func.func @transform_16(%arg0: i32, %arg1: i32) -> (i32, i32) {
    %c0_i32 = arith.constant 0 : i32
    %c0_i32_0 = arith.constant 0 : i32
    %c0_i32_1 = arith.constant 0 : i32
    return %c0_i32, %c0_i32_0 : i32, i32
  }
  func.func @transform_17(%arg0: i32, %arg1: i32) -> (i32, i32) {
    %c0_i32 = arith.constant 0 : i32
    %c0_i32_0 = arith.constant 0 : i32
    %c0_i32_1 = arith.constant 0 : i32
    return %c0_i32, %c0_i32_0 : i32, i32
  }
  func.func @transform_18(%arg0: i32, %arg1: i32) -> (i32, i32) {
    %c0_i32 = arith.constant 0 : i32
    %c0_i32_0 = arith.constant 0 : i32
    %c0_i32_1 = arith.constant 0 : i32
    return %c0_i32, %c0_i32_0 : i32, i32
  }
  func.func @transform_19(%arg0: i32, %arg1: i32) -> (i32, i32) {
    %c0_i32 = arith.constant 0 : i32
    %c0_i32_0 = arith.constant 0 : i32
    return %arg0, %c0_i32 : i32, i32
  }
}

</mosaic_0001>

<bundles_post_ra>
// kernel: forward.1
= control target key start
LH: loop header
LB: loop body
LE: loop exit
PB: predicated region body
PF: predicated region fallthrough
CT: control target
= control target key end

     0   :  { %s7519_s0 = inlined_call_operand.vmem [shape: f32[32,8,128], index: 0, kind: input, shape index: {}]   ;;  %s7520_s1 = inlined_call_operand.vmem [shape: f32[32,8], index: 1, kind: input, shape index: {}]   ;;  %s7521_s2 = inlined_call_operand.vmem [shape: bf16[4,32,128], index: 2, kind: input, shape index: {}]   ;;  %s7522_s3 = inlined_call_operand.vmem [shape: s32[32,4], index: 3, kind: input, shape index: {}]   ;;  %s7523_s4 = inlined_call_operand.vmem [shape: f32[32,4], index: 4, kind: input, shape index: {}]   ;;  %s7524_s5 = inlined_call_operand.vmem [shape: f32[128,128], index: 5, kind: input, shape index: {}]   ;;  %s7525_s6 = inlined_call_operand.vmem [shape: f32[1,128], index: 6, kind: input, shape index: {}]   ;;  %s7526_s7 = inlined_call_operand.vmem [shape: f32[128,128], index: 7, kind: input, shape index: {}]   ;;  %s7527_s8 = inlined_call_operand.vmem [shape: f32[1,128], index: 8, kind: input, shape index: {}]   ;;  %s7528_s9 = inlined_call_operand.vmem [shape: bf16[384,128], index: 9, kind: input, shape index: {}]   ;;  %s7529_s10 = inlined_call_operand.vmem [shape: f32[1,128], index: 10, kind: input, shape index: {}]   ;;  %s7530_s11 = inlined_call_operand.vmem [shape: f32[1,128], index: 11, kind: input, shape index: {}]   ;;  %s7531_s12 = inlined_call_operand.<no memory space> [shape: f32[1,1], index: 12, kind: input, shape index: {}]   ;;  %s7532_s13 = inlined_call_operand.vmem [shape: bf16[384,512], index: 13, kind: input, shape index: {}]   ;;  %s7533_s14 = inlined_call_operand.vmem [shape: f32[1,512], index: 14, kind: input, shape index: {}]   ;;  %s7534_s15 = inlined_call_operand.vmem [shape: bf16[384,256], index: 15, kind: input, shape index: {}]   ;;  %s7535_s16 = inlined_call_operand.vmem [shape: f32[1,256], index: 16, kind: input, shape index: {}]   ;;  %s7536_s17 = inlined_call_operand.vmem [shape: bf16[128,256], index: 17, kind: input, shape index: {}]   ;;  %s7537_s18 = inlined_call_operand.vmem [shape: f32[1,256], index: 18, kind: input, shape index: {}]   ;;  %s7538_s19 = inlined_call_operand.vmem [shape: f32[16,128], index: 19, kind: output, shape index: {}]  }
   0x1   :  { %7570 = sst [smem:[#allocation34_spill]] %s7519_s0  ;;  %v24_v0 = vstv %s7531_s12 }
   0x2   :  { %7571 = sst [smem:[#allocation35_spill]] %s7520_s1  ;;  %25 = vst [vmem:[#allocation7] sm:$0x1] %v24_v0 }
   0x3   :  { %7572 = sst [smem:[#allocation36_spill]] %s7521_s2 }
   0x4   :  { %7573 = sst [smem:[#allocation37_spill]] %s7522_s3 }
   0x5   :  { %7574 = sst [smem:[#allocation38_spill]] %s7537_s18 }
   0x6   :  { %s6018_s20 = smov 0   ;;  %s6020_s21 = smov 0  }
   0x7   :  { %s6022_s1 = smov 0   ;;  %s6024_s22 = smov 0  }
   0x8   :  { %s6026_s2 = smov 0   ;;  %s6028_s23 = smov 0  }
   0x9   :  { %s6030_s24 = smov 0  }
   0xa LB: > { %7575 = sst [smem:[#allocation9_spill]] %s5887_s21  ;;  %s40_s12 = sadd.s32 1, %s5899_s2  ;;  %s5907_s24 = sphi %s6030_s24, %s31_s24   ;;  %s5903_s23 = sphi %s6028_s23, %s7634_s23   ;;  %s5899_s2 = sphi %s6026_s2, %s7633_s2   ;;  %s5895_s22 = sphi %s6024_s22, %s7632_s22   ;;  %s5891_s1 = sphi %s6022_s1, %s7631_s1   ;;  %s5887_s21 = sphi %s6020_s21, %s7630_s21   ;;  %s5883_s20 = sphi %s6018_s20, %s7629_s20  }
   0xb   : > { %7576 = sst [smem:[#allocation10_spill]] %s5899_s2  ;;  %p41_p0 = scmp.ge.s32.totalorder %s40_s12, 4 }
   0xc   : > { %7577 = sst [smem:[#allocation11_spill]] %s5903_s23  ;;  %s43_s25 = sadd.s32 1, %s5903_s23 }
   0xd   : > { %7578 = sst [smem:[#allocation12_spill]] %s5907_s24  ;;  %p109_p1 = scmp.ne.s32.totalorder %s5887_s21, %s5883_s20 }
   0xe   : > { %p110_p2 = scmp.eq.s32.totalorder %s5907_s24, 0  ;;  %s7636_s12 = smov (%p41_p0, %s40_s12), 0 }
   0xf   : > { %7579 = sst [smem:[#allocation13_spill]] %s7636_s12  ;;  %s7638_s25 = smov (!%p41_p0, %s43_s25), %s5903_s23 }
  0x10   : > { %p111_p3 = por %p110_p2, %p109_p1  ;;  %p45_p4 = scmp.ge.s32.totalorder %s7638_s25, 2 }
  0x11   : > { %s102_s26 = sadd.s32 1, %s5887_s21  ;;  %p4801_p6 = scmp.ge.s32.totalorder %s5907_s24, 8 }
  0x12   : > { %s7640_s25 = smov (%p45_p4, %s7638_s25), 0 }
  0x13   : > { %7580 = sst [smem:[#allocation14_spill]] %s7640_s25  ;;  %s99_s3 = ssub.s32 %s5903_s23, %s7640_s25 }
  0x14   : > { %p100_p5 = scmp.eq.s32.totalorder %s99_s3, 0  ;;  %549 = sbr.rel (%p4801_p6) target bundleno = 39 (0x27), region = 72 }
  0x16   : > { %s6067_s27 = scalar_select %p100_p5, %s5887_s21, %s102_s26  }
  0x18   : > { %7581 = sst [smem:[#allocation15_spill]] %s6067_s27 }
  0x1b   : > { %570 = sbr.rel (!%p111_p3) target bundleno = 39 (0x27), region = 84  ;;  %s572_s28 = sand.u32 (%p111_p3), 1, %s5887_s21  }
  0x1c   : > { %s5026_s29 = sshll.u32 (%p111_p3), %s5903_s23, 3  ;;  %s4802_s0 = sshll.u32 (%p111_p3), %s572_s28, 5 }
  0x1d   : > { %s7582_s2 = sld [smem:[#allocation36_spill]] (%p111_p3)  ;;  %s574_s25 = scalar_lea.vmem (%p111_p3), [#allocation8], %s4802_s0 }
  0x23   : > { %s577_s18 = scalar_lea.vmem %s7582_s2, %s5026_s29 }
  0x24   : > { %v593_v1 = vld [vmem:[%s577_s18] sm:$0xff]   ;;  %v597_v2 = vld [vmem:[%s577_s18 + $0x10] sm:$0xff]  }
  0x25   : > { %v601_v3 = vld [vmem:[%s577_s18 + $0x20] sm:$0xff]   ;;  %594 = vst [vmem:[%s574_s25] sm:$0xff] %v593_v1   ;;  %598 = vst [vmem:[%s574_s25 + $0x8] sm:$0xff] %v597_v2   ;;  %v605_v4 = vld [vmem:[%s577_s18 + $0x30] sm:$0xff]  }
  0x26   : > { %602 = vst [vmem:[%s574_s25 + $0x10] sm:$0xff] %v601_v3   ;;  %606 = vst [vmem:[%s574_s25 + $0x18] sm:$0xff] %v605_v4  }
  0x27 PF: > { %p4805_p7 = scmp.ge.s32.totalorder %s5907_s24, 1  ;;  %p664_p8 = scmp.lt.s32.totalorder %s5907_s24, 9 }
  0x29   : > { %p665_p9 = pnand %p4805_p7, %p664_p8 }
  0x2b   : > { %668 = sbr.rel (%p665_p9) target bundleno = 2902 (0xb56), region = 133 }
  0x32   : > { %s671_s2 = sand.u32 1, %s5883_s20   ;;  %s4807_s12 = sshll.u32 %s5895_s22, 4 }
  0x33   : > { %s6079_s3 = sshll.u32 %s671_s2, 5  ;;  %p746_p10 = scmp.lt.s32.totalorder %s4807_s12, 31 }
  0x34   : > { %s4809_s18 = sshll.u32 %s5895_s22, 1  ;;  %p770_p12 = scmp.lt.s32.totalorder %s5895_s22, 1 }
  0x35   : > { %s7642_s12 = smov (!%p746_p10, %s4807_s12), 31  ;;  %p752_p11 = scmp.lt.s32.totalorder %s4809_s18, 3 }
  0x36   : > { %s4808_s25 = sshll.u32 %s7642_s12, 3  ;;  %s7583_s29 = sld [smem:[#allocation34_spill]] }
  0x37   : > { %s7644_s18 = smov (!%p752_p11, %s4809_s18), 3  ;;  %s7646_s22 = smov (!%p770_p12, %s5895_s22), 1 }
  0x38   : > { %s4810_s20 = sshll.u32 %s7644_s18, 3  ;;  %s7593_s12 = sld [smem:[#allocation35_spill]] }
  0x39   : > { %s6122_s21 = scalar_lea.vmem %s7523_s4, %s4810_s20  ;;  %s4815_s24 = sshll.u32 %s7646_s22, 3 }
  0x3a   : > { %s6142_s27 = scalar_lea.vmem [#allocation8], %s6079_s3  ;;  %p4816_p13 = scmp.ne.s32.totalorder %s5891_s1, 0 }
  0x3b   : > { %vm797_vm0 = vcmask (!%p4816_p13), 64512   ;;  %v806_v23 = vlaneseq (!%p4816_p13)  ;;  %v1078_v37 = vld [vmem:[%s7524_s5] sm:$0xff] (!%p4816_p13)  ;;  %v1079_v38 = vld [vmem:[%s7524_s5 + $0x8] sm:$0xff] (!%p4816_p13)  ;;  %v1080_v49 = vld [vmem:[%s7524_s5 + $0x10] sm:$0xff] (!%p4816_p13)  ;;  %vm1118_vm1 = vcmask (!%p4816_p13), 1041409   ;;  %vm1121_vm2 = vcmask (!%p4816_p13), 1042434  }
  0x3c   : > { %s749_s0 = scalar_lea.vmem %s7583_s29, %s4808_s25  ;;  %s7594_s29 = sld [smem:[#allocation37_spill]]  ;;  %v5305_v42 = vpack.c.bf16 (!%p4816_p13), %v1079_v38, %v1078_v37  ;;  %v1233_v43 = vld [vmem:[%s7526_s7] sm:$0xff] (!%p4816_p13)  ;;  %v1234_v44 = vld [vmem:[%s7526_s7 + $0x8] sm:$0xff] (!%p4816_p13)  ;;  %v1081_v50 = vld [vmem:[%s7524_s5 + $0x18] sm:$0xff] (!%p4816_p13)  ;;  %vm1124_vm3 = vcmask (!%p4816_p13), 1043459   ;;  %vm1127_vm4 = vcmask (!%p4816_p13), 1044484  }
  0x3d   : > { %v6086_v5 = vld [vmem:[%s749_s0] sm:$0xff]  ;;  %v6088_v6 = vld [vmem:[%s749_s0 + $0x8] sm:$0xff]  ;;  %v6090_v7 = vld [vmem:[%s749_s0 + $0x10] sm:$0xff]  ;;  %v6147_v26 = vshrl.u32 (!%p4816_p13), %v806_v23, 7  ;;  %v5337_v45 = vpack.c.bf16 (!%p4816_p13), %v1234_v44, %v1233_v43  ;;  %v5309_v51 = vpack.c.bf16 (!%p4816_p13), %v1081_v50, %v1080_v49  ;;  %vm1130_vm5 = vcmask (!%p4816_p13), 1045509  }
  0x3e   : > { %7584 = vst [vmem:[#allocation16_spill] sm:$0xff] %v6086_v5  ;;  %7585 = vst [vmem:[#allocation17_spill] sm:$0xff] %v6088_v6  ;;  %v6093_v8 = vld [vmem:[%s749_s0 + $0x18] sm:$0xff]  ;;  %v6095_v9 = vld [vmem:[%s749_s0 + $0x20] sm:$0xff]  ;;  %s755_s25 = scalar_lea.vmem %s7593_s12, %s4810_s20  ;;  %s6133_s12 = scalar_lea.vmem %s7538_s19, %s4815_s24  ;;  %5306 = vmatprep.subr.bf16.mxu0 (!%p4816_p13), %v5305_v42  ;;  %vm1133_vm6 = vcmask (!%p4816_p13), 1046534   ;;  %vm1136_vm7 = vcmask (!%p4816_p13), 1047559  }
  0x3f   : > { %7586 = vst [vmem:[#allocation18_spill] sm:$0xff] %v6090_v7  ;;  %7587 = vst [vmem:[#allocation19_spill] sm:$0xff] %v6093_v8  ;;  %v6097_v10 = vld [vmem:[%s749_s0 + $0x28] sm:$0xff]  ;;  %v6099_v11 = vld [vmem:[%s749_s0 + $0x30] sm:$0xff]  ;;  %796 = sbr.rel (%p4816_p13) target bundleno = 528 (0x210), region = 141  ;;  %v815_v27 = vsub.s32 (!%p4816_p13), 1, %v6147_v26  ;;  %5308 = vmatpush3.bf16.msra.mxu0 (!%p4816_p13), %v5305_v42  ;;  %5338 = vmatprep.subr.bf16.mxu1 (!%p4816_p13), %v5337_v45 }
  0x40   : > { %7588 = vst [vmem:[#allocation20_spill] sm:$0xff] %v6095_v9  ;;  %7589 = vst [vmem:[#allocation21_spill] sm:$0xff] %v6097_v10  ;;  %v6101_v12 = vld [vmem:[%s749_s0 + $0x38] sm:$0xff]  ;;  %v6103_v13 = vld [vmem:[%s749_s0 + $0x40] sm:$0xff]  ;;  %v822_v28 = vsub.s32 (!%p4816_p13), 2, %v6147_v26  ;;  %v808_v31 = vsub.s32 (!%p4816_p13), 0, %v6147_v26  ;;  %5340 = vmatpush3.bf16.msra.mxu1 (!%p4816_p13), %v5337_v45  ;;  %5310 = vmatprep.subr.bf16.mxu0 (!%p4816_p13), %v5309_v51 }
  0x41   : > { %7590 = vst [vmem:[#allocation22_spill] sm:$0xff] %v6099_v11  ;;  %7591 = vst [vmem:[#allocation23_spill] sm:$0xff] %v6101_v12  ;;  %v6113_v14 = vld [vmem:[%s749_s0 + $0x48] sm:$0xff]  ;;  %v6115_v15 = vld [vmem:[%s749_s0 + $0x50] sm:$0xff]  ;;  %v829_v33 = vsub.s32 (!%p4816_p13), 3, %v6147_v26  ;;  %v836_v36 = vsub.s32 (!%p4816_p13), 4, %v6147_v26 }
  0x42   : > { %7592 = vst [vmem:[#allocation24_spill] sm:$0xff] %v6103_v13  ;;  %s6111_s23 = scalar_lea.vmem %s7594_s29, %s4810_s20  ;;  %7595 = vst [vmem:[#allocation25_spill] sm:$0xff] %v6113_v14  ;;  %v6117_v16 = vld [vmem:[%s749_s0 + $0x58] sm:$0xff]  ;;  %v6124_v17 = vld [vmem:[%s749_s0 + $0x60] sm:$0xff]  ;;  %v843_v41 = vsub.s32 (!%p4816_p13), 5, %v6147_v26  ;;  %v850_v48 = vsub.s32 (!%p4816_p13), 6, %v6147_v26 }
  0x43   : > { %7596 = vst [vmem:[#allocation26_spill] sm:$0xff] %v6115_v15  ;;  %7597 = vst [vmem:[#allocation27_spill] sm:$0xff] %v6117_v16  ;;  %v6126_v18 = vld [vmem:[%s749_s0 + $0x68] sm:$0xff]  ;;  %v6128_v19 = vld [vmem:[%s749_s0 + $0x70] sm:$0xff]  ;;  %v857_v57 = vsub.s32 (!%p4816_p13), 7, %v6147_v26  ;;  %5312 = vmatpush3.bf16.msra.mxu0 (!%p4816_p13), %v5309_v51  ;;  %vm1689_vm8 = vcmask (!%p4816_p13), 0  }
  0x44   : > { %7598 = vst [vmem:[#allocation28_spill] sm:$0xff] %v6124_v17  ;;  %7599 = vst [vmem:[#allocation29_spill] sm:$0xff] %v6126_v18  ;;  %v6135_v20 = vld [vmem:[%s749_s0 + $0x78] sm:$0xff]  ;;  %v6137_v21 = vld [vmem:[%s755_s25] sm:$0xff] }
  0x45   : > { %7600 = vst [vmem:[#allocation30_spill] sm:$0xff] %v6128_v19  ;;  %7601 = vst [vmem:[#allocation31_spill] sm:$0xff] %v6135_v20  ;;  %v6139_v22 = vld [vmem:[%s755_s25 + $0x8] sm:$0xff]  ;;  %v798_v24 = vsel (!%p4816_p13), %vm797_vm0, %v6137_v21, 0.0  ;;  %v816_v29 = vrot.slane (!%p4816_p13), %v6137_v21, %v815_v27  ;;  %v823_v30 = vrot.slane (!%p4816_p13), %v6137_v21, %v822_v28  ;;  %v809_v32 = vrot.slane (!%p4816_p13), %v6137_v21, %v808_v31  ;;  %v1235_v52 = vld [vmem:[%s7526_s7 + $0x10] sm:$0xff] (!%p4816_p13) }
  0x46   : > { %799 = vadd.xlane.f32.xlu0 %v798_v24  ;;  %v801_v25 = vsel %vm797_vm0, %v6139_v22, 0.0  ;;  %v830_v34 = vrot.slane %v6137_v21, %v829_v33  ;;  %v879_v35 = vrot.slane %v6139_v22, %v822_v28  ;;  %v837_v39 = vrot.slane %v6137_v21, %v836_v36  ;;  %v1236_v53 = vld [vmem:[%s7526_s7 + $0x18] sm:$0xff]  ;;  %v1082_v58 = vld [vmem:[%s7524_s5 + $0x20] sm:$0xff]  ;;  %v1083_v59 = vld [vmem:[%s7524_s5 + $0x28] sm:$0xff] }
  0x47   : > { %818 = vbcast.lane.b32.xlu1 %v816_v29, 256  ;;  %v872_v40 = vrot.slane %v6139_v22, %v815_v27  ;;  %v865_v46 = vrot.slane %v6139_v22, %v808_v31  ;;  %v844_v47 = vrot.slane %v6137_v21, %v843_v41  ;;  %v5341_v54 = vpack.c.bf16 %v1236_v53, %v1235_v52  ;;  %v1237_v63 = vld [vmem:[%s7526_s7 + $0x20] sm:$0xff]  ;;  %v1238_v0 = vld [vmem:[%s7526_s7 + $0x28] sm:$0xff]  ;;  %v1084_v2 = vld [vmem:[%s7524_s5 + $0x30] sm:$0xff] }
  0x48   : > { %v886_v55 = vrot.slane %v6139_v22, %v829_v33  ;;  %v851_v56 = vrot.slane %v6137_v21, %v850_v48  ;;  %v5313_v60 = vpack.c.bf16 %v1083_v59, %v1082_v58  ;;  %v893_v61 = vrot.slane %v6139_v22, %v836_v36  ;;  %v1085_v3 = vld [vmem:[%s7524_s5 + $0x38] sm:$0xff]  ;;  %v1086_v28 = vld [vmem:[%s7524_s5 + $0x40] sm:$0xff]  ;;  %v1087_v29 = vld [vmem:[%s7524_s5 + $0x48] sm:$0xff] }
  0x49   : > { %5342 = vmatprep.subr.bf16.mxu1 %v5341_v54  ;;  %v858_v62 = vrot.slane %v6137_v21, %v857_v57  ;;  %v5345_v1 = vpack.c.bf16 %v1238_v0, %v1237_v63  ;;  %v900_v4 = vrot.slane %v6139_v22, %v843_v41  ;;  %v914_v23 = vrot.slane %v6139_v22, %v857_v57  ;;  %v1240_v26 = vld [vmem:[%s7526_s7 + $0x38] sm:$0xff]  ;;  %v1242_v33 = vld [vmem:[%s7526_s7 + $0x48] sm:$0xff]  ;;  %v1243_v38 = vld [vmem:[%s7526_s7 + $0x50] sm:$0xff] }
  0x4a   : > { %802 = vadd.xlane.f32.xlu0 %v801_v25  ;;  %5344 = vmatpush3.bf16.msra.mxu1 %v5341_v54  ;;  %v5317_v24 = vpack.c.bf16 %v1085_v3, %v1084_v2  ;;  %v1239_v25 = vld [vmem:[%s7526_s7 + $0x30] sm:$0xff]  ;;  %v5321_v31 = vpack.c.bf16 %v1087_v29, %v1086_v28  ;;  %v1089_v36 = vld [vmem:[%s7524_s5 + $0x58] sm:$0xff]  ;;  %v1090_v41 = vld [vmem:[%s7524_s5 + $0x60] sm:$0xff] }
  0x4b   : > { %825 = vbcast.lane.b32.xlu1 %v823_v30, 256  ;;  %5314 = vmatprep.subr.bf16.mxu0 %v5313_v60  ;;  %v5349_v27 = vpack.c.bf16 %v1240_v26, %v1239_v25  ;;  %v907_v30 = vrot.slane %v6139_v22, %v850_v48  ;;  %v1091_v42 = vld [vmem:[%s7524_s5 + $0x68] sm:$0xff]  ;;  %v1245_v44 = vld [vmem:[%s7526_s7 + $0x60] sm:$0xff]  ;;  %v1093_v48 = vld [vmem:[%s7524_s5 + $0x78] sm:$0xff] }
  0x4c   : > { %5316 = vmatpush3.bf16.msra.mxu0 %v5313_v60  ;;  %5346 = vmatprep.subr.bf16.mxu1 %v5345_v1  ;;  %v5329_v43 = vpack.c.bf16 %v1091_v42, %v1090_v41  ;;  %v1246_v45 = vld [vmem:[%s7526_s7 + $0x68] sm:$0xff]  ;;  %v1247_v50 = vld [vmem:[%s7526_s7 + $0x70] sm:$0xff]  ;;  %v1248_v51 = vld [vmem:[%s7526_s7 + $0x78] sm:$0xff] }
  0x4d   : > { %5318 = vmatprep.subr.bf16.mxu0 %v5317_v24  ;;  %v6272_v52 = vld [vmem:[%s7528_s9] sm:$0xff]   ;;  %v5365_v53 = vpack.c.bf16 %v1248_v51, %v1247_v50 }
  0x4e   : > { %5348 = vmatpush3.bf16.msra.mxu1 %v5345_v1  ;;  %v6278_v54 = vld [vmem:[%s7528_s9 + $0x40] sm:$0xff]  }
  0x4f   : > { %811 = vbcast.lane.b32.xlu1 %v809_v32, 256  ;;  %5350 = vmatprep.subr.bf16.mxu1 %v5349_v27  ;;  %v1241_v32 = vld [vmem:[%s7526_s7 + $0x40] sm:$0xff] }
  0x50   : > { %5320 = vmatpush3.bf16.msra.mxu0 %v5317_v24 }
  0x51   : > { %5322 = vmatprep.subr.bf16.mxu0 %v5321_v31 }
  0x52   : > { %5352 = vmatpush3.bf16.msra.mxu1 %v5349_v27 }
  0x53   : > { %832 = vbcast.lane.b32.xlu1 %v830_v34, 256  ;;  %v5353_v34 = vpack.c.bf16 %v1242_v33, %v1241_v32 }
  0x54   : > { %5324 = vmatpush3.bf16.msra.mxu0 %v5321_v31 }
  0x55   : > { %5354 = vmatprep.subr.bf16.mxu1 %v5353_v34 }
  0x56   : > { %5356 = vmatpush3.bf16.msra.mxu1 %v5353_v34 }
  0x57   : > { %881 = vbcast.lane.b32.xlu1 %v879_v35, 256  ;;  %v1088_v35 = vld [vmem:[%s7524_s5 + $0x50] sm:$0xff] }
  0x58   : > { %v5325_v37 = vpack.c.bf16 %v1089_v36, %v1088_v35 }
  0x5a   : > { %5326 = vmatprep.subr.bf16.mxu0 %v5325_v37 }
  0x5b   : > { %839 = vbcast.lane.b32.xlu1 %v837_v39, 256  ;;  %v1244_v39 = vld [vmem:[%s7526_s7 + $0x58] sm:$0xff]  ;;  %5328 = vmatpush3.bf16.msra.mxu0 %v5325_v37 }
  0x5c   : > { %5330 = vmatprep.subr.bf16.mxu0 %v5329_v43 }
  0x5f   : > { %867 = vbcast.lane.b32.xlu1 %v865_v46, 256  ;;  %v5361_v46 = vpack.c.bf16 %v1246_v45, %v1245_v44  ;;  %5332 = vmatpush3.bf16.msra.mxu0 %v5329_v43 }
  0x60   : > { %874 = vbcast.lane.b32.xlu0 %v872_v40, 256  ;;  %v5357_v40 = vpack.c.bf16 %v1244_v39, %v1243_v38 }
  0x62   : > { %5358 = vmatprep.subr.bf16.mxu1 %v5357_v40 }
  0x63   : > { %888 = vbcast.lane.b32.xlu1 %v886_v55, 256  ;;  %5360 = vmatpush3.bf16.msra.mxu1 %v5357_v40 }
  0x64   : > { %846 = vbcast.lane.b32.xlu0 %v844_v47, 256  ;;  %v1092_v47 = vld [vmem:[%s7524_s5 + $0x70] sm:$0xff]  ;;  %5362 = vmatprep.subr.bf16.mxu1 %v5361_v46 }
  0x65   : > { %v5333_v49 = vpack.c.bf16 %v1093_v48, %v1092_v47 }
  0x67   : > { %895 = vbcast.lane.b32.xlu1 %v893_v61, 256  ;;  %5334 = vmatprep.subr.bf16.mxu0 %v5333_v49 }
  0x68   : > { %853 = vbcast.lane.b32.xlu0 %v851_v56, 256  ;;  %5364 = vmatpush3.bf16.msra.mxu1 %v5361_v46 }
  0x69   : > { %5336 = vmatpush3.bf16.msra.mxu0 %v5333_v49  ;;  %5366 = vmatprep.subr.bf16.mxu1 %v5365_v53 }
  0x6a   : > { %5189 = vmatprep.subr.bf16.mxu0 %v6272_v52 }
  0x6b   : > { %902 = vbcast.lane.b32.xlu1 %v900_v4, 256 }
  0x6c   : > { %860 = vbcast.lane.b32.xlu0 %v858_v62, 256  ;;  %5368 = vmatpush3.bf16.msra.mxu1 %v5365_v53 }
  0x6d   : > { %5221 = vmatprep.subr.bf16.mxu1 %v6278_v54 }
  0x6f   : > { %909 = vbcast.lane.b32.xlu1 %v907_v30, 256 }
  0x70   : > { %916 = vbcast.lane.b32.xlu0 %v914_v23, 256 }
  0xb9   : > { %v819_v55 = vpop.permute.xlu1 %818 }
  0xba   : > { %v919_v58 = vmul.f32 %v819_v55, %v6088_v6 }
  0xbc   : > { %v940_v63 = vrot.slane %v919_v58, 4 }
  0xbd   : > { %v826_v56 = vpop.permute.xlu1 %825 }
  0xbe   : > { %v920_v59 = vmul.f32 %v826_v56, %v6090_v7  ;;  %v941_v23 = vadd.f32 %v940_v63, %v919_v58 }
  0xc0   : > { %v946_v0 = vrot.slane %v920_v59, 4  ;;  %v942_v32 = vrot.slane %v941_v23, 2 }
  0xc1   : > { %v812_v57 = vpop.permute.xlu1 %811 }
  0xc2   : > { %v918_v60 = vmul.f32 %v812_v57, %v6086_v5  ;;  %v947_v25 = vadd.f32 %v946_v0, %v920_v59  ;;  %v943_v42 = vadd.f32 %v942_v32, %v941_v23 }
  0xc4   : > { %v934_v1 = vrot.slane %v918_v60, 4  ;;  %v948_v34 = vrot.slane %v947_v25, 2  ;;  %v944_v57 = vrot.slane %v943_v42, 1 }
  0xc5   : > { %v833_v61 = vpop.permute.xlu1 %832 }
  0xc6   : > { %v921_v62 = vmul.f32 %v833_v61, %v6093_v8  ;;  %v935_v26 = vadd.f32 %v934_v1, %v918_v60  ;;  %v949_v45 = vadd.f32 %v948_v34, %v947_v25 }
  0xc8   : > { %v952_v2 = vrot.slane %v921_v62, 4  ;;  %v936_v35 = vrot.slane %v935_v26, 2  ;;  %v950_v60 = vrot.slane %v949_v45, 1 }
  0xc9   : > { %v882_v3 = vpop.permute.xlu1 %881 }
  0xca   : > { %v928_v4 = vmul.f32 %v882_v3, %v6115_v15  ;;  %v953_v27 = vadd.f32 %v952_v2, %v921_v62  ;;  %v937_v46 = vadd.f32 %v936_v35, %v935_v26 }
  0xcc   : > { %v994_v24 = vrot.slane %v928_v4, 4  ;;  %v954_v36 = vrot.slane %v953_v27, 2  ;;  %v938_v61 = vrot.slane %v937_v46, 1 }
  0xcd   : > { %v840_v28 = vpop.permute.xlu1 %839 }
  0xce   : > { %v995_v29 = vadd.f32 %v994_v24, %v928_v4  ;;  %v922_v30 = vmul.f32 %v840_v28, %v6095_v9  ;;  %v955_v47 = vadd.f32 %v954_v36, %v953_v27  ;;  %v6294_v27 = vadd.f32 %v944_v57, %v943_v42 }
  0xcf   : > { %v6298_v32 = vadd.f32 %v938_v61, %v937_v46 }
  0xd0   : > { %v958_v33 = vrot.slane %v922_v30, 4  ;;  %v996_v38 = vrot.slane %v995_v29, 2  ;;  %v956_v62 = vrot.slane %v955_v47, 1 }
  0xd1   : > { %v868_v37 = vpop.permute.xlu1 %867 }
  0xd2   : > { %v959_v39 = vadd.f32 %v958_v33, %v922_v30  ;;  %v926_v40 = vmul.f32 %v868_v37, %v6103_v13  ;;  %v997_v49 = vadd.f32 %v996_v38, %v995_v29  ;;  %v6300_v36 = vadd.f32 %v956_v62, %v955_v47 }
  0xd3   : > { %v800_v31 = vpop.xlane.xlu0 %799 }
  0xd4   : > { %5477 = vrcp.f32 %v800_v31  ;;  %v960_v43 = vrot.slane %v959_v39, 2  ;;  %v982_v44 = vrot.slane %v926_v40, 4  ;;  %v998_v1 = vrot.slane %v997_v49, 1 }
  0xd5   : > { %v889_v48 = vpop.permute.xlu1 %888  ;;  %v6296_v31 = vadd.f32 %v950_v60, %v949_v45 }
  0xd6   : > { %v961_v50 = vadd.f32 %v960_v43, %v959_v39  ;;  %v983_v51 = vadd.f32 %v982_v44, %v926_v40  ;;  %v929_v53 = vmul.f32 %v889_v48, %v6117_v16  ;;  %v6302_v37 = vadd.f32 %v998_v1, %v997_v49 }
  0xd7   : > { %v803_v41 = vpop.xlane.xlu0 %802 }
  0xd8   : > { %v984_v58 = vrot.slane %v983_v51, 2  ;;  %5479 = vrcp.f32 %v803_v41  ;;  %v1000_v59 = vrot.slane %v929_v53, 4  ;;  %v962_v2 = vrot.slane %v961_v50, 1 }
  0xd9   : > { %v896_v0 = vpop.permute.xlu1 %895 }
  0xda   : > { %v1001_v3 = vadd.f32 %v1000_v59, %v929_v53  ;;  %v930_v4 = vmul.f32 %v896_v0, %v6124_v17  ;;  %v985_v28 = vadd.f32 %v984_v58, %v983_v51  ;;  %v6304_v38 = vadd.f32 %v962_v2, %v961_v50 }
  0xdb   : > { %v875_v55 = vpop.permute.xlu0 %874 }
  0xdc   : > { %v927_v56 = vmul.f32 %v875_v55, %v6113_v14  ;;  %v1002_v29 = vrot.slane %v1001_v3, 2  ;;  %v1006_v30 = vrot.slane %v930_v4, 4  ;;  %v986_v45 = vrot.slane %v985_v28, 1 }
  0xdd   : > { %v903_v35 = vpop.permute.xlu1 %902 }
  0xde   : > { %v988_v63 = vrot.slane %v927_v56, 4  ;;  %v6292_v26 = vpop.eup %5477  ;;  %v1003_v39 = vadd.f32 %v1002_v29, %v1001_v3  ;;  %v1007_v42 = vadd.f32 %v1006_v30, %v930_v4  ;;  %v931_v46 = vmul.f32 %v903_v35, %v6126_v18 }
  0xdf   : > { %v847_v23 = vpop.permute.xlu0 %846  ;;  %v1036_v43 = vrot.slane %v6292_v26, 5  ;;  %v1032_v48 = vrot.slane %v6292_v26, 1  ;;  %v1033_v51 = vrot.slane %v6292_v26, 2  ;;  %v1034_v61 = vrot.slane %v6292_v26, 3 }
  0xe0   : > { %v989_v24 = vadd.f32 %v988_v63, %v927_v56  ;;  %v923_v25 = vmul.f32 %v847_v23, %v6097_v10  ;;  %v1008_v53 = vrot.slane %v1007_v42, 2  ;;  %v1004_v57 = vrot.slane %v1003_v39, 1 }
  0xe1   : > { %v910_v55 = vpop.permute.xlu1 %909  ;;  %v1012_v58 = vrot.slane %v931_v46, 4  ;;  %v1035_v23 = vrot.slane %v6292_v26, 4 }
  0xe2   : > { %v990_v33 = vrot.slane %v989_v24, 2  ;;  %v964_v34 = vrot.slane %v923_v25, 4  ;;  %v6311_v56 = vpop.eup %5479  ;;  %v932_v59 = vmul.f32 %v910_v55, %v6128_v19  ;;  %v1009_v63 = vadd.f32 %v1008_v53, %v1007_v42 }
  0xe3   : > { %v854_v40 = vpop.permute.xlu0 %853  ;;  %v1013_v2 = vadd.f32 %v1012_v58, %v931_v46  ;;  %v1005_v42 = vadd.f32 %v1004_v57, %v1003_v39 }
  0xe4   : > { %v991_v41 = vadd.f32 %v990_v33, %v989_v24  ;;  %v965_v44 = vadd.f32 %v964_v34, %v923_v25  ;;  %v924_v50 = vmul.f32 %v854_v40, %v6099_v11  ;;  %v1018_v3 = vrot.slane %v932_v59, 4 }
  0xe5   : > { %v987_v24 = vadd.f32 %v986_v45, %v985_v28  ;;  %v1039_v25 = vrot.slane %v6311_v56, 1  ;;  %v1041_v33 = vrot.slane %v6311_v56, 3  ;;  %v1014_v34 = vrot.slane %v1013_v2, 2 }
  0xe6   : > { %v992_v47 = vrot.slane %v991_v41, 1  ;;  %v966_v49 = vrot.slane %v965_v44, 2  ;;  %v970_v1 = vrot.slane %v924_v50, 4  ;;  %v1019_v35 = vadd.f32 %v1018_v3, %v932_v59 }
  0xe7   : > { %v861_v60 = vpop.permute.xlu0 %860  ;;  %v1010_v46 = vrot.slane %v1009_v63, 1  ;;  %v1015_v53 = vadd.f32 %v1014_v34, %v1013_v2  ;;  %v1070_v45 = vmul.f32 %v6311_v56, %v987_v24  ;;  %v1043_v3 = vrot.slane %v6311_v56, 5 }
  0xe8   : > { %v993_v62 = vadd.f32 %v992_v47, %v991_v41  ;;  %v967_v0 = vadd.f32 %v966_v49, %v965_v44  ;;  %v925_v4 = vmul.f32 %v861_v60, %v6101_v12  ;;  %v971_v30 = vadd.f32 %v970_v1, %v924_v50 }
  0xe9   : > { %v1020_v49 = vrot.slane %v1019_v35, 2  ;;  %v1042_v50 = vrot.slane %v6311_v56, 4  ;;  %v1016_v59 = vrot.slane %v1015_v53, 1 }
  0xea   : > { %v968_v29 = vrot.slane %v967_v0, 1  ;;  %v976_v40 = vrot.slane %v925_v4, 4  ;;  %v6319_v44 = vmul.f32 %v1039_v25, %v993_v62  ;;  %v972_v47 = vrot.slane %v971_v30, 2 }
  0xeb   : > { %v917_v41 = vpop.permute.xlu0 %916  ;;  %v1021_v1 = vadd.f32 %v1020_v49, %v1019_v35  ;;  %v1011_v62 = vadd.f32 %v1010_v46, %v1009_v63  ;;  %v1073_v25 = vmul.f32 %v1041_v33, %v1005_v42  ;;  %v1063_v35 = vmul.f32 %v1032_v48, %v6294_v27 }
  0xec   : > { %v977_v55 = vadd.f32 %v976_v40, %v925_v4  ;;  %v933_v28 = vmul.f32 %v917_v41, %v6135_v20  ;;  %v969_v58 = vadd.f32 %v968_v29, %v967_v0  ;;  %v973_v60 = vadd.f32 %v972_v47, %v971_v30 }
  0xed   : > { %v1044_v4 = vrot.slane %v6311_v56, 6  ;;  %v1138_v24 = vrot.slane %v6319_v44, 7  ;;  %v1022_v30 = vrot.slane %v1021_v1, 1  ;;  %v1017_v63 = vadd.f32 %v1016_v59, %v1015_v53 }
  0xee   : > { %v978_v39 = vrot.slane %v977_v55, 2  ;;  %v1024_v57 = vrot.slane %v933_v28, 4  ;;  %v974_v2 = vrot.slane %v973_v60, 1  ;;  %v1067_v0 = vmul.f32 %v1036_v43, %v969_v58 }
  0xef   : > { %v1037_v47 = vrot.slane %v6292_v26, 6  ;;  %v1074_v49 = vmul.f32 %v1042_v50, %v1011_v62  ;;  %v1064_v33 = vmul.f32 %v1033_v51, %v6296_v31  ;;  %v1065_v42 = vmul.f32 %v1034_v61, %v6300_v36 }
  0xf0   : > { %v979_v34 = vadd.f32 %v978_v39, %v977_v55  ;;  %v1025_v40 = vadd.f32 %v1024_v57, %v933_v28  ;;  %v975_v29 = vadd.f32 %v974_v2, %v973_v60  ;;  %v1066_v44 = vmul.f32 %v1035_v23, %v6304_v38 }
  0xf1   : > { %v1038_v28 = vrot.slane %v6292_v26, 7  ;;  %v1023_v48 = vadd.f32 %v1022_v30, %v1021_v1  ;;  %v1062_v53 = vmul.f32 %v6292_v26, %v6298_v32  ;;  %v1117_v58 = vrot.slane %v1063_v35, 7 }
  0xf2   : > { %v980_v41 = vrot.slane %v979_v34, 1  ;;  %v1026_v46 = vrot.slane %v1025_v40, 2  ;;  %v1068_v27 = vmul.f32 %v1037_v47, %v975_v29  ;;  %v1120_v60 = vrot.slane %v1064_v33, 6  ;;  %v5458_v33 = vld [vmem:[%s7528_s9 + $0x8] sm:$0xff]  }
  0xf3   : > { %v1129_v50 = vrot.slane %v1067_v0, 3  ;;  %v1075_v59 = vmul.f32 %v1043_v3, %v1017_v63  ;;  %v1119_v31 = vsel %vm1118_vm1, %v1117_v58, %v1062_v53  ;;  %v1123_v36 = vrot.slane %v1065_v42, 5  ;;  %v5463_v42 = vld [vmem:[%s7528_s9 + $0x48] sm:$0xff]   ;;  %v5469_v53 = vld [vmem:[%s7528_s9 + $0x60] sm:$0xff]  }
  0xf4   : > { %v981_v43 = vadd.f32 %v980_v41, %v979_v34  ;;  %v1027_v55 = vadd.f32 %v1026_v46, %v1025_v40  ;;  %v1126_v51 = vrot.slane %v1066_v44, 4  ;;  %v1040_v38 = vrot.slane %v6311_v56, 2  ;;  %v5464_v58 = vld [vmem:[%s7528_s9 + $0x28] sm:$0xff]  }
  0xf5   : > { %v1122_v23 = vsel %vm1121_vm2, %v1120_v60, %v1119_v31  ;;  %v1132_v62 = vrot.slane %v1068_v27, 2  ;;  %v1045_v1 = vrot.slane %v6311_v56, 7  ;;  %v1076_v2 = vmul.f32 %v1044_v4, %v1023_v48  ;;  %v5465_v27 = vld [vmem:[%s7528_s9 + $0x50] sm:$0xff]   ;;  %v5462_v48 = vld [vmem:[%s7528_s9 + $0x20] sm:$0xff]   ;;  %v5470_v60 = vld [vmem:[%s7528_s9 + $0x68] sm:$0xff]  }
  0xf6   : > { %v1028_v39 = vrot.slane %v1027_v55, 1  ;;  %v1069_v57 = vmul.f32 %v1038_v28, %v981_v43  ;;  %v1125_v26 = vsel %vm1124_vm3, %v1123_v36, %v1122_v23  ;;  %v1072_v3 = vmul.f32 %v1040_v38, %v6302_v37  ;;  %v5459_v28 = vld [vmem:[%s7528_s9 + $0x10] sm:$0xff]   ;;  %v5476_v23 = vld [vmem:[%s6142_s27 + $0x18] sm:$0xff]  }
  0xf7   : > { %v1139_v34 = vsel %vm1118_vm1, %v1138_v24, %v1070_v45  ;;  %v1128_v40 = vsel %vm1127_vm4, %v1126_v51, %v1125_v26  ;;  %v1144_v29 = vrot.slane %v1074_v49, 4  ;;  %v1142_v63 = vrot.slane %v1073_v25, 5  ;;  %v5474_v36 = vld [vmem:[%s6142_s27 + $0x8] sm:$0xff]   ;;  %v5475_v38 = vld [vmem:[%s6142_s27 + $0x10] sm:$0xff]  }
  0xf8   : > { %v1029_v61 = vadd.f32 %v1028_v39, %v1027_v55  ;;  %v1135_v32 = vrot.slane %v1069_v57, 1  ;;  %v1131_v30 = vsel %vm1130_vm5, %v1129_v50, %v1128_v40  ;;  %v1140_v35 = vrot.slane %v1072_v3, 6  ;;  %v5473_v55 = vld [vmem:[%s6142_s27] sm:$0xff]   ;;  %v5466_v50 = vld [vmem:[%s7528_s9 + $0x30] sm:$0xff]   ;;  %v5468_v39 = vld [vmem:[%s7528_s9 + $0x38] sm:$0xff]  }
  0xf9   : > { %v1146_v41 = vrot.slane %v1075_v59, 3  ;;  %v1134_v56 = vsel %vm1133_vm6, %v1132_v62, %v1131_v30  ;;  %v1148_v4 = vrot.slane %v1076_v2, 2  ;;  %v1335_v43 = vpack.c.bf16 %v6088_v6, %v6086_v5  ;;  %v5471_v59 = vld [vmem:[%s7528_s9 + $0x70] sm:$0xff]   ;;  %v5472_v57 = vld [vmem:[%s7528_s9 + $0x78] sm:$0xff]   ;;  %v4817_v3 = vld [vmem:[%s7525_s6] ss:$0 sm:$0xff] }
  0xfa   : > { %v1077_v0 = vmul.f32 %v1045_v1, %v1029_v61  ;;  %v1137_v46 = vsel %vm1136_vm7, %v1135_v32, %v1134_v56  ;;  %v1141_v37 = vsel %vm1121_vm2, %v1140_v35, %v1139_v34  ;;  %v1336_v31 = vpack.c.bf16 %v6093_v8, %v6090_v7  ;;  %v4818_v34 = vld [vmem:[%s7527_s8] ss:$0 sm:$0xff] }
  0xfb   : > { %5151 = vmatprep.mubr.f32.mxu0 %v1137_v46  ;;  %5186 = vmatprep.mubr.f32.mxu1 %v1137_v46  ;;  %v1143_v45 = vsel %vm1124_vm3, %v1142_v63, %v1141_v37  ;;  %v1337_v51 = vpack.c.bf16 %v6097_v10, %v6095_v9  ;;  %v1338_v61 = vpack.c.bf16 %v6101_v12, %v6099_v11  ;;  %v5909_v32 = vmov 0.0  }
  0xfc   : > { %v1150_v24 = vrot.slane %v1077_v0, 1  ;;  %v1145_v47 = vsel %vm1127_vm4, %v1144_v29, %v1143_v45  ;;  %v1339_v62 = vpack.c.bf16 %v6113_v14, %v6103_v13  ;;  %v1340_v1 = vpack.c.bf16 %v6117_v16, %v6115_v15  ;;  %1690 = vst.msk [vmem:[#allocation6] sm:$0x1] %vm1689_vm8, %v5909_v32  ;;  %1691 = vst [vmem:[%s6133_s12] sm:$0xff] %v5909_v32 }
  0xfd   : > { %v1147_v49 = vsel %vm1130_vm5, %v1146_v41, %v1145_v47  ;;  %v1341_v2 = vpack.c.bf16 %v6126_v18, %v6124_v17  ;;  %v1342_v26 = vpack.c.bf16 %v6135_v20, %v6128_v19 }
  0xfe   : > { %v1149_v25 = vsel %vm1133_vm6, %v1148_v4, %v1147_v49 }
  0xff   : > { %v1151_v44 = vsel %vm1136_vm7, %v1150_v24, %v1149_v25 }
 0x100   : > { %5152 = vmatmul.mubr.f32.vlgmr.msra.gmra.mrb[0].mxu0 %v1151_v44  ;;  %5187 = vmatmul.mubr.f32.vlgmr.msra.gmra.mrb[0].mxu1 %v1151_v44 }
 0x101   : > { %5190 = vmatpush3.bf16.msra.mxu0 %v6272_v52  ;;  %5222 = vmatpush3.bf16.msra.mxu1 %v6278_v54  ;;  %v5460_v52 = vld [vmem:[%s7528_s9 + $0x18] sm:$0xff]  }
 0x102   : > { %5191 = vmatprep.subr.bf16.mxu0 %v5458_v33  ;;  %5223 = vmatprep.subr.bf16.mxu1 %v5463_v42  ;;  %v5467_v54 = vld [vmem:[%s7528_s9 + $0x58] sm:$0xff]  }
 0x103   : > { %5205 = vmatprep.mubr.bf16.mxu0 %v1335_v43  ;;  %5237 = vmatprep.mubr.bf16.mxu1 %v5473_v55 }
 0x105   : > { %5192 = vmatpush3.bf16.msra.mxu0 %v5458_v33  ;;  %5224 = vmatpush3.bf16.msra.mxu1 %v5463_v42 }
 0x106   : > { %5193 = vmatprep.subr.bf16.mxu0 %v5459_v28  ;;  %5225 = vmatprep.subr.bf16.mxu1 %v5465_v27 }
 0x109   : > { %5194 = vmatpush3.bf16.msra.mxu0 %v5459_v28  ;;  %5226 = vmatpush3.bf16.msra.mxu1 %v5465_v27 }
 0x10a   : > { %5195 = vmatprep.subr.bf16.mxu0 %v5460_v52  ;;  %5227 = vmatprep.subr.bf16.mxu1 %v5467_v54 }
 0x10d   : > { %5196 = vmatpush3.bf16.msra.mxu0 %v5460_v52  ;;  %5228 = vmatpush3.bf16.msra.mxu1 %v5467_v54 }
 0x10e   : > { %5197 = vmatprep.subr.bf16.mxu0 %v5462_v48  ;;  %5229 = vmatprep.subr.bf16.mxu1 %v5469_v53 }
 0x111   : > { %5198 = vmatpush3.bf16.msra.mxu0 %v5462_v48  ;;  %5230 = vmatpush3.bf16.msra.mxu1 %v5469_v53 }
 0x112   : > { %5199 = vmatprep.subr.bf16.mxu0 %v5464_v58  ;;  %5231 = vmatprep.subr.bf16.mxu1 %v5470_v60 }
 0x115   : > { %5200 = vmatpush3.bf16.msra.mxu0 %v5464_v58  ;;  %5232 = vmatpush3.bf16.msra.mxu1 %v5470_v60 }
 0x116   : > { %5201 = vmatprep.subr.bf16.mxu0 %v5466_v50  ;;  %5233 = vmatprep.subr.bf16.mxu1 %v5471_v59 }
 0x119   : > { %5202 = vmatpush3.bf16.msra.mxu0 %v5466_v50  ;;  %5234 = vmatpush3.bf16.msra.mxu1 %v5471_v59 }
 0x11a   : > { %5203 = vmatprep.subr.bf16.mxu0 %v5468_v39  ;;  %5235 = vmatprep.subr.bf16.mxu1 %v5472_v57 }
 0x11d   : > { %5204 = vmatpush3.bf16.msra.mxu0 %v5468_v39  ;;  %5236 = vmatpush3.bf16.msra.mxu1 %v5472_v57 }
 0x120   : > { %5206 = vmatmul.mubr.bf16.vlgmr.msra.gmra.mrb[4].mxu0 %v1336_v31  ;;  %5238 = vmatmul.mubr.bf16.vlgmr.msra.gmra.mrb[4].mxu1 %v5474_v36 }
 0x121   : > { %5209 = vmatprep.mubr.bf16.mxu0 %v1337_v51  ;;  %5241 = vmatprep.mubr.bf16.mxu1 %v5475_v38 }
 0x128   : > { %5210 = vmatmul.mubr.bf16.gmra.mrb[8].mxu0 %v1338_v61  ;;  %5242 = vmatmul.mubr.bf16.gmra.mrb[8].mxu1 %v5476_v23 }
 0x129   : > { %5213 = vmatprep.mubr.bf16.mxu0 %v1339_v62 }
 0x130   : > { %5214 = vmatmul.mubr.bf16.gmra.mrb[12].mxu0 %v1340_v1 }
 0x131   : > { %5217 = vmatprep.mubr.bf16.mxu0 %v1341_v2 }
 0x138   : > { %5218 = vmatmul.mubr.bf16.gmra.mrb[16].mxu0 %v1342_v26 }
 0x1d3   : > { %v5153_v40 = vpop.f32.mrb[0].mxu0  ;;  %v5188_v0 = vpop.f32.mrb[0].mxu1 }
 0x1d4   : > { %v1226_v29 = vadd.f32 %v5153_v40, %v4817_v3  ;;  %v1328_v30 = vadd.f32 %v5188_v0, %v4818_v34  ;;  %v1220_v35 = vpop.f32.mrb[1].mxu0  ;;  %v1322_v63 = vpop.f32.mrb[1].mxu1 }
 0x1d5   : > { %v1221_v41 = vadd.f32 %v4817_v3, %v1220_v35  ;;  %v1323_v56 = vadd.f32 %v4818_v34, %v1322_v63 }
 0x1d6   : > { %5481 = vtanh.f32 %v1226_v29 }
 0x1d7   : > { %5483 = vtanh.f32 %v1328_v30 }
 0x1d8   : > { %5485 = vtanh.f32 %v1221_v41 }
 0x1d9   : > { %5487 = vtanh.f32 %v1323_v56 }
 0x1e0   : > { %v5482_v4 = vpop.eup %5481 }
 0x1e1   : > { %v5484_v46 = vpop.eup %5483  ;;  %1232 = vst [vmem:[#allocation4 + $0x8] sm:$0xff] %v5482_v4 }
 0x1e2   : > { %v5486_v37 = vpop.eup %5485  ;;  %1334 = vst [vmem:[#allocation5 + $0x8] sm:$0xff] %v5484_v46 }
 0x1e3   : > { %v5488_v45 = vpop.eup %5487  ;;  %1231 = vst [vmem:[#allocation4] sm:$0xff] %v5486_v37 }
 0x1e4   : > { %1333 = vst [vmem:[#allocation5] sm:$0xff] %v5488_v45 }
 0x1f3   : > { %v5207_v24 = vpop.f32.mrb[4].mxu0  ;;  %v5239_v47 = vpop.f32.mrb[4].mxu1 }
 0x1f4   : > { %1506 = vst [vmem:[#allocation2 + $0x10] sm:$0xff] %v5207_v24  ;;  %v1441_v49 = vpop.f32.mrb[5].mxu0  ;;  %1683 = vst [vmem:[#allocation3 + $0x10] sm:$0xff] %v5239_v47  ;;  %v1650_v25 = vpop.f32.mrb[5].mxu1 }
 0x1f5   : > { %1504 = vst [vmem:[#allocation2] sm:$0xff] %v1441_v49  ;;  %v5208_v33 = vpop.f32.mrb[6].mxu0  ;;  %1681 = vst [vmem:[#allocation3] sm:$0xff] %v1650_v25  ;;  %v5240_v42 = vpop.f32.mrb[6].mxu1 }
 0x1f6   : > { %1507 = vst [vmem:[#allocation2 + $0x18] sm:$0xff] %v5208_v33  ;;  %v1444_v44 = vpop.f32.mrb[7].mxu0  ;;  %1684 = vst [vmem:[#allocation3 + $0x18] sm:$0xff] %v5240_v42  ;;  %v1653_v43 = vpop.f32.mrb[7].mxu1 }
 0x1f7   : > { %1505 = vst [vmem:[#allocation2 + $0x8] sm:$0xff] %v1444_v44  ;;  %1682 = vst [vmem:[#allocation3 + $0x8] sm:$0xff] %v1653_v43 }
 0x1fb   : > { %v5211_v55 = vpop.f32.mrb[8].mxu0  ;;  %v5243_v28 = vpop.f32.mrb[8].mxu1 }
 0x1fc   : > { %1510 = vst [vmem:[#allocation2 + $0x30] sm:$0xff] %v5211_v55  ;;  %v1457_v27 = vpop.f32.mrb[9].mxu0  ;;  %1687 = vst [vmem:[#allocation3 + $0x30] sm:$0xff] %v5243_v28  ;;  %v1666_v52 = vpop.f32.mrb[9].mxu1 }
 0x1fd   : > { %1508 = vst [vmem:[#allocation2 + $0x20] sm:$0xff] %v1457_v27  ;;  %v5212_v54 = vpop.f32.mrb[10].mxu0  ;;  %1685 = vst [vmem:[#allocation3 + $0x20] sm:$0xff] %v1666_v52  ;;  %v5244_v48 = vpop.f32.mrb[10].mxu1 }
 0x1fe   : > { %1511 = vst [vmem:[#allocation2 + $0x38] sm:$0xff] %v5212_v54  ;;  %v1460_v53 = vpop.f32.mrb[11].mxu0  ;;  %1688 = vst [vmem:[#allocation3 + $0x38] sm:$0xff] %v5244_v48  ;;  %v1669_v58 = vpop.f32.mrb[11].mxu1 }
 0x1ff   : > { %1509 = vst [vmem:[#allocation2 + $0x28] sm:$0xff] %v1460_v53  ;;  %1686 = vst [vmem:[#allocation3 + $0x28] sm:$0xff] %v1669_v58 }
 0x203   : > { %v5215_v60 = vpop.f32.mrb[12].mxu0 }
 0x204   : > { %1514 = vst [vmem:[#allocation2 + $0x50] sm:$0xff] %v5215_v60  ;;  %v1473_v50 = vpop.f32.mrb[13].mxu0 }
 0x205   : > { %1512 = vst [vmem:[#allocation2 + $0x40] sm:$0xff] %v1473_v50  ;;  %v5216_v59 = vpop.f32.mrb[14].mxu0 }
 0x206   : > { %1515 = vst [vmem:[#allocation2 + $0x58] sm:$0xff] %v5216_v59  ;;  %v1476_v39 = vpop.f32.mrb[15].mxu0 }
 0x207   : > { %1513 = vst [vmem:[#allocation2 + $0x48] sm:$0xff] %v1476_v39 }
 0x20b   : > { %v5219_v57 = vpop.f32.mrb[16].mxu0 }
 0x20c   : > { %1518 = vst [vmem:[#allocation2 + $0x70] sm:$0xff] %v5219_v57  ;;  %v1489_v31 = vpop.f32.mrb[17].mxu0 }
 0x20d   : > { %1516 = vst [vmem:[#allocation2 + $0x60] sm:$0xff] %v1489_v31  ;;  %v5220_v36 = vpop.f32.mrb[18].mxu0 }
 0x20e   : > { %1519 = vst [vmem:[#allocation2 + $0x78] sm:$0xff] %v5220_v36  ;;  %v1492_v51 = vpop.f32.mrb[19].mxu0 }
 0x20f   : > { %1517 = vst [vmem:[#allocation2 + $0x68] sm:$0xff] %v1492_v51 }
 0x210 PF: > { %v5491_v38 = vld [vmem:[%s7528_s9 + $0x80] sm:$0xff]   ;;  %v7549_v61 = vlaneseq  ;;  %v7545_v23 = vmov 0.0   ;;  %v5492_v62 = vld [vmem:[%s7528_s9 + $0x88] sm:$0xff]   ;;  %vm5911_vm9 = vmmov 0   ;;  %v7547_v26 = vmov 0   ;;  %v5493_v3 = vld [vmem:[%s7528_s9 + $0x90] sm:$0xff]  }
 0x211   : > { %5245 = vmatprep.subr.bf16.mxu0 %v7545_v23  ;;  %5261 = vmatprep.mubr.msk.bf16.mxu0 %vm5911_vm9, %v7545_v23  ;;  %v5494_v40 = vld [vmem:[%s7528_s9 + $0x98] sm:$0xff]   ;;  %v4852_v30 = vld [vmem:[#allocation7] ss:$0 sm:$0xff]  ;;  %v5496_v37 = vld [vmem:[%s7528_s9 + $0xa8] sm:$0xff]   ;;  %s4849_s29 = sshll.u32 %s5891_s1, 4  ;;  %vm2309_vm10 = vcmask 7168  }
 0x212   : > { %5246 = vmatpush3.bf16.msra.mxu0 %v5491_v38  ;;  %v6437_v1 = vshrl.u32 %v7549_v61, 7  ;;  %5489 = vset.pattern.permute.xlu0 %v7547_v26  ;;  %v5495_v63 = vld [vmem:[%s7528_s9 + $0xa0] sm:$0xff]   ;;  %v5497_v47 = vld [vmem:[%s7528_s9 + $0xb0] sm:$0xff]   ;;  %v5498_v33 = vld [vmem:[%s7528_s9 + $0xb8] sm:$0xff]   ;;  %v5913_v60 = vmov 1966171168  }
 0x213   : > { %5247 = vmatprep.subr.bf16.mxu0 %v7545_v23  ;;  %5490 = vset.pattern.permute.xlu1 %v7547_v26  ;;  %v1697_v42 = vld [vmem:[#allocation4] sm:$0xff]  ;;  %v1698_v44 = vld [vmem:[#allocation4 + $0x8] sm:$0xff]  ;;  %s1824_s18 = scalar_lea.vmem [#allocation3], %s4849_s29  ;;  %vm2543_vm11 = vcmask 1041409   ;;  %vm2545_vm12 = vcmask 1042434   ;;  %vm2547_vm13 = vcmask 1043459  }
 0x214   : > { %v6441_v2 = vsub.s32 0, %v6437_v1  ;;  %v6446_v32 = vsub.s32 1, %v6437_v1  ;;  %3187 = vmatprep.mubr.bf16.mxu1 %v7547_v26  ;;  %v6461_v29 = vsub.s32 2, %v6437_v1  ;;  %2144 = vperm.xlu0 %5489, %v4852_v30   ;;  %v6472_v56 = vsub.s32 3, %v6437_v1  ;;  %v1825_v59 = vld [vmem:[%s1824_s18] sm:$0xff]  ;;  %v1826_v31 = vld [vmem:[%s1824_s18 + $0x8] sm:$0xff] }
 0x215   : > { %v6478_v46 = vsub.s32 4, %v6437_v1  ;;  %v6494_v25 = vsub.s32 5, %v6437_v1  ;;  %v6503_v55 = vsub.s32 6, %v6437_v1  ;;  %v6509_v27 = vsub.s32 7, %v6437_v1  ;;  %v4850_v57 = vld [vmem:[%s7529_s10] ss:$0 sm:$0xff] }
 0x216   : > { %5248 = vmatpush3.bf16.msra.mxu0 %v5492_v62  ;;  %v2168_v34 = vrot.slane %v6137_v21, %v6441_v2  ;;  %v2175_v0 = vrot.slane %v6137_v21, %v6446_v32  ;;  %v2224_v35 = vrot.slane %v6139_v22, %v6441_v2  ;;  %v2182_v41 = vrot.slane %v6137_v21, %v6461_v29  ;;  %s5027_s2 = sshll.u32 %s5891_s1, 3  ;;  %s7627_s0 = sld [smem:[#allocation38_spill]] }
 0x217   : > { %5249 = vmatprep.subr.bf16.mxu0 %v7545_v23  ;;  %v2238_v4 = vrot.slane %v6139_v22, %v6461_v29  ;;  %v2189_v45 = vrot.slane %v6137_v21, %v6472_v56  ;;  %v2252_v24 = vrot.slane %v6139_v22, %v6478_v46  ;;  %v2196_v49 = vrot.slane %v6137_v21, %v6478_v46  ;;  %s6962_s22 = scalar_lea.vmem %s6142_s27, %s5027_s2 [#allocation8]  ;;  %p5022_p0 = scmp.ne.s32.totalorder %s5891_s1, 3 }
 0x218   : > { %2170 = vbcast.lane.b32.xlu1 %v2168_v34, 256  ;;  %2226 = vbcast.lane.b32.xlu0 %v2224_v35, 256  ;;  %v2203_v43 = vrot.slane %v6137_v21, %v6494_v25  ;;  %v2210_v28 = vrot.slane %v6137_v21, %v6503_v55  ;;  %7602 = vst [vmem:[#allocation32_spill] sm:$0xff] %v6509_v27  ;;  %vm2549_vm14 = vcmask 1044484   ;;  %vm2551_vm15 = vcmask 1045509  }
 0x219   : > { %v6511_v52 = vpack.c.bf16 %v1698_v44, %v1697_v42  ;;  %v2217_v54 = vrot.slane %v6137_v21, %v6509_v27  ;;  %v2231_v48 = vrot.slane %v6139_v22, %v6446_v32  ;;  %v2245_v53 = vrot.slane %v6139_v22, %v6472_v56 }
 0x21a   : > { %5250 = vmatpush3.bf16.msra.mxu0 %v5493_v3  ;;  %v2259_v58 = vrot.slane %v6139_v22, %v6494_v25  ;;  %v1842_v21 = vunpack.c.l.s4 %v5913_v60  ;;  %vm2553_vm0 = vcmask 1046534   ;;  %vm2555_vm1 = vcmask 1047559  }
 0x21b   : > { %5251 = vmatprep.subr.bf16.mxu0 %v7545_v23  ;;  %7603 = vst [vmem:[#allocation33_spill] sm:$0xff] %v6511_v52  ;;  %vm2566_vm2 = vcmask 64512   ;;  %vm4308_vm4 = vcmask 31744  }
 0x21c   : > { %2177 = vbcast.lane.b32.xlu1 %v2175_v0, 256  ;;  %2240 = vbcast.lane.b32.xlu0 %v2238_v4, 256  ;;  %v1843_v50 = vunpack.c.0.s8 %v1842_v21 }
 0x21e   : > { %5252 = vmatpush3.bf16.msra.mxu0 %v5494_v40  ;;  %v6528_v51 = vsub.s32 %v1843_v50, %v6437_v1  ;;  %v1808_v50 = vld [vmem:[#allocation2 + $0x8] sm:$0xff] }
 0x21f   : > { %5253 = vmatprep.subr.bf16.mxu0 %v7545_v23 }
 0x220   : > { %2184 = vbcast.lane.b32.xlu1 %v2182_v41, 256  ;;  %2254 = vbcast.lane.b32.xlu0 %v2252_v24, 256 }
 0x222   : > { %5254 = vmatpush3.bf16.msra.mxu0 %v5495_v63 }
 0x223   : > { %5255 = vmatprep.subr.bf16.mxu0 %v7545_v23 }
 0x224   : > { %2191 = vbcast.lane.b32.xlu1 %v2189_v45, 256 }
 0x226   : > { %5256 = vmatpush3.bf16.msra.mxu0 %v5496_v37 }
 0x227   : > { %5257 = vmatprep.subr.bf16.mxu0 %v7545_v23 }
 0x228   : > { %2198 = vbcast.lane.b32.xlu1 %v2196_v49, 256 }
 0x22a   : > { %5258 = vmatpush3.bf16.msra.mxu0 %v5497_v47 }
 0x22b   : > { %5259 = vmatprep.subr.bf16.mxu0 %v7545_v23 }
 0x22c   : > { %2205 = vbcast.lane.b32.xlu1 %v2203_v43, 256 }
 0x22e   : > { %5260 = vmatpush3.bf16.msra.mxu0 %v5498_v33 }
 0x230   : > { %2212 = vbcast.lane.b32.xlu1 %v2210_v28, 256  ;;  %v1807_v28 = vld [vmem:[#allocation2] sm:$0xff] }
 0x231   : > { %5262 = vmatmul.mubr.bf16.vlgmr.msra.gmra.mrb[0].mxu0 %v6511_v52 }
 0x232   : > { %3230 = vmatprep.mubr.bf16.mxu0 %v7547_v26 }
 0x234   : > { %2219 = vbcast.lane.b32.xlu1 %v2217_v54, 256  ;;  %v1809_v54 = vld [vmem:[#allocation2 + $0x10] sm:$0xff] }
 0x238   : > { %2233 = vbcast.lane.b32.xlu1 %v2231_v48, 256 }
 0x23c   : > { %2247 = vbcast.lane.b32.xlu1 %v2245_v53, 256 }
 0x240   : > { %2261 = vbcast.lane.b32.xlu1 %v2259_v58, 256 }
 0x304   : > { %v1800_v39 = vpop.f32.mrb[0].mxu0 }
 0x305   : > { %v1827_v36 = vadd.f32 %v1825_v59, %v1800_v39  ;;  %v5263_v38 = vpop.f32.mrb[1].mxu0 }
 0x306   : > { %v1803_v62 = vpop.f32.mrb[2].mxu0  ;;  %v1815_v38 = vld [vmem:[#allocation2 + $0x40] sm:$0xff] }
 0x307   : > { %v1836_v3 = vadd.f32 %v4850_v57, %v1827_v36  ;;  %v1828_v34 = vadd.f32 %v1826_v31, %v1803_v62  ;;  %v5264_v40 = vpop.f32.mrb[3].mxu0  ;;  %v1810_v36 = vld [vmem:[#allocation2 + $0x18] sm:$0xff] }
 0x309   : > { %v1840_v0 = vcombine.high %v1836_v3, %v1836_v3  ;;  %v1847_v30 = vrot.slane %v1836_v3, %v6528_v51  ;;  %v1837_v35 = vadd.f32 %v4850_v57, %v1828_v34 }
 0x30b   : > { %v1854_v63 = vrot.slane %v1840_v0, %v6528_v51  ;;  %v1855_v41 = vcombine.high %v1847_v30, %v1847_v30  ;;  %v1863_v4 = vrot.slane %v1847_v30, %v6528_v51  ;;  %v1896_v37 = vrot.slane %v1837_v35, %v6528_v51  ;;  %v1811_v0 = vld [vmem:[#allocation2 + $0x20] sm:$0xff] }
 0x30c   : > { %v1889_v42 = vcombine.high %v1837_v35, %v1837_v35 }
 0x30d   : > { %v1856_v45 = vcombine.high %v1854_v63, %v1854_v63  ;;  %v1870_v24 = vrot.slane %v1854_v63, %v6528_v51  ;;  %v1877_v47 = vrot.slane %v1855_v41, %v6528_v51  ;;  %v1885_v49 = vcombine.high %v1863_v4, %v1863_v4 }
 0x30e   : > { %v1941_v33 = vrot.slane %v1863_v4, %v6441_v2  ;;  %v1904_v44 = vcombine.high %v1896_v37, %v1896_v37  ;;  %v1912_v43 = vrot.slane %v1896_v37, %v6528_v51  ;;  %v1903_v62 = vrot.slane %v1889_v42, %v6528_v51  ;;  %v1812_v4 = vld [vmem:[#allocation2 + $0x28] sm:$0xff] }
 0x30f   : > { %v1887_v48 = vcombine.high %v1877_v47, %v1877_v47  ;;  %v1949_v53 = vrot.slane %v1885_v49, %v6441_v2  ;;  %v1884_v58 = vrot.slane %v1856_v45, %v6528_v51  ;;  %v1886_v60 = vcombine.high %v1870_v24, %v1870_v24 }
 0x310   : > { %v1926_v21 = vrot.slane %v1904_v44, %v6528_v51  ;;  %v1973_v59 = vrot.slane %v1912_v43, %v6441_v2  ;;  %v2018_v39 = vadd.f32 %v1941_v33, %v1807_v28  ;;  %v1945_v31 = vrot.slane %v1877_v47, %v6441_v2  ;;  %v1816_v47 = vld [vmem:[#allocation2 + $0x48] sm:$0xff] }
 0x311   : > { %v2020_v57 = vadd.f32 %v1949_v53, %v1809_v54  ;;  %v1934_v3 = vcombine.high %v1912_v43, %v1912_v43  ;;  %v1953_v40 = vrot.slane %v1887_v48, %v6441_v2  ;;  %v1957_v41 = vrot.slane %v1870_v24, %v6441_v2  ;;  %v1813_v53 = vld [vmem:[#allocation2 + $0x30] sm:$0xff] }
 0x312   : > { %v1936_v34 = vcombine.high %v1926_v21, %v1926_v21  ;;  %v2034_v30 = vpack.c.bf16 %v2018_v39, %v2018_v39  ;;  %v2019_v63 = vadd.f32 %v1945_v31, %v1808_v50  ;;  %v1961_v45 = vrot.slane %v1884_v58, %v6441_v2 }
 0x313   : > { %v2036_v35 = vpack.c.bf16 %v2020_v57, %v2020_v57  ;;  %v2021_v37 = vadd.f32 %v1953_v40, %v1810_v36  ;;  %v2026_v49 = vadd.f32 %v1973_v59, %v1815_v38  ;;  %v1977_v33 = vrot.slane %v1926_v21, %v6441_v2  ;;  %v1814_v38 = vld [vmem:[#allocation2 + $0x38] sm:$0xff] }
 0x314   : > { %5732 = vtanh.bf16 %v2034_v30  ;;  %v2035_v42 = vpack.c.bf16 %v2019_v63, %v2019_v63  ;;  %v2022_v44 = vadd.f32 %v1957_v41, %v1811_v0  ;;  %v1965_v43 = vrot.slane %v1886_v60, %v6441_v2  ;;  %v1817_v60 = vld [vmem:[#allocation2 + $0x50] sm:$0xff] }
 0x315   : > { %v1905_v28 = vcombine.high %v1903_v62, %v1903_v62  ;;  %5734 = vtanh.bf16 %v2036_v35  ;;  %v2037_v54 = vpack.c.bf16 %v2021_v37, %v2021_v37  ;;  %v2023_v48 = vadd.f32 %v1961_v45, %v1812_v4  ;;  %v1818_v35 = vld [vmem:[#allocation2 + $0x58] sm:$0xff] }
 0x316   : > { %v1919_v24 = vrot.slane %v1903_v62, %v6528_v51  ;;  %5736 = vtanh.bf16 %v2035_v42  ;;  %v2038_v50 = vpack.c.bf16 %v2022_v44, %v2022_v44  ;;  %v2027_v39 = vadd.f32 %v1977_v33, %v1816_v47  ;;  %v6559_v42 = vld [vmem:[%s7530_s11] ss:$0 sm:$0xff] }
 0x317   : > { %5738 = vtanh.bf16 %v2037_v54  ;;  %v2039_v59 = vpack.c.bf16 %v2023_v48, %v2023_v48  ;;  %v1888_v57 = vcombine.high %v1884_v58, %v1884_v58  ;;  %v1981_v21 = vrot.slane %v1934_v3, %v6441_v2 }
 0x318   : > { %5740 = vtanh.bf16 %v2038_v50  ;;  %v2042_v31 = vpack.c.bf16 %v2026_v49, %v2026_v49  ;;  %v2024_v36 = vadd.f32 %v1965_v43, %v1813_v53  ;;  %v1985_v40 = vrot.slane %v1936_v34, %v6441_v2  ;;  %v1819_v49 = vld [vmem:[#allocation2 + $0x60] sm:$0xff] }
 0x319   : > { %v1933_v0 = vrot.slane %v1905_v28, %v6528_v51  ;;  %5742 = vtanh.bf16 %v2039_v59  ;;  %v2043_v30 = vpack.c.bf16 %v2027_v39, %v2027_v39  ;;  %v1969_v62 = vrot.slane %v1888_v57, %v6441_v2  ;;  %v1820_v51 = vld [vmem:[#allocation2 + $0x68] sm:$0xff]  ;;  %v1821_v59 = vld [vmem:[#allocation2 + $0x70] sm:$0xff] }
 0x31a   : > { %v1935_v63 = vcombine.high %v1919_v24, %v1919_v24  ;;  %v2028_v4 = vadd.f32 %v1981_v21, %v1817_v60  ;;  %5744 = vtanh.bf16 %v2042_v31  ;;  %v2040_v58 = vpack.c.bf16 %v2024_v36, %v2024_v36 }
 0x31b   : > { %v2025_v41 = vadd.f32 %v1969_v62, %v1814_v38  ;;  %v2029_v3 = vadd.f32 %v1985_v40, %v1818_v35  ;;  %v1989_v37 = vrot.slane %v1919_v24, %v6441_v2  ;;  %5746 = vtanh.bf16 %v2043_v30  ;;  %v1822_v38 = vld [vmem:[#allocation2 + $0x78] sm:$0xff] }
 0x31c   : > { %v1993_v34 = vrot.slane %v1933_v0, %v6441_v2  ;;  %v1937_v47 = vcombine.high %v1933_v0, %v1933_v0  ;;  %v2044_v44 = vpack.c.bf16 %v2028_v4, %v2028_v4  ;;  %v1997_v43 = vrot.slane %v1935_v63, %v6441_v2 }
 0x31d   : > { %v2041_v45 = vpack.c.bf16 %v2025_v41, %v2025_v41  ;;  %5748 = vtanh.bf16 %v2040_v58  ;;  %v2045_v48 = vpack.c.bf16 %v2029_v3, %v2029_v3  ;;  %v2030_v53 = vadd.f32 %v1989_v37, %v1819_v49 }
 0x31e   : > { %v2031_v39 = vadd.f32 %v1993_v34, %v1820_v51  ;;  %v2001_v57 = vrot.slane %v1937_v47, %v6441_v2  ;;  %v2032_v35 = vadd.f32 %v1997_v43, %v1821_v59 }
 0x31f   : > { %v5733_v33 = vpop.eup %5732  ;;  %5750 = vtanh.bf16 %v2041_v45  ;;  %v2046_v62 = vpack.c.bf16 %v2030_v53, %v2030_v53 }
 0x320   : > { %v5735_v28 = vpop.eup %5734  ;;  %v2067_v54 = vunpack.c.l.bf16 %v5733_v33  ;;  %5752 = vtanh.bf16 %v2044_v44  ;;  %v2047_v63 = vpack.c.bf16 %v2031_v39, %v2031_v39  ;;  %v2033_v41 = vadd.f32 %v2001_v57, %v1822_v38 }
 0x321   : > { %v5737_v24 = vpop.eup %5736  ;;  %v2069_v50 = vunpack.c.l.bf16 %v5735_v28  ;;  %5754 = vtanh.bf16 %v2045_v48  ;;  %v2048_v34 = vpack.c.bf16 %v2032_v35, %v2032_v35 }
 0x322   : > { %v5739_v21 = vpop.eup %5738  ;;  %v2089_v31 = vmul.f32 %v6559_v42, %v2067_v54  ;;  %v2068_v36 = vunpack.c.l.bf16 %v5737_v24  ;;  %5756 = vtanh.bf16 %v2046_v62  ;;  %v2049_v47 = vpack.c.bf16 %v2033_v41, %v2033_v41 }
 0x323   : > { %v5741_v60 = vpop.eup %5740  ;;  %v2091_v40 = vmul.f32 %v6559_v42, %v2069_v50  ;;  %v2070_v0 = vunpack.c.l.bf16 %v5739_v21  ;;  %5758 = vtanh.bf16 %v2047_v63 }
 0x324   : > { %v5743_v30 = vpop.eup %5742  ;;  %2105 = vadd.xlane.f32.xlu0 %v2089_v31  ;;  %v2090_v4 = vmul.f32 %v6559_v42, %v2068_v36  ;;  %v2071_v58 = vunpack.c.l.bf16 %v5741_v60  ;;  %5760 = vtanh.bf16 %v2048_v34  ;;  %v2266_v34 = vrot.slane %v6139_v22, %v6503_v55 }
 0x325   : > { %2109 = vadd.xlane.f32.xlu1 %v2091_v40  ;;  %v5745_v3 = vpop.eup %5744  ;;  %v2092_v37 = vmul.f32 %v6559_v42, %v2070_v0  ;;  %v2072_v45 = vunpack.c.l.bf16 %v5743_v30  ;;  %5762 = vtanh.bf16 %v2049_v47  ;;  %v6583_v47 = vpop.permute.xlu1 %2170 }
 0x326   : > { %v5747_v49 = vpop.eup %5746  ;;  %v2093_v51 = vmul.f32 %v6559_v42, %v2071_v58  ;;  %v2075_v33 = vunpack.c.l.bf16 %v5745_v3 }
 0x327   : > { %v2094_v43 = vmul.f32 %v6559_v42, %v2072_v45  ;;  %v2076_v28 = vunpack.c.l.bf16 %v5747_v49  ;;  %v2273_v49 = vrot.slane %v6139_v22, %v6509_v27 }
 0x328   : > { %2107 = vadd.xlane.f32.xlu0 %v2090_v4  ;;  %v5749_v44 = vpop.eup %5748  ;;  %v2097_v48 = vmul.f32 %v6559_v42, %v2075_v33 }
 0x329   : > { %2111 = vadd.xlane.f32.xlu1 %v2092_v37  ;;  %v2073_v53 = vunpack.c.l.bf16 %v5749_v44  ;;  %v2098_v50 = vmul.f32 %v6559_v42, %v2076_v28 }
 0x32a   : > { %v5751_v54 = vpop.eup %5750 }
 0x32b   : > { %v5753_v24 = vpop.eup %5752  ;;  %v2074_v39 = vunpack.c.l.bf16 %v5751_v54  ;;  %v2095_v57 = vmul.f32 %v6559_v42, %v2073_v53  ;;  %v6597_v54 = vpop.permute.xlu0 %2144 }
 0x32c   : > { %2113 = vadd.xlane.f32.xlu0 %v2093_v51  ;;  %v5755_v59 = vpop.eup %5754  ;;  %v2077_v21 = vunpack.c.l.bf16 %v5753_v24  ;;  %v6585_v51 = vpop.permute.xlu1 %2177 }
 0x32d   : > { %2115 = vadd.xlane.f32.xlu1 %v2094_v43  ;;  %v5757_v31 = vpop.eup %5756  ;;  %v2096_v36 = vmul.f32 %v6559_v42, %v2074_v39  ;;  %v2078_v38 = vunpack.c.l.bf16 %v5755_v59 }
 0x32e   : > { %v5759_v60 = vpop.eup %5758  ;;  %v2099_v40 = vmul.f32 %v6559_v42, %v2077_v21  ;;  %v2079_v0 = vunpack.c.l.bf16 %v5757_v31 }
 0x32f   : > { %v5761_v30 = vpop.eup %5760  ;;  %v2100_v62 = vmul.f32 %v6559_v42, %v2078_v38  ;;  %v2080_v35 = vunpack.c.l.bf16 %v5759_v60  ;;  %v6601_v22 = vpop.permute.xlu0 %2226 }
 0x330   : > { %2121 = vadd.xlane.f32.xlu0 %v2097_v48  ;;  %v5763_v63 = vpop.eup %5762  ;;  %v2101_v41 = vmul.f32 %v6559_v42, %v2079_v0  ;;  %v2081_v4 = vunpack.c.l.bf16 %v5761_v30  ;;  %v6587_v33 = vpop.permute.xlu1 %2184 }
 0x331   : > { %2123 = vadd.xlane.f32.xlu1 %v2098_v50  ;;  %v2102_v58 = vmul.f32 %v6559_v42, %v2080_v35  ;;  %v2082_v3 = vunpack.c.l.bf16 %v5763_v63 }
 0x332   : > { %v2103_v37 = vmul.f32 %v6559_v42, %v2081_v4 }
 0x333   : > { %v2104_v45 = vmul.f32 %v6559_v42, %v2082_v3  ;;  %v6605_v24 = vpop.permute.xlu0 %2240 }
 0x334   : > { %2117 = vadd.xlane.f32.xlu0 %v2095_v57  ;;  %v6589_v44 = vpop.permute.xlu1 %2191 }
 0x335   : > { %2119 = vadd.xlane.f32.xlu1 %v2096_v36 }
 0x337   : > { %v6609_v39 = vpop.permute.xlu0 %2254 }
 0x338   : > { %2125 = vadd.xlane.f32.xlu0 %v2099_v40  ;;  %v6591_v43 = vpop.permute.xlu1 %2198 }
 0x339   : > { %2127 = vadd.xlane.f32.xlu1 %v2100_v62 }
 0x33c   : > { %2129 = vadd.xlane.f32.xlu0 %v2101_v41  ;;  %v6593_v42 = vpop.permute.xlu1 %2205 }
 0x33d   : > { %2131 = vadd.xlane.f32.xlu1 %v2102_v58 }
 0x340   : > { %2133 = vadd.xlane.f32.xlu0 %v2103_v37  ;;  %v6595_v28 = vpop.permute.xlu1 %2212 }
 0x341   : > { %2135 = vadd.xlane.f32.xlu1 %v2104_v45 }
 0x344   : > { %v6599_v48 = vpop.permute.xlu1 %2219 }
 0x348   : > { %v6603_v53 = vpop.permute.xlu1 %2233 }
 0x34c   : > { %v6607_v50 = vpop.permute.xlu1 %2247 }
 0x350   : > { %v6611_v59 = vpop.permute.xlu1 %2261 }
 0x352   : > { %2275 = vbcast.lane.b32.xlu1 %v2273_v49, 256 }
 0x356   : > { %2268 = vbcast.lane.b32.xlu0 %v2266_v34, 256 }
 0x3b1   : > { %v2106_v57 = vpop.xlane.xlu0 %2105 }
 0x3b2   : > { %v2110_v21 = vpop.xlane.xlu1 %2109  ;;  %v2147_v63 = vadd.f32 %v6597_v54, %v2106_v57 }
 0x3b3   : > { %v2149_v58 = vadd.f32 %v6597_v54, %v2110_v21 }
 0x3b5   : > { %v2108_v31 = vpop.xlane.xlu0 %2107 }
 0x3b6   : > { %v2112_v36 = vpop.xlane.xlu1 %2111  ;;  %v2148_v3 = vadd.f32 %v6597_v54, %v2108_v31 }
 0x3b7   : > { %v2150_v37 = vadd.f32 %v6597_v54, %v2112_v36 }
 0x3b9   : > { %v2114_v38 = vpop.xlane.xlu0 %2113 }
 0x3ba   : > { %v2116_v60 = vpop.xlane.xlu1 %2115  ;;  %v2151_v35 = vadd.f32 %v6597_v54, %v2114_v38 }
 0x3bb   : > { %v2152_v41 = vadd.f32 %v6597_v54, %v2116_v60  ;;  %v6627_v60 = vmul.f32 %v6583_v47, %v2147_v63 }
 0x3bc   : > { %v6623_v38 = vmul.f32 %v6591_v43, %v2151_v35  ;;  %v6641_v35 = vmul.f32 %v6589_v44, %v2150_v37 }
 0x3bd   : > { %v2122_v40 = vpop.xlane.xlu0 %2121  ;;  %v6630_v21 = vmul.f32 %v6593_v42, %v2152_v41 }
 0x3be   : > { %v2124_v0 = vpop.xlane.xlu1 %2123  ;;  %v2155_v57 = vadd.f32 %v6597_v54, %v2122_v40 }
 0x3bf   : > { %v2156_v45 = vadd.f32 %v6597_v54, %v2124_v0 }
 0x3c0   : > { %v2301_v37 = vmul.f32 %v6601_v22, %v2155_v57 }
 0x3c1   : > { %v2118_v30 = vpop.xlane.xlu0 %2117  ;;  %v6644_v40 = vmul.f32 %v6603_v53, %v2156_v45  ;;  %v2316_v45 = vsel %vm2309_vm10, %v6630_v21, -inf }
 0x3c2   : > { %v2120_v62 = vpop.xlane.xlu1 %2119  ;;  %v2153_v34 = vadd.f32 %v6597_v54, %v2118_v30  ;;  %v6635_v30 = vmul.f32 %v6587_v33, %v2149_v58  ;;  %v2322_v10 = vsel %vm2309_vm10, %v2301_v37, -inf }
 0x3c3   : > { %v2154_v23 = vadd.f32 %v6597_v54, %v2120_v62  ;;  %v6638_v62 = vmul.f32 %v6585_v51, %v2148_v3  ;;  %v2314_v3 = vsel %vm2309_vm10, %v6623_v38, -inf }
 0x3c4   : > { %v6647_v41 = vmul.f32 %v6595_v28, %v2153_v34  ;;  %v2312_v61 = vsel %vm2309_vm10, %v6635_v30, -inf }
 0x3c5   : > { %v2126_v4 = vpop.xlane.xlu0 %2125  ;;  %v2311_v57 = vsel %vm2309_vm10, %v6638_v62, -inf }
 0x3c6   : > { %v2128_v49 = vpop.xlane.xlu1 %2127  ;;  %v2157_v31 = vadd.f32 %v6597_v54, %v2126_v4  ;;  %v6650_v4 = vmul.f32 %v6599_v48, %v2154_v23  ;;  %v2317_v19 = vmax.f32 %v2311_v57, %v2316_v45 }
 0x3c7   : > { %v2158_v36 = vadd.f32 %v6597_v54, %v2128_v49 }
 0x3c8   : > { %v6660_v26 = vmul.f32 %v6605_v24, %v2157_v31  ;;  %v2313_v31 = vsel %vm2309_vm10, %v6641_v35, -inf  ;;  %v2320_v12 = vsel %vm2309_vm10, %v6650_v4, -inf }
 0x3c9   : > { %v2130_v0 = vpop.xlane.xlu0 %2129  ;;  %v6663_v34 = vmul.f32 %v6607_v50, %v2158_v36  ;;  %v2324_v36 = vsel %vm2309_vm10, %v6644_v40, -inf  ;;  %v2321_v45 = vmax.f32 %v2313_v31, %v2320_v12 }
 0x3ca   : > { %v2132_v63 = vpop.xlane.xlu1 %2131  ;;  %v2159_v49 = vadd.f32 %v6597_v54, %v2130_v0  ;;  %v2326_v9 = vsel %vm2309_vm10, %v6660_v26, -inf }
 0x3cb   : > { %v2160_v58 = vadd.f32 %v6597_v54, %v2132_v63  ;;  %v2310_v63 = vsel %vm2309_vm10, %v6627_v60, -inf  ;;  %v2328_v17 = vsel %vm2309_vm10, %v6663_v34, -inf }
 0x3cc   : > { %v6683_v20 = vmul.f32 %v6609_v39, %v2159_v49  ;;  %v2315_v11 = vmax.f32 %v2310_v63, %v2314_v3  ;;  %v2325_v49 = vmax.f32 %v2317_v19, %v2324_v36  ;;  %v2329_v5 = vmax.f32 %v2321_v45, %v2328_v17 }
 0x3cd   : > { %v6666_v23 = vmul.f32 %v6611_v59, %v2160_v58  ;;  %v2134_v0 = vpop.xlane.xlu0 %2133  ;;  %v2318_v58 = vsel %vm2309_vm10, %v6647_v41, -inf }
 0x3ce   : > { %v2136_v52 = vpop.xlane.xlu1 %2135  ;;  %v2161_v18 = vadd.f32 %v6597_v54, %v2134_v0  ;;  %v2319_v3 = vmax.f32 %v2312_v61, %v2318_v58  ;;  %v2323_v57 = vmax.f32 %v2315_v11, %v2322_v10  ;;  %v2330_v15 = vsel %vm2309_vm10, %v6683_v20, -inf }
 0x3cf   : > { %v2332_v8 = vsel %vm2309_vm10, %v6666_v23, -inf  ;;  %v2162_v16 = vadd.f32 %v6597_v54, %v2136_v52 }
 0x3d0   : > { %v2327_v14 = vmax.f32 %v2319_v3, %v2326_v9  ;;  %v2333_v52 = vmax.f32 %v2325_v49, %v2332_v8 }
 0x3d1   : > { %v6694_v7 = vpop.permute.xlu0 %2268 }
 0x3d2   : > { %v6697_v63 = vmul.f32 %v6694_v7, %v2161_v18  ;;  %v6699_v0 = vpop.permute.xlu1 %2275  ;;  %v2331_v18 = vmax.f32 %v2323_v57, %v2330_v15 }
 0x3d3   : > { %v6704_v13 = vmul.f32 %v6699_v0, %v2162_v16 }
 0x3d4   : > { %v2334_v19 = vsel %vm2309_vm10, %v6697_v63, -inf  ;;  %v2338_v31 = vmax.f32 %v2331_v18, %v2333_v52 }
 0x3d5   : > { %v2336_v12 = vsel %vm2309_vm10, %v6704_v13, -inf  ;;  %v2335_v61 = vmax.f32 %v2327_v14, %v2334_v19 }
 0x3d6   : > { %v2337_v54 = vmax.f32 %v2329_v5, %v2336_v12 }
 0x3d8   : > { %v2339_v10 = vmax.f32 %v2335_v61, %v2337_v54 }
 0x3da   : > { %v2340_v11 = vmax.f32 %v2338_v31, %v2339_v10 }
 0x3dc   : > { %v2341_v36 = vrot.slane %v2340_v11, 4 }
 0x3de   : > { %v2342_v58 = vmax.f32 %v2340_v11, %v2341_v36 }
 0x3e0   : > { %v2343_v6 = vrot.slane %v2342_v58, 2 }
 0x3e2   : > { %v2344_v16 = vmax.f32 %v2342_v58, %v2343_v6 }
 0x3e4   : > { %v2345_v27 = vrot.slane %v2344_v16, 1 }
 0x3e6   : > { %v2346_v9 = vmax.f32 %v2344_v16, %v2345_v27 }
 0x3e8   : > { %5393 = vpush %v2346_v9 }
 0x419   : > { %s5394_s3 = spop %5393 }
 0x41a   : > { %v6710_v8 = vstv %s5394_s3 }
 0x41b   : > { %v2350_v17 = vsub.f32 %v6638_v62, %v6710_v8  ;;  %v2349_v14 = vsub.f32 %v6627_v60, %v6710_v8  ;;  %v2358_v5 = vsub.f32 %v6644_v40, %v6710_v8  ;;  %v2357_v15 = vsub.f32 %v2301_v37, %v6710_v8 }
 0x41c   : > { %v2359_v27 = vsub.f32 %v6660_v26, %v6710_v8  ;;  %v2351_v57 = vsub.f32 %v6635_v30, %v6710_v8  ;;  %v2360_v60 = vsub.f32 %v6663_v34, %v6710_v8  ;;  %v2352_v37 = vsub.f32 %v6641_v35, %v6710_v8 }
 0x41d   : > { %v2367_v49 = vmul.f32 1.442695, %v2350_v17  ;;  %v2365_v3 = vmul.f32 1.442695, %v2349_v14  ;;  %v2383_v6 = vmul.f32 1.442695, %v2358_v5  ;;  %v2361_v26 = vsub.f32 %v6683_v20, %v6710_v8 }
 0x41e   : > { %v2381_v45 = vmul.f32 1.442695, %v2357_v15  ;;  %v2385_v62 = vmul.f32 1.442695, %v2359_v27  ;;  %v2369_v40 = vmul.f32 1.442695, %v2351_v57  ;;  %v2353_v30 = vsub.f32 %v6623_v38, %v6710_v8 }
 0x41f   : > { %5764 = vpow2.f32 %v2367_v49  ;;  %v2387_v52 = vmul.f32 1.442695, %v2360_v60  ;;  %v2371_v19 = vmul.f32 1.442695, %v2352_v37  ;;  %v2389_v18 = vmul.f32 1.442695, %v2361_v26 }
 0x420   : > { %5766 = vpow2.f32 %v2365_v3  ;;  %v2362_v34 = vsub.f32 %v6666_v23, %v6710_v8  ;;  %v2373_v35 = vmul.f32 1.442695, %v2353_v30  ;;  %v2354_v20 = vsub.f32 %v6630_v21, %v6710_v8 }
 0x421   : > { %5768 = vpow2.f32 %v2383_v6  ;;  %v2355_v21 = vsub.f32 %v6647_v41, %v6710_v8  ;;  %v2356_v41 = vsub.f32 %v6650_v4, %v6710_v8 }
 0x422   : > { %5770 = vpow2.f32 %v2381_v45  ;;  %v2391_v23 = vmul.f32 1.442695, %v2362_v34  ;;  %v2375_v36 = vmul.f32 1.442695, %v2354_v20 }
 0x423   : > { %5772 = vpow2.f32 %v2385_v62  ;;  %v2377_v17 = vmul.f32 1.442695, %v2355_v21 }
 0x424   : > { %5774 = vpow2.f32 %v2369_v40 }
 0x425   : > { %5776 = vpow2.f32 %v2387_v52 }
 0x426   : > { %5778 = vpow2.f32 %v2371_v19 }
 0x427   : > { %5780 = vpow2.f32 %v2389_v18 }
 0x428   : > { %5782 = vpow2.f32 %v2373_v35 }
 0x429   : > { %v5765_v12 = vpop.eup %5764  ;;  %5784 = vpow2.f32 %v2391_v23 }
 0x42a   : > { %v5767_v61 = vpop.eup %5766  ;;  %v6734_v54 = vmul.f32 %v5765_v12, %v6585_v51  ;;  %v2363_v51 = vsub.f32 %v6697_v63, %v6710_v8  ;;  %5786 = vpow2.f32 %v2375_v36  ;;  %v7604_v12 = vlaneseq }
 0x42b   : > { %v5769_v31 = vpop.eup %5768  ;;  %v6739_v10 = vmul.f32 %v5767_v61, %v6583_v47 }
 0x42c   : > { %v5771_v38 = vpop.eup %5770  ;;  %2433 = vperm.xlu1 %5490, %v6734_v54   ;;  %v6746_v11 = vmul.f32 %v5769_v31, %v6603_v53  ;;  %v2393_v9 = vmul.f32 1.442695, %v2363_v51  ;;  %v2364_v53 = vsub.f32 %v6704_v13, %v6710_v8  ;;  %v6808_v18 = vand.u32 127, %v7604_v12 }
 0x42d   : > { %2430 = vperm.xlu0 %5489, %v6739_v10   ;;  %v5773_v47 = vpop.eup %5772  ;;  %v6751_v58 = vmul.f32 %v5771_v38, %v6601_v22 }
 0x42e   : > { %v5775_v16 = vpop.eup %5774  ;;  %v6758_v63 = vmul.f32 %v5773_v47, %v6605_v24  ;;  %5788 = vpow2.f32 %v2393_v9  ;;  %v2395_v15 = vmul.f32 1.442695, %v2364_v53  ;;  %v2379_v24 = vmul.f32 1.442695, %v2356_v41 }
 0x42f   : > { %v5777_v22 = vpop.eup %5776  ;;  %v6763_v14 = vmul.f32 %v5775_v16, %v6587_v33  ;;  %5790 = vpow2.f32 %v2377_v17 }
 0x430   : > { %2457 = vperm.xlu1 %5490, %v6746_v11   ;;  %v5779_v5 = vpop.eup %5778  ;;  %v6768_v13 = vmul.f32 %v5777_v22, %v6607_v50  ;;  %5792 = vpow2.f32 %v2395_v15 }
 0x431   : > { %2454 = vperm.xlu0 %5489, %v6751_v58   ;;  %v5781_v49 = vpop.eup %5780  ;;  %v6771_v3 = vmul.f32 %v5779_v5, %v6589_v44  ;;  %5794 = vpow2.f32 %v2379_v24 }
 0x432   : > { %v5783_v4 = vpop.eup %5782  ;;  %v6776_v33 = vmul.f32 %v5781_v49, %v6609_v39 }
 0x433   : > { %v5785_v8 = vpop.eup %5784  ;;  %v6779_v50 = vmul.f32 %v5783_v4, %v6591_v43 }
 0x434   : > { %2460 = vperm.xlu1 %5490, %v6758_v63   ;;  %v5787_v6 = vpop.eup %5786  ;;  %v6784_v44 = vmul.f32 %v5785_v8, %v6611_v59 }
 0x435   : > { %2436 = vperm.xlu0 %5489, %v6763_v14   ;;  %v6787_v45 = vmul.f32 %v5787_v6, %v6593_v42 }
 0x438   : > { %2463 = vperm.xlu1 %5490, %v6768_v13   ;;  %v5789_v27 = vpop.eup %5788 }
 0x439   : > { %2439 = vperm.xlu0 %5489, %v6771_v3   ;;  %v5791_v57 = vpop.eup %5790  ;;  %v6792_v43 = vmul.f32 %v5789_v27, %v6694_v7 }
 0x43a   : > { %v5793_v39 = vpop.eup %5792  ;;  %v6795_v62 = vmul.f32 %v5791_v57, %v6595_v28 }
 0x43b   : > { %v5795_v60 = vpop.eup %5794  ;;  %v6800_v42 = vmul.f32 %v5793_v39, %v6699_v0 }
 0x43c   : > { %2466 = vperm.xlu1 %5490, %v6776_v33   ;;  %v6803_v59 = vmul.f32 %v5795_v60, %v6599_v48  ;;  %v2481_v48 = vsub.s32 %v6808_v18, %v6437_v1 }
 0x43d   : > { %2442 = vperm.xlu0 %5489, %v6779_v50  }
 0x440   : > { %2469 = vperm.xlu1 %5490, %v6784_v44  }
 0x441   : > { %2445 = vperm.xlu0 %5489, %v6787_v45  }
 0x444   : > { %2472 = vperm.xlu1 %5490, %v6792_v43  }
 0x445   : > { %2448 = vperm.xlu0 %5489, %v6795_v62  }
 0x448   : > { %2475 = vperm.xlu1 %5490, %v6800_v42  }
 0x449   : > { %2451 = vperm.xlu0 %5489, %v6803_v59  }
 0x4ab   : > { %v2434_v7 = vpop.permute.xlu1 %2433 }
 0x4ac   : > { %v2431_v40 = vpop.permute.xlu0 %2430  ;;  %v2486_v38 = vrot.slane %v2434_v7, %v2481_v48 }
 0x4ad   : > { %v2482_v23 = vrot.slane %v2431_v40, %v2481_v48 }
 0x4af   : > { %v2458_v37 = vpop.permute.xlu1 %2457  ;;  %v2544_v22 = vsel %vm2543_vm11, %v2486_v38, %v2482_v23 }
 0x4b0   : > { %v2455_v28 = vpop.permute.xlu0 %2454  ;;  %v2518_v35 = vrot.slane %v2458_v37, %v2481_v48 }
 0x4b1   : > { %v2514_v20 = vrot.slane %v2455_v28, %v2481_v48 }
 0x4b3   : > { %v2461_v52 = vpop.permute.xlu1 %2460  ;;  %v2557_v53 = vsel %vm2543_vm11, %v2518_v35, %v2514_v20 }
 0x4b4   : > { %v2437_v26 = vpop.permute.xlu0 %2436  ;;  %v2522_v51 = vrot.slane %v2461_v52, %v2481_v48 }
 0x4b5   : > { %v2490_v36 = vrot.slane %v2437_v26, %v2481_v48 }
 0x4b6   : > { %v2558_v5 = vsel %vm2545_vm12, %v2522_v51, %v2557_v53 }
 0x4b7   : > { %v2464_v19 = vpop.permute.xlu1 %2463  ;;  %v2546_v49 = vsel %vm2545_vm12, %v2490_v36, %v2544_v22 }
 0x4b8   : > { %v2440_v30 = vpop.permute.xlu0 %2439  ;;  %v2526_v21 = vrot.slane %v2464_v19, %v2481_v48 }
 0x4b9   : > { %v2494_v47 = vrot.slane %v2440_v30, %v2481_v48 }
 0x4ba   : > { %v2559_v4 = vsel %vm2547_vm13, %v2526_v21, %v2558_v5 }
 0x4bb   : > { %v2467_v0 = vpop.permute.xlu1 %2466  ;;  %v2548_v6 = vsel %vm2547_vm13, %v2494_v47, %v2546_v49 }
 0x4bc   : > { %v2443_v34 = vpop.permute.xlu0 %2442  ;;  %v2530_v16 = vrot.slane %v2467_v0, %v2481_v48 }
 0x4bd   : > { %v2498_v17 = vrot.slane %v2443_v34, %v2481_v48 }
 0x4be   : > { %v2560_v27 = vsel %vm2549_vm14, %v2530_v16, %v2559_v4  ;;  %v7605_v4 = vld [vmem:[#allocation32_spill] sm:$0xff] }
 0x4bf   : > { %v2470_v61 = vpop.permute.xlu1 %2469  ;;  %v2550_v39 = vsel %vm2549_vm14, %v2498_v17, %v2548_v6  ;;  %v5509_v6 = vld [vmem:[%s7532_s13 + $0x12c] ss:$16 sps:$4 sm:$0xff]  }
 0x4c0   : > { %v2446_v31 = vpop.permute.xlu0 %2445  ;;  %v2534_v1 = vrot.slane %v2470_v61, %v2481_v48 }
 0x4c1   : > { %v2502_v15 = vrot.slane %v2446_v31, %v2481_v48 }
 0x4c2   : > { %v2561_v60 = vsel %vm2551_vm15, %v2534_v1, %v2560_v27  ;;  %v5507_v27 = vld [vmem:[%s7532_s13 + $0x128] ss:$16 sps:$4 sm:$0xff]  }
 0x4c3   : > { %v2473_v9 = vpop.permute.xlu1 %2472  ;;  %v2552_v37 = vsel %vm2551_vm15, %v2502_v15, %v2550_v39  ;;  %v5511_v39 = vld [vmem:[%s7532_s13 + $0x144] ss:$16 sps:$4 sm:$0xff]  }
 0x4c4   : > { %v2449_v41 = vpop.permute.xlu0 %2448  ;;  %v2538_v24 = vrot.slane %v2473_v9, %v2481_v48 }
 0x4c5   : > { %v2506_v8 = vrot.slane %v2449_v41, %v2481_v48 }
 0x4c6   : > { %v2562_v52 = vsel %vm2553_vm0, %v2538_v24, %v2561_v60  ;;  %v5515_v60 = vld [vmem:[%s7532_s13 + $0x14c] ss:$16 sps:$4 sm:$0xff]  }
 0x4c7   : > { %v2476_v57 = vpop.permute.xlu1 %2475  ;;  %v2554_v19 = vsel %vm2553_vm0, %v2506_v8, %v2552_v37  ;;  %v5517_v37 = vld [vmem:[%s7532_s13 + $0x164] ss:$16 sps:$4 sm:$0xff]  }
 0x4c8   : > { %v2542_v7 = vrot.slane %v2476_v57, %v2481_v48  ;;  %v2452_v40 = vpop.permute.xlu0 %2451  ;;  %v5510_v57 = vld [vmem:[%s7532_s13 + $0x120] ss:$16 sps:$4 sm:$0xff]  }
 0x4c9   : > { %v2510_v28 = vrot.slane %v2452_v40, %v2481_v48  ;;  %v5516_v40 = vld [vmem:[%s7532_s13 + $0x140] ss:$16 sps:$4 sm:$0xff]  }
 0x4ca   : > { %v2563_v26 = vsel %vm2555_vm1, %v2542_v7, %v2562_v52  ;;  %v5513_v7 = vld [vmem:[%s7532_s13 + $0x148] ss:$16 sps:$4 sm:$0xff]  }
 0x4cb   : > { %v2570_v30 = vsel %vm2566_vm2, %v2563_v26, 0.0  ;;  %v2556_v12 = vsel %vm2555_vm1, %v2510_v28, %v2554_v19  ;;  %v5521_v28 = vld [vmem:[%s7532_s13 + $0x16c] ss:$16 sps:$4 sm:$0xff]   ;;  %v5519_v52 = vld [vmem:[%s7532_s13 + $0x168] ss:$16 sps:$4 sm:$0xff]  }
 0x4cc   : > { %2571 = vadd.xlane.f32.xlu1 %v2570_v30  ;;  %v2567_v0 = vsel %vm2566_vm2, %v2556_v12, 0.0  ;;  %v5522_v26 = vld [vmem:[%s7532_s13 + $0x160] ss:$16 sps:$4 sm:$0xff]   ;;  %v5523_v19 = vld [vmem:[%s7532_s13 + $0x184] ss:$16 sps:$4 sm:$0xff]  }
 0x4cd   : > { %2568 = vadd.xlane.f32.xlu0 %v2567_v0  ;;  %v5527_v30 = vld [vmem:[%s7532_s13 + $0x18c] ss:$16 sps:$4 sm:$0xff]   ;;  %v5525_v12 = vld [vmem:[%s7532_s13 + $0x188] ss:$16 sps:$4 sm:$0xff]   ;;  %v5528_v0 = vld [vmem:[%s7532_s13 + $0x180] ss:$16 sps:$4 sm:$0xff]  }
 0x559   : > { %v2572_v34 = vpop.xlane.xlu1 %2571 }
 0x55a   : > { %v2574_v61 = vadd.f32 1e-15, %v2572_v34  ;;  %v2569_v35 = vpop.xlane.xlu0 %2568  ;;  %v5529_v34 = vld [vmem:[%s7532_s13 + $0x1a4] ss:$16 sps:$4 sm:$0xff]  }
 0x55b   : > { %v2573_v20 = vadd.f32 1e-15, %v2569_v35  ;;  %v5531_v35 = vld [vmem:[%s7532_s13 + $0x1a8] ss:$16 sps:$4 sm:$0xff]  }
 0x55c   : > { %5796 = vrcp.f32 %v2574_v61  ;;  %v5533_v61 = vld [vmem:[%s7532_s13 + $0x1ac] ss:$16 sps:$4 sm:$0xff]  }
 0x55d   : > { %5798 = vrcp.f32 %v2573_v20  ;;  %v5534_v20 = vld [vmem:[%s7532_s13 + $0x1a0] ss:$16 sps:$4 sm:$0xff]  }
 0x566   : > { %v5797_v31 = vpop.eup %5796 }
 0x567   : > { %v5799_v48 = vpop.eup %5798  ;;  %v2618_v21 = vrot.slane %v5797_v31, %v6446_v32  ;;  %v2614_v47 = vrot.slane %v5797_v31, %v6441_v2  ;;  %v2622_v53 = vrot.slane %v5797_v31, %v6461_v29  ;;  %v2626_v1 = vrot.slane %v5797_v31, %v6472_v56 }
 0x568   : > { %v2586_v38 = vrot.slane %v5799_v48, %v6446_v32  ;;  %v2582_v23 = vrot.slane %v5799_v48, %v6441_v2  ;;  %v2590_v17 = vrot.slane %v5799_v48, %v6461_v29  ;;  %v2594_v41 = vrot.slane %v5799_v48, %v6472_v56 }
 0x569   : > { %v2668_v16 = vmul.f32 %v2618_v21, %v6746_v11  ;;  %v2667_v9 = vmul.f32 %v2614_v47, %v6751_v58  ;;  %v2670_v11 = vmul.f32 %v2626_v1, %v6768_v13  ;;  %v2630_v22 = vrot.slane %v5797_v31, %v6478_v46  ;;  %v5543_v21 = vld [vmem:[%s7532_s13 + $0x1e8] ss:$16 sps:$4 sm:$0xff]   ;;  %v5546_v47 = vld [vmem:[%s7532_s13 + $0x1e0] ss:$16 sps:$4 sm:$0xff]  }
 0x56a   : > { %v2660_v51 = vmul.f32 %v2586_v38, %v6734_v54  ;;  %v2659_v36 = vmul.f32 %v2582_v23, %v6739_v10  ;;  %v2669_v54 = vmul.f32 %v2622_v53, %v6758_v63  ;;  %v2661_v10 = vmul.f32 %v2590_v17, %v6763_v14  ;;  %v5537_v38 = vld [vmem:[%s7532_s13 + $0x1c8] ss:$16 sps:$4 sm:$0xff]   ;;  %v5540_v23 = vld [vmem:[%s7532_s13 + $0x1c0] ss:$16 sps:$4 sm:$0xff]  }
 0x56b   : > { %v2662_v58 = vmul.f32 %v2594_v41, %v6771_v3  ;;  %v2598_v5 = vrot.slane %v5799_v48, %v6478_v46  ;;  %v2671_v63 = vmul.f32 %v2630_v22, %v6776_v33  ;;  %v2634_v15 = vrot.slane %v5797_v31, %v6494_v25  ;;  %v7607_v1 = vld [vmem:[#allocation16_spill] sm:$0xff] }
 0x56c   : > { %2682 = vperm.xlu1 %5490, %v2660_v51   ;;  %2677 = vperm.xlu0 %5489, %v2659_v36   ;;  %v2602_v24 = vrot.slane %v5799_v48, %v6494_v25  ;;  %v2638_v49 = vrot.slane %v5797_v31, %v6503_v55  ;;  %v2606_v46 = vrot.slane %v5799_v48, %v6503_v55  ;;  %v5499_v55 = vld [vmem:[%s7532_s13 + $0x104] ss:$16 sps:$4 sm:$0xff]   ;;  %v5545_v36 = vld [vmem:[%s7532_s13 + $0x1ec] ss:$16 sps:$4 sm:$0xff]  }
 0x56d   : > { %v2663_v14 = vmul.f32 %v2598_v5, %v6779_v50  ;;  %v2672_v13 = vmul.f32 %v2634_v15, %v6784_v44  ;;  %v2642_v8 = vrot.slane %v5797_v31, %v7605_v4  ;;  %v2610_v25 = vrot.slane %v5799_v48, %v7605_v4  ;;  %3155 = vmatprep.subr.bf16.mxu1 %v5499_v55  ;;  %v5535_v31 = vld [vmem:[%s7532_s13 + $0x1c4] ss:$16 sps:$4 sm:$0xff]   ;;  %v5539_v48 = vld [vmem:[%s7532_s13 + $0x1cc] ss:$16 sps:$4 sm:$0xff]  }
 0x56e   : > { %v2664_v3 = vmul.f32 %v2602_v24, %v6787_v45  ;;  %v2673_v33 = vmul.f32 %v2638_v49, %v6792_v43  ;;  %v2665_v50 = vmul.f32 %v2606_v46, %v6795_v62  ;;  %v5503_v43 = vld [vmem:[%s7532_s13 + $0x10c] ss:$16 sps:$4 sm:$0xff]   ;;  %v5501_v62 = vld [vmem:[%s7532_s13 + $0x108] ss:$16 sps:$4 sm:$0xff]   ;;  %v5541_v51 = vld [vmem:[%s7532_s13 + $0x1e4] ss:$16 sps:$4 sm:$0xff]  }
 0x56f   : > { %v2674_v44 = vmul.f32 %v2642_v8, %v6800_v42  ;;  %v2666_v45 = vmul.f32 %v2610_v25, %v6803_v59  ;;  %v5504_v42 = vld [vmem:[%s7532_s13 + $0x100] ss:$16 sps:$4 sm:$0xff]   ;;  %3198 = vmatprep.subr.bf16.mxu0 %v5503_v43  ;;  %v5505_v59 = vld [vmem:[%s7532_s13 + $0x124] ss:$16 sps:$4 sm:$0xff]  }
 0x570   : > { %2722 = vperm.xlu1 %5490, %v2668_v16   ;;  %2717 = vperm.xlu0 %5489, %v2667_v9   ;;  %v5549_v16 = vld [vmem:[%s7532_s13 + $0x4] ss:$16 sps:$4 sm:$0xff]   ;;  %v5552_v9 = vld [vmem:[%s7532_s13 + $0xc] ss:$16 sps:$4 sm:$0xff]  }
 0x571   : > { %3156 = vmatpush1.bf16.msra.mxu1 %v5504_v42  ;;  %3199 = vmatpush1.bf16.msra.mxu0 %v5501_v62  ;;  %v7608_v15 = vld [vmem:[#allocation25_spill] sm:$0xff]  ;;  %v7611_v43 = vld [vmem:[#allocation18_spill] sm:$0xff] }
 0x572   : > { %3157 = vmatprep.subr.bf16.mxu1 %v5505_v59  ;;  %3200 = vmatprep.subr.bf16.mxu0 %v5509_v6 }
 0x574   : > { %2727 = vperm.xlu1 %5490, %v2669_v54   ;;  %2687 = vperm.xlu0 %5489, %v2661_v10   ;;  %v7606_v54 = vld [vmem:[#allocation17_spill] sm:$0xff] }
 0x575   : > { %3158 = vmatpush1.bf16.msra.mxu1 %v5510_v57  ;;  %3201 = vmatpush1.bf16.msra.mxu0 %v5507_v27 }
 0x576   : > { %3159 = vmatprep.subr.bf16.mxu1 %v5511_v39  ;;  %3202 = vmatprep.subr.bf16.mxu0 %v5515_v60 }
 0x578   : > { %2732 = vperm.xlu1 %5490, %v2670_v11   ;;  %2692 = vperm.xlu0 %5489, %v2662_v58  }
 0x579   : > { %3160 = vmatpush1.bf16.msra.mxu1 %v5516_v40  ;;  %3203 = vmatpush1.bf16.msra.mxu0 %v5513_v7 }
 0x57a   : > { %3161 = vmatprep.subr.bf16.mxu1 %v5517_v37  ;;  %3204 = vmatprep.subr.bf16.mxu0 %v5521_v28  ;;  %v7612_v37 = vld [vmem:[#allocation27_spill] sm:$0xff] }
 0x57c   : > { %2737 = vperm.xlu1 %5490, %v2671_v63   ;;  %2697 = vperm.xlu0 %5489, %v2663_v14  }
 0x57d   : > { %3162 = vmatpush1.bf16.msra.mxu1 %v5522_v26  ;;  %3205 = vmatpush1.bf16.msra.mxu0 %v5519_v52  ;;  %v7613_v52 = vld [vmem:[#allocation19_spill] sm:$0xff] }
 0x57e   : > { %3163 = vmatprep.subr.bf16.mxu1 %v5523_v19  ;;  %3206 = vmatprep.subr.bf16.mxu0 %v5527_v30 }
 0x580   : > { %2742 = vperm.xlu1 %5490, %v2672_v13   ;;  %2702 = vperm.xlu0 %5489, %v2664_v3   ;;  %v7609_v13 = vld [vmem:[#allocation24_spill] sm:$0xff] }
 0x581   : > { %3164 = vmatpush1.bf16.msra.mxu1 %v5528_v0  ;;  %3207 = vmatpush1.bf16.msra.mxu0 %v5525_v12 }
 0x582   : > { %3165 = vmatprep.subr.bf16.mxu1 %v5529_v34  ;;  %3208 = vmatprep.subr.bf16.mxu0 %v5533_v61 }
 0x584   : > { %2747 = vperm.xlu1 %5490, %v2673_v33   ;;  %2707 = vperm.xlu0 %5489, %v2665_v50  }
 0x585   : > { %3166 = vmatpush1.bf16.msra.mxu1 %v5534_v20  ;;  %3209 = vmatpush1.bf16.msra.mxu0 %v5531_v35 }
 0x586   : > { %3167 = vmatprep.subr.bf16.mxu1 %v5535_v31  ;;  %3210 = vmatprep.subr.bf16.mxu0 %v5539_v48 }
 0x588   : > { %2752 = vperm.xlu1 %5490, %v2674_v44   ;;  %2712 = vperm.xlu0 %5489, %v2666_v45   ;;  %v7610_v45 = vld [vmem:[#allocation26_spill] sm:$0xff] }
 0x589   : > { %3168 = vmatpush1.bf16.msra.mxu1 %v5540_v23  ;;  %3211 = vmatpush1.bf16.msra.mxu0 %v5537_v38 }
 0x58a   : > { %3169 = vmatprep.subr.bf16.mxu1 %v5541_v51  ;;  %3212 = vmatprep.subr.bf16.mxu0 %v5545_v36  ;;  %v7614_v51 = vld [vmem:[#allocation28_spill] sm:$0xff] }
 0x58d   : > { %3170 = vmatpush1.bf16.msra.mxu1 %v5546_v47  ;;  %3213 = vmatpush1.bf16.msra.mxu0 %v5543_v21 }
 0x58e   : > { %3407 = vmatprep.subr.bf16.mxu1 %v5549_v16  ;;  %3450 = vmatprep.subr.bf16.mxu0 %v5552_v9 }
 0x5eb   : > { %v2683_v53 = vpop.permute.xlu1 %2682  ;;  %v2678_v17 = vpop.permute.xlu0 %2677 }
 0x5ec   : > { %v2756_v10 = vmul.f32 %v2683_v53, %v7606_v54  ;;  %v2755_v41 = vmul.f32 %v2678_v17, %v7607_v1 }
 0x5ee   : > { %v2777_v11 = vrot.slane %v2756_v10, 4  ;;  %v2771_v58 = vrot.slane %v2755_v41, 4 }
 0x5ef   : > { %v2723_v22 = vpop.permute.xlu1 %2722  ;;  %v2718_v5 = vpop.permute.xlu0 %2717 }
 0x5f0   : > { %v2778_v63 = vadd.f32 %v2777_v11, %v2756_v10  ;;  %v2772_v14 = vadd.f32 %v2771_v58, %v2755_v41  ;;  %v2764_v24 = vmul.f32 %v2723_v22, %v7608_v15  ;;  %v2763_v3 = vmul.f32 %v2718_v5, %v7609_v13  ;;  %v7615_v10 = vld [vmem:[#allocation20_spill] sm:$0xff] }
 0x5f2   : > { %v2779_v49 = vrot.slane %v2778_v63, 2  ;;  %v2773_v46 = vrot.slane %v2772_v14, 2  ;;  %v2825_v33 = vrot.slane %v2764_v24, 4  ;;  %v2819_v50 = vrot.slane %v2763_v3, 4 }
 0x5f3   : > { %v2728_v4 = vpop.permute.xlu1 %2727  ;;  %v2688_v8 = vpop.permute.xlu0 %2687 }
 0x5f4   : > { %v2826_v25 = vadd.f32 %v2825_v33, %v2764_v24  ;;  %v2820_v44 = vadd.f32 %v2819_v50, %v2763_v3  ;;  %v2765_v55 = vmul.f32 %v2728_v4, %v7610_v45  ;;  %v2757_v62 = vmul.f32 %v2688_v8, %v7611_v43  ;;  %v7617_v4 = vld [vmem:[#allocation21_spill] sm:$0xff] }
 0x5f5   : > { %v2780_v42 = vadd.f32 %v2779_v49, %v2778_v63  ;;  %v2774_v59 = vadd.f32 %v2773_v46, %v2772_v14  ;;  %v7616_v14 = vld [vmem:[#allocation29_spill] sm:$0xff] }
 0x5f6   : > { %v2827_v6 = vrot.slane %v2826_v25, 2  ;;  %v2821_v27 = vrot.slane %v2820_v44, 2  ;;  %v2831_v57 = vrot.slane %v2765_v55, 4  ;;  %v2783_v40 = vrot.slane %v2757_v62, 4 }
 0x5f7   : > { %v2733_v39 = vpop.permute.xlu1 %2732  ;;  %v2693_v60 = vpop.permute.xlu0 %2692  ;;  %v2781_v19 = vrot.slane %v2780_v42, 1  ;;  %v2775_v30 = vrot.slane %v2774_v59, 1 }
 0x5f8   : > { %v2828_v7 = vadd.f32 %v2827_v6, %v2826_v25  ;;  %v2766_v28 = vmul.f32 %v2733_v39, %v7612_v37  ;;  %v2758_v26 = vmul.f32 %v2693_v60, %v7613_v52  ;;  %v2822_v12 = vadd.f32 %v2821_v27, %v2820_v44 }
 0x5f9   : > { %v2832_v0 = vadd.f32 %v2831_v57, %v2765_v55  ;;  %v2784_v48 = vadd.f32 %v2783_v40, %v2757_v62  ;;  %v2782_v21 = vadd.f32 %v2781_v19, %v2780_v42  ;;  %v2776_v47 = vadd.f32 %v2775_v30, %v2774_v59  ;;  %v7618_v19 = vld [vmem:[#allocation30_spill] sm:$0xff] }
 0x5fa   : > { %v2837_v34 = vrot.slane %v2766_v28, 4  ;;  %v2789_v61 = vrot.slane %v2758_v26, 4  ;;  %v2829_v31 = vrot.slane %v2828_v7, 1  ;;  %v2823_v16 = vrot.slane %v2822_v12, 1 }
 0x5fb   : > { %v2738_v35 = vpop.permute.xlu1 %2737  ;;  %v2698_v20 = vpop.permute.xlu0 %2697  ;;  %v2833_v9 = vrot.slane %v2832_v0, 2  ;;  %v2785_v11 = vrot.slane %v2784_v48, 2  ;;  %v2868_v24 = vpack.c.bf16 %v2782_v21, %v2782_v21  ;;  %v2867_v13 = vpack.c.bf16 %v2776_v47, %v2776_v47 }
 0x5fc   : > { %v2838_v38 = vadd.f32 %v2837_v34, %v2766_v28  ;;  %v2790_v23 = vadd.f32 %v2789_v61, %v2758_v26  ;;  %v2767_v36 = vmul.f32 %v2738_v35, %v7614_v51  ;;  %v2759_v1 = vmul.f32 %v2698_v20, %v7615_v10 }
 0x5fd   : > { %v2830_v41 = vadd.f32 %v2829_v31, %v2828_v7  ;;  %v2824_v3 = vadd.f32 %v2823_v16, %v2822_v12  ;;  %v2834_v49 = vadd.f32 %v2833_v9, %v2832_v0  ;;  %v2786_v55 = vadd.f32 %v2785_v11, %v2784_v48  ;;  %v7619_v12 = vld [vmem:[#allocation22_spill] sm:$0xff] }
 0x5fe   : > { %v2843_v54 = vrot.slane %v2767_v36, 4  ;;  %v2839_v58 = vrot.slane %v2838_v38, 2  ;;  %v2791_v22 = vrot.slane %v2790_v23, 2  ;;  %v2795_v63 = vrot.slane %v2759_v1, 4 }
 0x5ff   : > { %v2743_v53 = vpop.permute.xlu1 %2742  ;;  %v2703_v17 = vpop.permute.xlu0 %2702  ;;  %v2876_v45 = vpack.c.bf16 %v2830_v41, %v2830_v41  ;;  %v6976_v27 = vunpack.c.l.b16 %v2868_v24  ;;  %v6978_v57 = vunpack.c.l.b16 %v2867_v13  ;;  %v2875_v39 = vpack.c.bf16 %v2824_v3, %v2824_v3 }
 0x600   : > { %v2844_v5 = vadd.f32 %v2843_v54, %v2767_v36  ;;  %v2768_v15 = vmul.f32 %v2743_v53, %v7616_v14  ;;  %v2796_v33 = vadd.f32 %v2795_v63, %v2759_v1  ;;  %v2760_v8 = vmul.f32 %v2703_v17, %v7617_v4  ;;  %v7620_v54 = vld [vmem:[#allocation31_spill] sm:$0xff] }
 0x601   : > { %v2840_v43 = vadd.f32 %v2839_v58, %v2838_v38  ;;  %v2792_v62 = vadd.f32 %v2791_v22, %v2790_v23  ;;  %v2835_v60 = vrot.slane %v2834_v49, 1  ;;  %v6980_v52 = vunpack.c.l.b16 %v2876_v45  ;;  %v7621_v1 = vld [vmem:[#allocation23_spill] sm:$0xff] }
 0x602   : > { %v2845_v46 = vrot.slane %v2844_v5, 2  ;;  %v2849_v50 = vrot.slane %v2768_v15, 4  ;;  %v2797_v42 = vrot.slane %v2796_v33, 2  ;;  %v2801_v6 = vrot.slane %v2760_v8, 4 }
 0x603   : > { %v2748_v25 = vpop.permute.xlu1 %2747  ;;  %v2708_v44 = vpop.permute.xlu0 %2707  ;;  %v2787_v26 = vrot.slane %v2786_v55, 1  ;;  %v2841_v34 = vrot.slane %v2840_v43, 1  ;;  %v2793_v61 = vrot.slane %v2792_v62, 1  ;;  %v2971_v38 = vunpack.c.l.b16 %v2875_v39 }
 0x604   : > { %v2850_v59 = vadd.f32 %v2849_v50, %v2768_v15  ;;  %v2846_v7 = vadd.f32 %v2845_v46, %v2844_v5  ;;  %v2798_v40 = vadd.f32 %v2797_v42, %v2796_v33  ;;  %v2802_v28 = vadd.f32 %v2801_v6, %v2760_v8 }
 0x605   : > { %v2769_v30 = vmul.f32 %v2748_v25, %v7618_v19  ;;  %v2761_v0 = vmul.f32 %v2708_v44, %v7619_v12  ;;  %v2836_v23 = vadd.f32 %v2835_v60, %v2834_v49  ;;  %v2788_v11 = vadd.f32 %v2787_v26, %v2786_v55 }
 0x606   : > { %v2851_v37 = vrot.slane %v2850_v59, 2  ;;  %v2803_v20 = vrot.slane %v2802_v28, 2  ;;  %v2847_v21 = vrot.slane %v2846_v7, 1  ;;  %v2799_v47 = vrot.slane %v2798_v40, 1 }
 0x607   : > { %v2753_v31 = vpop.permute.xlu1 %2752  ;;  %v2713_v48 = vpop.permute.xlu0 %2712  ;;  %v2855_v51 = vrot.slane %v2769_v30, 4  ;;  %v2807_v36 = vrot.slane %v2761_v0, 4  ;;  %v2842_v58 = vadd.f32 %v2841_v34, %v2840_v43  ;;  %v2794_v22 = vadd.f32 %v2793_v61, %v2792_v62 }
 0x608   : > { %v2852_v35 = vadd.f32 %v2851_v37, %v2850_v59  ;;  %v2804_v9 = vadd.f32 %v2803_v20, %v2802_v28  ;;  %v2770_v10 = vmul.f32 %v2753_v31, %v7620_v54  ;;  %v2762_v41 = vmul.f32 %v2713_v48, %v7621_v1 }
 0x609   : > { %v2856_v53 = vadd.f32 %v2855_v51, %v2769_v30  ;;  %v2808_v17 = vadd.f32 %v2807_v36, %v2761_v0  ;;  %v2848_v13 = vadd.f32 %v2847_v21, %v2846_v7  ;;  %v2800_v3 = vadd.f32 %v2799_v47, %v2798_v40 }
 0x60a   : > { %v2853_v16 = vrot.slane %v2852_v35, 1  ;;  %v2805_v5 = vrot.slane %v2804_v9, 1  ;;  %v2861_v15 = vrot.slane %v2770_v10, 4  ;;  %v2813_v24 = vrot.slane %v2762_v41, 4 }
 0x60b   : > { %v2857_v63 = vrot.slane %v2856_v53, 2  ;;  %v2809_v14 = vrot.slane %v2808_v17, 2  ;;  %v2877_v25 = vpack.c.bf16 %v2836_v23, %v2836_v23  ;;  %v2869_v44 = vpack.c.bf16 %v2788_v11, %v2788_v11 }
 0x60c   : > { %v2854_v49 = vadd.f32 %v2853_v16, %v2852_v35  ;;  %v2806_v46 = vadd.f32 %v2805_v5, %v2804_v9  ;;  %v2862_v4 = vadd.f32 %v2861_v15, %v2770_v10  ;;  %v2814_v8 = vadd.f32 %v2813_v24, %v2762_v41  ;;  %v5550_v15 = vld [vmem:[%s7532_s13 + $0x8] ss:$16 sps:$4 sm:$0xff]  }
 0x60d   : > { %v2858_v33 = vadd.f32 %v2857_v63, %v2856_v53  ;;  %v2810_v50 = vadd.f32 %v2809_v14, %v2808_v17  ;;  %v2878_v45 = vpack.c.bf16 %v2842_v58, %v2842_v58  ;;  %v2870_v42 = vpack.c.bf16 %v2794_v22, %v2794_v22  ;;  %v5547_v14 = vld [vmem:[%s7532_s13] ss:$16 sps:$4 sm:$0xff]  }
 0x60e   : > { %v2863_v62 = vrot.slane %v2862_v4, 2  ;;  %v2815_v59 = vrot.slane %v2814_v8, 2  ;;  %v2879_v6 = vpack.c.bf16 %v2848_v13, %v2848_v13  ;;  %v2871_v39 = vpack.c.bf16 %v2800_v3, %v2800_v3 }
 0x60f   : > { %v2859_v55 = vrot.slane %v2858_v33, 1  ;;  %v2811_v43 = vrot.slane %v2810_v50, 1  ;;  %v2880_v60 = vpack.c.bf16 %v2854_v49, %v2854_v49  ;;  %v2872_v37 = vpack.c.bf16 %v2806_v46, %v2806_v46  ;;  %v5555_v49 = vld [vmem:[%s7532_s13 + $0x24] ss:$16 sps:$4 sm:$0xff]   ;;  %v5558_v46 = vld [vmem:[%s7532_s13 + $0x2c] ss:$16 sps:$4 sm:$0xff]  }
 0x610   : > { %v2864_v28 = vadd.f32 %v2863_v62, %v2862_v4  ;;  %v2816_v26 = vadd.f32 %v2815_v59, %v2814_v8  ;;  %v2973_v19 = vunpack.c.l.b16 %v2877_v25  ;;  %v2965_v30 = vunpack.c.l.b16 %v2869_v44  ;;  %v5561_v4 = vld [vmem:[%s7532_s13 + $0x44] ss:$16 sps:$4 sm:$0xff]   ;;  %v5564_v8 = vld [vmem:[%s7532_s13 + $0x4c] ss:$16 sps:$4 sm:$0xff]   ;;  %v5559_v44 = vld [vmem:[%s7532_s13 + $0x40] ss:$16 sps:$4 sm:$0xff]  }
 0x611   : > { %v2860_v7 = vadd.f32 %v2859_v55, %v2858_v33  ;;  %v2812_v40 = vadd.f32 %v2811_v43, %v2810_v50  ;;  %v2974_v12 = vunpack.c.l.b16 %v2878_v45  ;;  %v2966_v0 = vunpack.c.l.b16 %v2870_v42  ;;  %v5553_v33 = vld [vmem:[%s7532_s13 + $0x20] ss:$16 sps:$4 sm:$0xff]   ;;  %v5556_v50 = vld [vmem:[%s7532_s13 + $0x28] ss:$16 sps:$4 sm:$0xff]   ;;  %v5567_v42 = vld [vmem:[%s7532_s13 + $0x64] ss:$16 sps:$4 sm:$0xff]  }
 0x612   : > { %v2865_v35 = vrot.slane %v2864_v28, 1  ;;  %v2817_v20 = vrot.slane %v2816_v26, 1  ;;  %v2979_v31 = vsel %vm2543_vm11, %v6976_v27, %v6978_v57  ;;  %v2986_v48 = vsel %vm2543_vm11, %v6980_v52, %v2971_v38  ;;  %v5562_v45 = vld [vmem:[%s7532_s13 + $0x48] ss:$16 sps:$4 sm:$0xff]   ;;  %v5570_v55 = vld [vmem:[%s7532_s13 + $0x6c] ss:$16 sps:$4 sm:$0xff]  }
 0x613   : > { %v2881_v34 = vpack.c.bf16 %v2860_v7, %v2860_v7  ;;  %v2873_v61 = vpack.c.bf16 %v2812_v40, %v2812_v40  ;;  %v2975_v23 = vunpack.c.l.b16 %v2879_v6  ;;  %v2967_v51 = vunpack.c.l.b16 %v2871_v39  ;;  %v5565_v43 = vld [vmem:[%s7532_s13 + $0x60] ss:$16 sps:$4 sm:$0xff]   ;;  %v5568_v62 = vld [vmem:[%s7532_s13 + $0x68] ss:$16 sps:$4 sm:$0xff]   ;;  %v5573_v59 = vld [vmem:[%s7532_s13 + $0x84] ss:$16 sps:$4 sm:$0xff]  }
 0x614   : > { %v2976_v36 = vunpack.c.l.b16 %v2880_v60  ;;  %v2968_v21 = vunpack.c.l.b16 %v2872_v37  ;;  %v2866_v47 = vadd.f32 %v2865_v35, %v2864_v28  ;;  %v2818_v16 = vadd.f32 %v2817_v20, %v2816_v26  ;;  %v5576_v6 = vld [vmem:[%s7532_s13 + $0x8c] ss:$16 sps:$4 sm:$0xff]   ;;  %v5571_v39 = vld [vmem:[%s7532_s13 + $0x80] ss:$16 sps:$4 sm:$0xff]   ;;  %v5574_v60 = vld [vmem:[%s7532_s13 + $0x88] ss:$16 sps:$4 sm:$0xff]  }
 0x615   : > { %v2987_v9 = vsel %vm2545_vm12, %v2973_v19, %v2986_v48  ;;  %v2980_v53 = vsel %vm2545_vm12, %v2965_v30, %v2979_v31  ;;  %v2977_v17 = vunpack.c.l.b16 %v2881_v34  ;;  %v2969_v54 = vunpack.c.l.b16 %v2873_v61  ;;  %v5579_v37 = vld [vmem:[%s7532_s13 + $0xa4] ss:$16 sps:$4 sm:$0xff]   ;;  %v5582_v7 = vld [vmem:[%s7532_s13 + $0xac] ss:$16 sps:$4 sm:$0xff]   ;;  %v5577_v40 = vld [vmem:[%s7532_s13 + $0xa0] ss:$16 sps:$4 sm:$0xff]  }
 0x616   : > { %v2988_v10 = vsel %vm2547_vm13, %v2974_v12, %v2987_v9  ;;  %v2981_v1 = vsel %vm2547_vm13, %v2966_v0, %v2980_v53  ;;  %v2882_v27 = vpack.c.bf16 %v2866_v47, %v2866_v47  ;;  %v2874_v57 = vpack.c.bf16 %v2818_v16, %v2818_v16  ;;  %v5580_v28 = vld [vmem:[%s7532_s13 + $0xa8] ss:$16 sps:$4 sm:$0xff]   ;;  %v5585_v26 = vld [vmem:[%s7532_s13 + $0xc4] ss:$16 sps:$4 sm:$0xff]   ;;  %v5588_v19 = vld [vmem:[%s7532_s13 + $0xcc] ss:$16 sps:$4 sm:$0xff]  }
 0x617   : > { %v2982_v52 = vsel %vm2549_vm14, %v2967_v51, %v2981_v1  ;;  %v2989_v38 = vsel %vm2549_vm14, %v2975_v23, %v2988_v10  ;;  %v7622_v25 = vmov 0   ;;  %v5583_v30 = vld [vmem:[%s7532_s13 + $0xc0] ss:$16 sps:$4 sm:$0xff]   ;;  %v5586_v12 = vld [vmem:[%s7532_s13 + $0xc8] ss:$16 sps:$4 sm:$0xff]  }
 0x618   : > { %v2978_v41 = vunpack.c.l.b16 %v2882_v27  ;;  %v2970_v11 = vunpack.c.l.b16 %v2874_v57  ;;  %v2983_v58 = vsel %vm2551_vm15, %v2968_v21, %v2982_v52  ;;  %v2990_v22 = vsel %vm2551_vm15, %v2976_v36, %v2989_v38  ;;  %v5591_v0 = vld [vmem:[%s7532_s13 + $0xe4] ss:$16 sps:$4 sm:$0xff]   ;;  %v5594_v34 = vld [vmem:[%s7532_s13 + $0xec] ss:$16 sps:$4 sm:$0xff]   ;;  %v5589_v61 = vld [vmem:[%s7532_s13 + $0xe0] ss:$16 sps:$4 sm:$0xff]  }
 0x619   : > { %v2984_v5 = vsel %vm2553_vm0, %v2969_v54, %v2983_v58  ;;  %v2991_v63 = vsel %vm2553_vm0, %v2977_v17, %v2990_v22  ;;  %v5592_v35 = vld [vmem:[%s7532_s13 + $0xe8] ss:$16 sps:$4 sm:$0xff]   ;;  %v5597_v20 = vld [vmem:[%s7532_s13 + $0x204] ss:$16 sps:$4 sm:$0xff]   ;;  %v5600_v31 = vld [vmem:[%s7532_s13 + $0x20c] ss:$16 sps:$4 sm:$0xff]  }
 0x61a   : > { %v2985_v24 = vsel %vm2555_vm1, %v2970_v11, %v2984_v5  ;;  %v2992_v13 = vsel %vm2555_vm1, %v2978_v41, %v2991_v63  ;;  %v7106_v48 = vld [vmem:[%s6962_s22] sm:$0xff]   ;;  %v5598_v51 = vld [vmem:[%s7532_s13 + $0x208] ss:$16 sps:$4 sm:$0xff]   ;;  %v5607_v21 = vld [vmem:[%s7532_s13 + $0x22c] ss:$16 sps:$4 sm:$0xff]  }
 0x61b   : > { %v7009_v3 = vpack.c.b16 %v2992_v13, %v2985_v24  ;;  %v5595_v23 = vld [vmem:[%s7532_s13 + $0x200] ss:$16 sps:$4 sm:$0xff]   ;;  %v5604_v36 = vld [vmem:[%s7532_s13 + $0x224] ss:$16 sps:$4 sm:$0xff]   ;;  %v5605_v16 = vld [vmem:[%s7532_s13 + $0x228] ss:$16 sps:$4 sm:$0xff]  }
 0x61c   : > { %v5602_v47 = vld [vmem:[%s7532_s13 + $0x220] ss:$16 sps:$4 sm:$0xff]   ;;  %v5610_v9 = vld [vmem:[%s7532_s13 + $0x244] ss:$16 sps:$4 sm:$0xff]   ;;  %v5613_v53 = vld [vmem:[%s7532_s13 + $0x24c] ss:$16 sps:$4 sm:$0xff]  }
 0x61d   : > { %3188 = vmatmul.mubr.bf16.vlgmr.msra.gmra.mrb[0].mxu1 %v7009_v3  ;;  %3231 = vmatmul.mubr.bf16.vlgmr.msra.gmra.mrb[4].mxu0 %v7009_v3  ;;  %v5608_v17 = vld [vmem:[%s7532_s13 + $0x240] ss:$16 sps:$4 sm:$0xff]   ;;  %v5611_v54 = vld [vmem:[%s7532_s13 + $0x248] ss:$16 sps:$4 sm:$0xff]   ;;  %v5616_v10 = vld [vmem:[%s7532_s13 + $0x264] ss:$16 sps:$4 sm:$0xff]  }
 0x61e   : > { %3408 = vmatpush1.bf16.msra.mxu1 %v5547_v14  ;;  %3451 = vmatpush1.bf16.msra.mxu0 %v5550_v15  ;;  %v5619_v1 = vld [vmem:[%s7532_s13 + $0x26c] ss:$16 sps:$4 sm:$0xff]   ;;  %v5614_v27 = vld [vmem:[%s7532_s13 + $0x260] ss:$16 sps:$4 sm:$0xff]   ;;  %v5617_v57 = vld [vmem:[%s7532_s13 + $0x268] ss:$16 sps:$4 sm:$0xff]  }
 0x61f   : > { %3409 = vmatprep.subr.bf16.mxu1 %v5555_v49  ;;  %3452 = vmatprep.subr.bf16.mxu0 %v5558_v46  ;;  %v5622_v52 = vld [vmem:[%s7532_s13 + $0x284] ss:$16 sps:$4 sm:$0xff]   ;;  %v5625_v38 = vld [vmem:[%s7532_s13 + $0x28c] ss:$16 sps:$4 sm:$0xff]   ;;  %v5620_v41 = vld [vmem:[%s7532_s13 + $0x280] ss:$16 sps:$4 sm:$0xff]  }
 0x620   : > { %3439 = vmatprep.mubr.bf16.mxu1 %v7622_v25  ;;  %3482 = vmatprep.mubr.bf16.mxu0 %v7622_v25  ;;  %v5623_v11 = vld [vmem:[%s7532_s13 + $0x288] ss:$16 sps:$4 sm:$0xff]   ;;  %v5628_v58 = vld [vmem:[%s7532_s13 + $0x2a4] ss:$16 sps:$4 sm:$0xff]   ;;  %v5631_v22 = vld [vmem:[%s7532_s13 + $0x2ac] ss:$16 sps:$4 sm:$0xff]  }
 0x621   : > { %v5626_v5 = vld [vmem:[%s7532_s13 + $0x2a0] ss:$16 sps:$4 sm:$0xff]   ;;  %v5629_v63 = vld [vmem:[%s7532_s13 + $0x2a8] ss:$16 sps:$4 sm:$0xff]   ;;  %v5634_v14 = vld [vmem:[%s7532_s13 + $0x2c4] ss:$16 sps:$4 sm:$0xff]  }
 0x622   : > { %3410 = vmatpush1.bf16.msra.mxu1 %v5553_v33  ;;  %3453 = vmatpush1.bf16.msra.mxu0 %v5556_v50  ;;  %v5637_v15 = vld [vmem:[%s7532_s13 + $0x2cc] ss:$16 sps:$4 sm:$0xff]   ;;  %v5632_v24 = vld [vmem:[%s7532_s13 + $0x2c0] ss:$16 sps:$4 sm:$0xff]   ;;  %v5635_v13 = vld [vmem:[%s7532_s13 + $0x2c8] ss:$16 sps:$4 sm:$0xff]  }
 0x623   : > { %3411 = vmatprep.subr.bf16.mxu1 %v5561_v4  ;;  %3454 = vmatprep.subr.bf16.mxu0 %v5564_v8  ;;  %v5640_v49 = vld [vmem:[%s7532_s13 + $0x2e4] ss:$16 sps:$4 sm:$0xff]   ;;  %v5643_v46 = vld [vmem:[%s7532_s13 + $0x2ec] ss:$16 sps:$4 sm:$0xff]   ;;  %v5638_v33 = vld [vmem:[%s7532_s13 + $0x2e0] ss:$16 sps:$4 sm:$0xff]  }
 0x624   : > { %v5641_v50 = vld [vmem:[%s7532_s13 + $0x2e8] ss:$16 sps:$4 sm:$0xff]   ;;  %v7623_v4 = vmov 0.0  }
 0x625   : > { %v7624_v8 = vld [vmem:[#allocation33_spill] sm:$0xff] }
 0x626   : > { %3412 = vmatpush1.bf16.msra.mxu1 %v5559_v44  ;;  %3455 = vmatpush1.bf16.msra.mxu0 %v5562_v45  ;;  %v5646_v44 = vld [vmem:[%s7534_s15 + $0x84] ss:$8 sps:$4 sm:$0xff]   ;;  %v5644_v45 = vld [vmem:[%s7534_s15 + $0x80] ss:$8 sps:$4 sm:$0xff]  }
 0x627   : > { %3413 = vmatprep.subr.bf16.mxu1 %v5567_v42  ;;  %3456 = vmatprep.subr.bf16.mxu0 %v5570_v55  ;;  %v5649_v42 = vld [vmem:[%s7534_s15 + $0x94] ss:$8 sps:$4 sm:$0xff]   ;;  %v5647_v55 = vld [vmem:[%s7534_s15 + $0x90] ss:$8 sps:$4 sm:$0xff]  }
 0x62a   : > { %3414 = vmatpush1.bf16.msra.mxu1 %v5565_v43  ;;  %3457 = vmatpush1.bf16.msra.mxu0 %v5568_v62  ;;  %v5652_v43 = vld [vmem:[%s7534_s15 + $0xa4] ss:$8 sps:$4 sm:$0xff]   ;;  %v5650_v62 = vld [vmem:[%s7534_s15 + $0xa0] ss:$8 sps:$4 sm:$0xff]  }
 0x62b   : > { %3415 = vmatprep.subr.bf16.mxu1 %v5573_v59  ;;  %3458 = vmatprep.subr.bf16.mxu0 %v5576_v6  ;;  %v5655_v59 = vld [vmem:[%s7534_s15 + $0xb4] ss:$8 sps:$4 sm:$0xff]   ;;  %v5653_v6 = vld [vmem:[%s7534_s15 + $0xb0] ss:$8 sps:$4 sm:$0xff]  }
 0x62e   : > { %3416 = vmatpush1.bf16.msra.mxu1 %v5571_v39  ;;  %3459 = vmatpush1.bf16.msra.mxu0 %v5574_v60  ;;  %v5658_v39 = vld [vmem:[%s7534_s15 + $0xc4] ss:$8 sps:$4 sm:$0xff]   ;;  %v5656_v60 = vld [vmem:[%s7534_s15 + $0xc0] ss:$8 sps:$4 sm:$0xff]  }
 0x62f   : > { %3417 = vmatprep.subr.bf16.mxu1 %v5579_v37  ;;  %3460 = vmatprep.subr.bf16.mxu0 %v5582_v7  ;;  %v5661_v37 = vld [vmem:[%s7534_s15 + $0xd4] ss:$8 sps:$4 sm:$0xff]   ;;  %v5659_v7 = vld [vmem:[%s7534_s15 + $0xd0] ss:$8 sps:$4 sm:$0xff]  }
 0x632   : > { %3418 = vmatpush1.bf16.msra.mxu1 %v5577_v40  ;;  %3461 = vmatpush1.bf16.msra.mxu0 %v5580_v28  ;;  %v5664_v40 = vld [vmem:[%s7534_s15 + $0xe4] ss:$8 sps:$4 sm:$0xff]   ;;  %v5662_v28 = vld [vmem:[%s7534_s15 + $0xe0] ss:$8 sps:$4 sm:$0xff]  }
 0x633   : > { %3419 = vmatprep.subr.bf16.mxu1 %v5585_v26  ;;  %3462 = vmatprep.subr.bf16.mxu0 %v5588_v19  ;;  %v5667_v26 = vld [vmem:[%s7534_s15 + $0xf4] ss:$8 sps:$4 sm:$0xff]   ;;  %v5665_v19 = vld [vmem:[%s7534_s15 + $0xf0] ss:$8 sps:$4 sm:$0xff]  }
 0x636   : > { %3420 = vmatpush1.bf16.msra.mxu1 %v5583_v30  ;;  %3463 = vmatpush1.bf16.msra.mxu0 %v5586_v12  ;;  %v5670_v30 = vld [vmem:[%s7534_s15 + $0x4] ss:$8 sps:$4 sm:$0xff]   ;;  %v5716_v12 = vld [vmem:[%s7536_s17] ss:$8 sps:$4 sm:$0xff]  }
 0x637   : > { %3421 = vmatprep.subr.bf16.mxu1 %v5591_v0  ;;  %3464 = vmatprep.subr.bf16.mxu0 %v5594_v34  ;;  %v5717_v0 = vld [vmem:[%s7536_s17 + $0x10] ss:$8 sps:$4 sm:$0xff]   ;;  %v3779_v34 = vld [vmem:[%s7533_s14] sm:$0xf] }
 0x63a   : > { %3422 = vmatpush1.bf16.msra.mxu1 %v5589_v61  ;;  %3465 = vmatpush1.bf16.msra.mxu0 %v5592_v35  ;;  %v5718_v61 = vld [vmem:[%s7536_s17 + $0x20] ss:$8 sps:$4 sm:$0xff]   ;;  %v3784_v35 = vrot.slane %v3779_v34, %v6441_v2 }
 0x63b   : > { %3685 = vmatprep.subr.bf16.mxu1 %v5597_v20  ;;  %3728 = vmatprep.subr.bf16.mxu0 %v5600_v31  ;;  %v3788_v20 = vrot.slane %v3779_v34, %v6446_v32  ;;  %v5719_v31 = vld [vmem:[%s7536_s17 + $0x30] ss:$8 sps:$4 sm:$0xff]  }
 0x63d   : > { %3440 = vmatmul.mubr.bf16.vlgmr.msra.gmra.mrb[0].mxu1 %v7106_v48  ;;  %3483 = vmatmul.mubr.bf16.vlgmr.msra.gmra.mrb[4].mxu0 %v7106_v48 }
 0x63e   : > { %3686 = vmatpush1.bf16.msra.mxu1 %v5595_v23  ;;  %3729 = vmatpush1.bf16.msra.mxu0 %v5598_v51 }
 0x63f   : > { %3687 = vmatprep.subr.bf16.mxu1 %v5604_v36  ;;  %3730 = vmatprep.subr.bf16.mxu0 %v5607_v21 }
 0x640   : > { %3717 = vmatprep.mubr.bf16.mxu1 %v7622_v25  ;;  %3760 = vmatprep.mubr.bf16.mxu0 %v7622_v25 }
 0x642   : > { %3688 = vmatpush1.bf16.msra.mxu1 %v5602_v47  ;;  %3731 = vmatpush1.bf16.msra.mxu0 %v5605_v16 }
 0x643   : > { %3689 = vmatprep.subr.bf16.mxu1 %v5610_v9  ;;  %3732 = vmatprep.subr.bf16.mxu0 %v5613_v53 }
 0x646   : > { %3690 = vmatpush1.bf16.msra.mxu1 %v5608_v17  ;;  %3733 = vmatpush1.bf16.msra.mxu0 %v5611_v54 }
 0x647   : > { %3691 = vmatprep.subr.bf16.mxu1 %v5616_v10  ;;  %3734 = vmatprep.subr.bf16.mxu0 %v5619_v1 }
 0x64a   : > { %3692 = vmatpush1.bf16.msra.mxu1 %v5614_v27  ;;  %3735 = vmatpush1.bf16.msra.mxu0 %v5617_v57  ;;  %v5720_v27 = vld [vmem:[%s7536_s17 + $0x40] ss:$8 sps:$4 sm:$0xff]  }
 0x64b   : > { %3693 = vmatprep.subr.bf16.mxu1 %v5622_v52  ;;  %3736 = vmatprep.subr.bf16.mxu0 %v5625_v38  ;;  %v3796_v52 = vrot.slane %v3779_v34, %v6472_v56 }
 0x64e   : > { %3694 = vmatpush1.bf16.msra.mxu1 %v5620_v41  ;;  %3737 = vmatpush1.bf16.msra.mxu0 %v5623_v11 }
 0x64f   : > { %3695 = vmatprep.subr.bf16.mxu1 %v5628_v58  ;;  %3738 = vmatprep.subr.bf16.mxu0 %v5631_v22  ;;  %v3792_v58 = vrot.slane %v3779_v34, %v6461_v29  ;;  %v5721_v22 = vld [vmem:[%s7536_s17 + $0x50] ss:$8 sps:$4 sm:$0xff]  }
 0x652   : > { %3696 = vmatpush1.bf16.msra.mxu1 %v5626_v5  ;;  %3739 = vmatpush1.bf16.msra.mxu0 %v5629_v63 }
 0x653   : > { %3697 = vmatprep.subr.bf16.mxu1 %v5634_v14  ;;  %3740 = vmatprep.subr.bf16.mxu0 %v5637_v15 }
 0x656   : > { %3698 = vmatpush1.bf16.msra.mxu1 %v5632_v24  ;;  %3741 = vmatpush1.bf16.msra.mxu0 %v5635_v13 }
 0x657   : > { %3699 = vmatprep.subr.bf16.mxu1 %v5640_v49  ;;  %3742 = vmatprep.subr.bf16.mxu0 %v5643_v46 }
 0x65a   : > { %3700 = vmatpush1.bf16.msra.mxu1 %v5638_v33  ;;  %3743 = vmatpush1.bf16.msra.mxu0 %v5641_v50 }
 0x65b   : > { %5265 = vmatprep.subr.bf16.mxu0 %v7623_v4  ;;  %3974 = vmatprep.subr.bf16.mxu1 %v5646_v44 }
 0x65d   : > { %3718 = vmatmul.mubr.bf16.vlgmr.msra.gmra.mrb[0].mxu1 %v7624_v8  ;;  %3761 = vmatmul.mubr.bf16.vlgmr.msra.gmra.mrb[4].mxu0 %v7624_v8 }
 0x65e   : > { %4006 = vmatprep.mubr.bf16.mxu1 %v7622_v25  ;;  %5281 = vmatprep.mubr.msk.bf16.mxu0 %vm5911_vm9, %v7623_v4 }
 0x65f   : > { %3975 = vmatpush1.bf16.msra.mxu1 %v5644_v45  ;;  %5266 = vmatpush3.bf16.msra.mxu0 %v5716_v12 }
 0x660   : > { %3976 = vmatprep.subr.bf16.mxu1 %v5649_v42  ;;  %5267 = vmatprep.subr.bf16.mxu0 %v7623_v4 }
 0x663   : > { %3977 = vmatpush1.bf16.msra.mxu1 %v5647_v55  ;;  %5268 = vmatpush3.bf16.msra.mxu0 %v5717_v0 }
 0x664   : > { %3978 = vmatprep.subr.bf16.mxu1 %v5652_v43  ;;  %5269 = vmatprep.subr.bf16.mxu0 %v7623_v4  ;;  %v1699_v43 = vld [vmem:[#allocation5] sm:$0xff] }
 0x667   : > { %3979 = vmatpush1.bf16.msra.mxu1 %v5650_v62  ;;  %5270 = vmatpush3.bf16.msra.mxu0 %v5718_v61 }
 0x668   : > { %3980 = vmatprep.subr.bf16.mxu1 %v5655_v59  ;;  %5271 = vmatprep.subr.bf16.mxu0 %v7623_v4 }
 0x66b   : > { %3981 = vmatpush1.bf16.msra.mxu1 %v5653_v6  ;;  %5272 = vmatpush3.bf16.msra.mxu0 %v5719_v31 }
 0x66c   : > { %3982 = vmatprep.subr.bf16.mxu1 %v5658_v39  ;;  %5273 = vmatprep.subr.bf16.mxu0 %v7623_v4 }
 0x66f   : > { %3983 = vmatpush1.bf16.msra.mxu1 %v5656_v60  ;;  %5274 = vmatpush3.bf16.msra.mxu0 %v5720_v27  ;;  %v5683_v27 = vld [vmem:[%s7534_s15 + $0x50] ss:$8 sps:$4 sm:$0xff]  }
 0x670   : > { %3984 = vmatprep.subr.bf16.mxu1 %v5661_v37  ;;  %5275 = vmatprep.subr.bf16.mxu0 %v7623_v4 }
 0x673   : > { %3985 = vmatpush1.bf16.msra.mxu1 %v5659_v7  ;;  %5276 = vmatpush3.bf16.msra.mxu0 %v5721_v22  ;;  %v5697_v22 = vld [vmem:[%s7534_s15 + $0x114] ss:$8 sps:$4 sm:$0xff]  }
 0x674   : > { %3986 = vmatprep.subr.bf16.mxu1 %v5664_v40  ;;  %5277 = vmatprep.subr.bf16.mxu0 %v7623_v4  ;;  %v1700_v40 = vld [vmem:[#allocation5 + $0x8] sm:$0xff] }
 0x677   : > { %3987 = vmatpush1.bf16.msra.mxu1 %v5662_v28 }
 0x678   : > { %3988 = vmatprep.subr.bf16.mxu1 %v5667_v26 }
 0x67b   : > { %3989 = vmatpush1.bf16.msra.mxu1 %v5665_v19 }
 0x67c   : > { %4097 = vmatprep.subr.bf16.mxu1 %v5670_v30 }
 0x730   : > { %v3719_v23 = vpop.f32.mrb[0].mxu1  ;;  %v3762_v51 = vpop.f32.mrb[4].mxu0 }
 0x731   : > { %v3801_v36 = vadd.f32 %v3784_v35, %v3719_v23  ;;  %v3721_v21 = vpop.f32.mrb[1].mxu1  ;;  %v3764_v47 = vpop.f32.mrb[5].mxu0  ;;  %v3803_v56 = vadd.f32 %v3792_v58, %v3762_v51  ;;  %v5668_v51 = vld [vmem:[%s7534_s15] ss:$8 sps:$4 sm:$0xff]  }
 0x732   : > { %v3802_v16 = vadd.f32 %v3788_v20, %v3721_v21  ;;  %v3723_v9 = vpop.f32.mrb[2].mxu1  ;;  %v3766_v53 = vpop.f32.mrb[6].mxu0  ;;  %v3804_v5 = vadd.f32 %v3796_v52, %v3764_v47  ;;  %v5673_v21 = vld [vmem:[%s7534_s15 + $0x14] ss:$8 sps:$4 sm:$0xff]   ;;  %v5671_v47 = vld [vmem:[%s7534_s15 + $0x10] ss:$8 sps:$4 sm:$0xff]  }
 0x733   : > { %v4950_v17 = vmul.f32 -1.442695, %v3801_v36  ;;  %v3805_v54 = vadd.f32 %v3784_v35, %v3723_v9  ;;  %v3725_v10 = vpop.f32.mrb[3].mxu1  ;;  %v3768_v1 = vpop.f32.mrb[7].mxu0  ;;  %v3807_v15 = vadd.f32 %v3792_v58, %v3766_v53  ;;  %v5674_v9 = vld [vmem:[%s7534_s15 + $0x20] ss:$8 sps:$4 sm:$0xff]  }
 0x734   : > { %v4952_v57 = vmul.f32 -1.442695, %v3802_v16  ;;  %v3806_v38 = vadd.f32 %v3788_v20, %v3725_v10  ;;  %v4954_v63 = vmul.f32 -1.442695, %v3804_v5  ;;  %v3808_v14 = vadd.f32 %v3796_v52, %v3768_v1  ;;  %v5676_v16 = vld [vmem:[%s7534_s15 + $0x24] ss:$8 sps:$4 sm:$0xff]  }
 0x735   : > { %5800 = vpow2.f32 %v4950_v17  ;;  %v4951_v41 = vmul.f32 -1.442695, %v3805_v54  ;;  %v5679_v53 = vld [vmem:[%s7534_s15 + $0x34] ss:$8 sps:$4 sm:$0xff]   ;;  %v5677_v17 = vld [vmem:[%s7534_s15 + $0x30] ss:$8 sps:$4 sm:$0xff]  }
 0x736   : > { %5802 = vpow2.f32 %v4952_v57  ;;  %v4953_v11 = vmul.f32 -1.442695, %v3806_v38  ;;  %v4955_v49 = vmul.f32 -1.442695, %v3808_v14  ;;  %v5682_v54 = vld [vmem:[%s7534_s15 + $0x44] ss:$8 sps:$4 sm:$0xff]  }
 0x737   : > { %5804 = vpow2.f32 %v4951_v41  ;;  %v5680_v10 = vld [vmem:[%s7534_s15 + $0x40] ss:$8 sps:$4 sm:$0xff]   ;;  %v5685_v1 = vld [vmem:[%s7534_s15 + $0x54] ss:$8 sps:$4 sm:$0xff]   ;;  %v5688_v57 = vld [vmem:[%s7534_s15 + $0x64] ss:$8 sps:$4 sm:$0xff]  }
 0x738   : > { %5806 = vpow2.f32 %v4953_v11  ;;  %v5686_v52 = vld [vmem:[%s7534_s15 + $0x60] ss:$8 sps:$4 sm:$0xff]   ;;  %v5691_v38 = vld [vmem:[%s7534_s15 + $0x74] ss:$8 sps:$4 sm:$0xff]   ;;  %v5689_v41 = vld [vmem:[%s7534_s15 + $0x70] ss:$8 sps:$4 sm:$0xff]  }
 0x739   : > { %5808 = vtanh.f32 %v3803_v56  ;;  %v5694_v11 = vld [vmem:[%s7534_s15 + $0x104] ss:$8 sps:$4 sm:$0xff]   ;;  %v5692_v58 = vld [vmem:[%s7534_s15 + $0x100] ss:$8 sps:$4 sm:$0xff]   ;;  %v5695_v5 = vld [vmem:[%s7534_s15 + $0x110] ss:$8 sps:$4 sm:$0xff]  }
 0x73a   : > { %5810 = vpow2.f32 %v4954_v63  ;;  %v5700_v56 = vld [vmem:[%s7534_s15 + $0x124] ss:$8 sps:$4 sm:$0xff]   ;;  %v5698_v63 = vld [vmem:[%s7534_s15 + $0x120] ss:$8 sps:$4 sm:$0xff]  }
 0x73b   : > { %5812 = vtanh.f32 %v3807_v15  ;;  %v5706_v14 = vld [vmem:[%s7534_s15 + $0x144] ss:$8 sps:$4 sm:$0xff]   ;;  %v5704_v15 = vld [vmem:[%s7534_s15 + $0x140] ss:$8 sps:$4 sm:$0xff]  }
 0x73f   : > { %v5801_v24 = vpop.eup %5800 }
 0x740   : > { %v5803_v29 = vpop.eup %5802  ;;  %v3815_v13 = vadd.f32 1.0, %v5801_v24  ;;  %v5709_v24 = vld [vmem:[%s7534_s15 + $0x154] ss:$8 sps:$4 sm:$0xff]  }
 0x741   : > { %v3827_v46 = vadd.f32 1.0, %v5803_v29  ;;  %v5805_v33 = vpop.eup %5804  ;;  %v5707_v29 = vld [vmem:[%s7534_s15 + $0x150] ss:$8 sps:$4 sm:$0xff]  }
 0x742   : > { %5814 = vrcp.f32 %v3815_v13  ;;  %v3816_v50 = vadd.f32 1.0, %v5805_v33  ;;  %v5807_v8 = vpop.eup %5806  ;;  %v5712_v13 = vld [vmem:[%s7534_s15 + $0x164] ss:$8 sps:$4 sm:$0xff]   ;;  %v5713_v33 = vld [vmem:[%s7534_s15 + $0x170] ss:$8 sps:$4 sm:$0xff]  }
 0x743   : > { %5816 = vrcp.f32 %v3827_v46  ;;  %v3828_v44 = vadd.f32 1.0, %v5807_v8  ;;  %v5809_v45 = vpop.eup %5808  ;;  %v5715_v46 = vld [vmem:[%s7534_s15 + $0x174] ss:$8 sps:$4 sm:$0xff]   ;;  %v5723_v8 = vld [vmem:[%s7536_s17 + $0x70] ss:$8 sps:$4 sm:$0xff]  }
 0x744   : > { %5818 = vpow2.f32 %v4955_v49  ;;  %v5811_v42 = vpop.eup %5810  ;;  %v5710_v49 = vld [vmem:[%s7534_s15 + $0x160] ss:$8 sps:$4 sm:$0xff]  }
 0x745   : > { %5820 = vrcp.f32 %v3816_v50  ;;  %v5813_v55 = vpop.eup %5812  ;;  %v3841_v39 = vadd.f32 1.0, %v5811_v42  ;;  %v5722_v50 = vld [vmem:[%s7536_s17 + $0x60] ss:$8 sps:$4 sm:$0xff]  }
 0x746   : > { %5822 = vrcp.f32 %v3828_v44  ;;  %5278 = vmatpush3.bf16.msra.mxu0 %v5722_v50  ;;  %v4283_v44 = vld [vmem:[%s7535_s16] sm:$0x3] }
 0x747   : > { %5824 = vrcp.f32 %v3841_v39  ;;  %5279 = vmatprep.subr.bf16.mxu0 %v7623_v4 }
 0x74a   : > { %5280 = vmatpush3.bf16.msra.mxu0 %v5723_v8 }
 0x74b   : > { %5285 = vmatprep.subr.bf16.mxu0 %v7623_v4 }
 0x74c   : > { %v5815_v62 = vpop.eup %5814 }
 0x74d   : > { %v5817_v59 = vpop.eup %5816  ;;  %v3849_v6 = vmul.f32 %v5815_v62, %v5809_v45  ;;  %v4292_v45 = vrot.slane %v4283_v44, %v6446_v32  ;;  %v5726_v32 = vld [vmem:[%s7536_s17 + $0x24] ss:$8 sps:$4 sm:$0xff]  }
 0x74e   : > { %v5819_v60 = vpop.eup %5818  ;;  %v3847_v37 = vmul.f32 %v5817_v59, %v1699_v43 }
 0x74f   : > { %v5821_v7 = vpop.eup %5820  ;;  %v3842_v30 = vadd.f32 1.0, %v5819_v60 }
 0x750   : > { %v3851_v28 = vadd.f32 %v3849_v6, %v3847_v37  ;;  %v3850_v26 = vmul.f32 %v5821_v7, %v5813_v55  ;;  %v5823_v19 = vpop.eup %5822 }
 0x751   : > { %v3848_v12 = vmul.f32 %v5823_v19, %v1700_v40  ;;  %v5825_v34 = vpop.eup %5824  ;;  %v5724_v40 = vld [vmem:[%s7536_s17 + $0x4] ss:$8 sps:$4 sm:$0xff]  }
 0x752   : > { %5826 = vtanh.f32 %v3851_v28  ;;  %3859 = vst [vmem:[#allocation5] sm:$0xff] %v3851_v28  ;;  %v5728_v19 = vld [vmem:[%s7536_s17 + $0x44] ss:$8 sps:$4 sm:$0xff]  }
 0x753   : > { %v3852_v0 = vadd.f32 %v3850_v26, %v3848_v12  ;;  %5828 = vrcp.f32 %v3842_v30  ;;  %v5727_v26 = vld [vmem:[%s7536_s17 + $0x34] ss:$8 sps:$4 sm:$0xff]   ;;  %v5730_v12 = vld [vmem:[%s7536_s17 + $0x64] ss:$8 sps:$4 sm:$0xff]  }
 0x754   : > { %v5729_v30 = vld [vmem:[%s7536_s17 + $0x54] ss:$8 sps:$4 sm:$0xff]  }
 0x755   : > { %5830 = vtanh.f32 %v3852_v0  ;;  %3860 = vst [vmem:[#allocation5 + $0x8] sm:$0xff] %v3852_v0  ;;  %v5731_v0 = vld [vmem:[%s7536_s17 + $0x74] ss:$8 sps:$4 sm:$0xff]  }
 0x75c   : > { %v5827_v61 = vpop.eup %5826 }
 0x75d   : > { %v3855_v35 = vmul.f32 %v5827_v61, %v5825_v34  ;;  %v5829_v20 = vpop.eup %5828  ;;  %v4302_v34 = vstv %s5891_s1 }
 0x75e   : > { %vm7435_vm3 = vcmp.eq.s32.totalorder %v6808_v18, %v4302_v34 }
 0x75f   : > { %3857 = vst [vmem:[#allocation4] sm:$0xff] %v3855_v35  ;;  %v5831_v31 = vpop.eup %5830 }
 0x760   : > { %v3856_v23 = vmul.f32 %v5831_v31, %v5829_v20  ;;  %v5004_v31 = vld [vmem:[%s7627_s0] ss:$0 sm:$0xff] }
 0x762   : > { %3858 = vst [vmem:[#allocation4 + $0x8] sm:$0xff] %v3856_v23  ;;  %v3861_v36 = vpack.c.bf16 %v3856_v23, %v3855_v35  ;;  %v4304_v35 = vld [vmem:[%s6111_s23] sm:$0xff] }
 0x763   : > { %v4306_v20 = vsel %vm7435_vm3, %v4304_v35, 0 }
 0x764   : > { %4007 = vmatmul.mubr.bf16.vlgmr.msra.gmra.mrb[4].mxu1 %v3861_v36 }
 0x765   : > { %4098 = vmatpush1.bf16.msra.mxu1 %v5668_v51  ;;  %4129 = vmatprep.mubr.bf16.mxu1 %v7622_v25 }
 0x766   : > { %4099 = vmatprep.subr.bf16.mxu1 %v5673_v21 }
 0x769   : > { %4100 = vmatpush1.bf16.msra.mxu1 %v5671_v47 }
 0x76a   : > { %4101 = vmatprep.subr.bf16.mxu1 %v5676_v16 }
 0x76d   : > { %4102 = vmatpush1.bf16.msra.mxu1 %v5674_v9 }
 0x76e   : > { %4103 = vmatprep.subr.bf16.mxu1 %v5679_v53 }
 0x771   : > { %4104 = vmatpush1.bf16.msra.mxu1 %v5677_v17 }
 0x772   : > { %4105 = vmatprep.subr.bf16.mxu1 %v5682_v54 }
 0x775   : > { %4106 = vmatpush1.bf16.msra.mxu1 %v5680_v10  ;;  %v4305_v10 = vld [vmem:[%s6111_s23 + $0x8] sm:$0xff] }
 0x776   : > { %4107 = vmatprep.subr.bf16.mxu1 %v5685_v1  ;;  %v4307_v1 = vsel %vm7435_vm3, %v4305_v10, 0 }
 0x779   : > { %4108 = vmatpush1.bf16.msra.mxu1 %v5683_v27  ;;  %v5013_v27 = vld [vmem:[%s7627_s0 + $0x1] ss:$0 sm:$0xff] }
 0x77a   : > { %4109 = vmatprep.subr.bf16.mxu1 %v5688_v57 }
 0x77d   : > { %4110 = vmatpush1.bf16.msra.mxu1 %v5686_v52  ;;  %v4322_v52 = vsel %vm4308_vm4, %v4307_v1, 0 }
 0x77e   : > { %4111 = vmatprep.subr.bf16.mxu1 %v5691_v38 }
 0x781   : > { %4112 = vmatpush1.bf16.msra.mxu1 %v5689_v41 }
 0x782   : > { %4236 = vmatprep.subr.bf16.mxu1 %v5694_v11 }
 0x784   : > { %4130 = vmatmul.mubr.bf16.vlgmr.msra.gmra.mrb[4].mxu1 %v7009_v3  ;;  %v5703_v3 = vld [vmem:[%s7534_s15 + $0x134] ss:$8 sps:$4 sm:$0xff]  }
 0x785   : > { %4237 = vmatpush1.bf16.msra.mxu1 %v5692_v58  ;;  %4268 = vmatprep.mubr.bf16.mxu1 %v7622_v25  ;;  %v5701_v25 = vld [vmem:[%s7534_s15 + $0x130] ss:$8 sps:$4 sm:$0xff]  }
 0x786   : > { %4238 = vmatprep.subr.bf16.mxu1 %v5697_v22  ;;  %v4324_v22 = vshrl.u32 %v4322_v52, 16 }
 0x789   : > { %4239 = vmatpush1.bf16.msra.mxu1 %v5695_v5 }
 0x78a   : > { %4240 = vmatprep.subr.bf16.mxu1 %v5700_v56  ;;  %v4326_v56 = vcvt.s32.f32 %v4324_v22 }
 0x78d   : > { %4241 = vmatpush1.bf16.msra.mxu1 %v5698_v63  ;;  %v4323_v63 = vand.u32 65535, %v4322_v52 }
 0x78e   : > { %4242 = vmatprep.subr.bf16.mxu1 %v5703_v3 }
 0x78f   : > { %v4325_v3 = vcvt.s32.f32 %v4323_v63 }
 0x791   : > { %4243 = vmatpush1.bf16.msra.mxu1 %v5701_v25 }
 0x792   : > { %4244 = vmatprep.subr.bf16.mxu1 %v5706_v14 }
 0x795   : > { %4245 = vmatpush1.bf16.msra.mxu1 %v5704_v15 }
 0x796   : > { %4246 = vmatprep.subr.bf16.mxu1 %v5709_v24 }
 0x799   : > { %4247 = vmatpush1.bf16.msra.mxu1 %v5707_v29 }
 0x79a   : > { %4248 = vmatprep.subr.bf16.mxu1 %v5712_v13 }
 0x79d   : > { %4249 = vmatpush1.bf16.msra.mxu1 %v5710_v49 }
 0x79e   : > { %4250 = vmatprep.subr.bf16.mxu1 %v5715_v46 }
 0x7a1   : > { %4251 = vmatpush1.bf16.msra.mxu1 %v5713_v33 }
 0x7a4   : > { %4269 = vmatmul.mubr.bf16.vlgmr.msra.gmra.mrb[4].mxu1 %v7106_v48  ;;  %v4288_v48 = vrot.slane %v4283_v44, %v6441_v2  ;;  %v5725_v2 = vld [vmem:[%s7536_s17 + $0x14] ss:$8 sps:$4 sm:$0xff]  }
 0x877   : > { %v4270_v42 = vpop.f32.mrb[4].mxu1 }
 0x878   : > { %v4295_v55 = vadd.f32 %v4288_v48, %v4270_v42  ;;  %v4272_v43 = vpop.f32.mrb[5].mxu1 }
 0x879   : > { %v4296_v62 = vadd.f32 %v4292_v45, %v4272_v43  ;;  %v4274_v59 = vpop.f32.mrb[6].mxu1 }
 0x87a   : > { %v4297_v6 = vadd.f32 %v4288_v48, %v4274_v59  ;;  %v4276_v39 = vpop.f32.mrb[7].mxu1 }
 0x87b   : > { %v4299_v60 = vmax.f32 %v4295_v55, %v4296_v62  ;;  %v4298_v37 = vadd.f32 %v4292_v45, %v4276_v39 }
 0x87d   : > { %v4300_v7 = vmax.f32 %v4297_v6, %v4298_v37 }
 0x87f   : > { %v4301_v28 = vpack.c.bf16 %v4300_v7, %v4299_v60 }
 0x881   : > { %5282 = vmatmul.mubr.bf16.vlgmr.msra.gmra.mrb[8].mxu0 %v4301_v28 }
 0x882   : > { %5286 = vmatpush3.bf16.msra.mxu0 %v5724_v40  ;;  %5301 = vmatprep.mubr.msk.bf16.mxu0 %vm5911_vm9, %v7623_v4  ;;  %vm4659_vm9 = vcmask 0  }
 0x883   : > { %5287 = vmatprep.subr.bf16.mxu0 %v7623_v4 }
 0x886   : > { %5288 = vmatpush3.bf16.msra.mxu0 %v5725_v2 }
 0x887   : > { %5289 = vmatprep.subr.bf16.mxu0 %v7623_v4 }
 0x88a   : > { %5290 = vmatpush3.bf16.msra.mxu0 %v5726_v32 }
 0x88b   : > { %5291 = vmatprep.subr.bf16.mxu0 %v7623_v4 }
 0x88e   : > { %5292 = vmatpush3.bf16.msra.mxu0 %v5727_v26 }
 0x88f   : > { %5293 = vmatprep.subr.bf16.mxu0 %v7623_v4 }
 0x892   : > { %5294 = vmatpush3.bf16.msra.mxu0 %v5728_v19  ;;  %v4603_v19 = vadd.s32 128, %v6808_v18 }
 0x893   : > { %5295 = vmatprep.subr.bf16.mxu0 %v7623_v4 }
 0x896   : > { %5296 = vmatpush3.bf16.msra.mxu0 %v5729_v30 }
 0x897   : > { %5297 = vmatprep.subr.bf16.mxu0 %v7623_v4 }
 0x89a   : > { %5298 = vmatpush3.bf16.msra.mxu0 %v5730_v12 }
 0x89b   : > { %5299 = vmatprep.subr.bf16.mxu0 %v7623_v4  ;;  %v4309_v4 = vsel %vm4308_vm4, %v4306_v20, 0 }
 0x89c   : > { %v4311_v21 = vshrl.u32 %v4309_v4, 16  ;;  %v4310_v17 = vand.u32 65535, %v4309_v4 }
 0x89e   : > { %5300 = vmatpush3.bf16.msra.mxu0 %v5731_v0  ;;  %v4313_v53 = vcvt.s32.f32 %v4311_v21  ;;  %v4312_v54 = vcvt.s32.f32 %v4310_v17  ;;  %v4335_v0 = vld [vmem:[%s6122_s21] sm:$0xff] }
 0x89f   : > { %v4337_v34 = vsel %vm7435_vm3, %v4335_v0, 0.0 }
 0x8a0   : > { %v4339_v4 = vsel %vm4308_vm4, %v4337_v34, 0.0 }
 0x8a1   : > { %5302 = vmatmul.mubr.bf16.vlgmr.msra.gmra.mrb[12].mxu0 %v4301_v28 }
 0x954   : > { %v4450_v23 = vpop.f32.mrb[8].mxu0 }
 0x955   : > { %v7446_v51 = vadd.f32 %v5004_v31, %v4450_v23  ;;  %v5283_v36 = vpop.f32.mrb[9].mxu0 }
 0x956   : > { %v4453_v47 = vpop.f32.mrb[10].mxu0 }
 0x957   : > { %v7448_v16 = vadd.f32 %v5004_v31, %v4453_v47  ;;  %4467 = vmax.xlane.f32.xlu0 %v7446_v51  ;;  %v5284_v9 = vpop.f32.mrb[11].mxu0  ;;  %v4336_v31 = vld [vmem:[%s6122_s21 + $0x8] sm:$0xff] }
 0x958   : > { %v4338_v23 = vsel %vm7435_vm3, %v4336_v31, 0.0 }
 0x959   : > { %4469 = vmax.xlane.f32.xlu1 %v7448_v16 }
 0x95d   : > { %4316 = vadd.xlane.f32.xlu1 %v4313_v53 }
 0x961   : > { %4314 = vadd.xlane.f32.xlu1 %v4312_v54 }
 0x974   : > { %v4596_v57 = vpop.f32.mrb[12].mxu0 }
 0x975   : > { %v4597_v38 = vadd.f32 %v5013_v27, %v4596_v57  ;;  %v5303_v41 = vpop.f32.mrb[13].mxu0 }
 0x976   : > { %v4599_v11 = vpop.f32.mrb[14].mxu0 }
 0x977   : > { %4614 = vmax.xlane.f32.xlu0 %v4597_v38  ;;  %v5304_v58 = vpop.f32.mrb[15].mxu0  ;;  %v4600_v5 = vadd.f32 %v5013_v27, %v4599_v11 }
 0x97b   : > { %4616 = vmax.xlane.f32.xlu0 %v4600_v5 }
 0x97f   : > { %4329 = vadd.xlane.f32.xlu0 %v4326_v56 }
 0x983   : > { %4327 = vadd.xlane.f32.xlu0 %v4325_v3 }
 0x9e4   : > { %v7459_v25 = vpop.xlane.xlu0 %4467 }
 0x9e5   : > { %v4479_v14 = vsub.f32 %v7446_v51, %v7459_v25  ;;  %v4471_v36 = vsub.f32 -inf, %v7459_v25 }
 0x9e6   : > { %v7463_v15 = vpop.xlane.xlu1 %4469 }
 0x9e7   : > { %v4481_v24 = vmul.f32 1.442695, %v4479_v14  ;;  %v4480_v29 = vsub.f32 %v7448_v16, %v7463_v15  ;;  %v4472_v21 = vsub.f32 -inf, %v7463_v15  ;;  %v4473_v47 = vmul.f32 1.442695, %v4471_v36 }
 0x9e9   : > { %5832 = vpow2.f32 %v4481_v24  ;;  %v4483_v13 = vmul.f32 1.442695, %v4480_v29  ;;  %v4475_v9 = vmul.f32 1.442695, %v4472_v21 }
 0x9ea   : > { %v4317_v8 = vpop.xlane.xlu1 %4316 }
 0x9eb   : > { %5834 = vpow2.f32 %v4483_v13  ;;  %v4319_v55 = vcvt.f32.s32 %v4317_v8 }
 0x9ed   : > { %v4320_v39 = vshll.u32 %v4319_v55, 16 }
 0x9ee   : > { %v4315_v62 = vpop.xlane.xlu1 %4314 }
 0x9ef   : > { %v4318_v60 = vcvt.f32.s32 %v4315_v62 }
 0x9f1   : > { %v4321_v40 = vadd.s32 %v4320_v39, %v4318_v60 }
 0x9f3   : > { %v5833_v49 = vpop.eup %5832  ;;  %vm4457_vm5 = vcmp.eq.s32.totalorder %v6808_v18, %v4321_v40  ;;  %vm4604_vm6 = vcmp.eq.s32.totalorder %v4603_v19, %v4321_v40 }
 0x9f4   : > { %4485 = vadd.xlane.f32.xlu1 %v5833_v49  ;;  %v4459_v12 = vsel %vm4457_vm5, %v7446_v51, 0.0  ;;  %v4606_v35 = vsel %vm4604_vm6, %v4597_v38, 0.0 }
 0x9f5   : > { %v5835_v46 = vpop.eup %5834 }
 0x9f6   : > { %4487 = vadd.xlane.f32.xlu0 %v5835_v46 }
 0xa04   : > { %v4615_v33 = vpop.xlane.xlu0 %4614 }
 0xa05   : > { %v7468_v50 = vmax.f32 %v7459_v25, %v4615_v33 }
 0xa07   : > { %v4628_v44 = vsub.f32 %v4597_v38, %v7468_v50 }
 0xa08   : > { %v4617_v48 = vpop.xlane.xlu0 %4616 }
 0xa09   : > { %v4630_v45 = vmul.f32 1.442695, %v4628_v44  ;;  %v7472_v42 = vmax.f32 %v7463_v15, %v4617_v48 }
 0xa0b   : > { %v4629_v43 = vsub.f32 %v4600_v5, %v7472_v42  ;;  %5836 = vpow2.f32 %v4630_v45  ;;  %v4621_v61 = vsub.f32 %v7463_v15, %v7472_v42 }
 0xa0c   : > { %v4330_v59 = vpop.xlane.xlu0 %4329 }
 0xa0d   : > { %v4632_v6 = vmul.f32 1.442695, %v4629_v43  ;;  %v4332_v37 = vcvt.f32.s32 %v4330_v59  ;;  %v4624_v17 = vmul.f32 1.442695, %v4621_v61 }
 0xa0f   : > { %5838 = vpow2.f32 %v4632_v6  ;;  %v4333_v28 = vshll.u32 %v4332_v37, 16 }
 0xa10   : > { %v4328_v7 = vpop.xlane.xlu0 %4327  ;;  %5840 = vpow2.f32 %v4473_v47 }
 0xa11   : > { %v4331_v2 = vcvt.f32.s32 %v4328_v7  ;;  %5842 = vpow2.f32 %v4475_v9 }
 0xa13   : > { %v4334_v26 = vadd.s32 %v4333_v28, %v4331_v2 }
 0xa15   : > { %v5837_v32 = vpop.eup %5836  ;;  %vm4458_vm7 = vcmp.eq.s32.totalorder %v6808_v18, %v4334_v26  ;;  %vm4605_vm8 = vcmp.eq.s32.totalorder %v4603_v19, %v4334_v26  ;;  %v4342_v18 = vsel %vm4308_vm4, %v4338_v23, 0.0  ;;  %v5914_v19 = vmov (!%p5022_p0), 0  }
 0xa16   : > { %4634 = vadd.xlane.f32.xlu1 %v5837_v32  ;;  %v4460_v20 = vsel %vm4458_vm7, %v7448_v16, 0.0  ;;  %v4607_v51 = vsel %vm4605_vm8, %v4600_v5, 0.0  ;;  %v4620_v16 = vsub.f32 %v7459_v25, %v7468_v50  ;;  %5852 = vset.pattern.permute.xlu0 (!%p5022_p0), %v5914_v19 }
 0xa18   : > { %v4622_v53 = vmul.f32 1.442695, %v4620_v16 }
 0xa19   : > { %v5839_v30 = vpop.eup %5838 }
 0xa1a   : > { %4461 = vadd.xlane.f32.xlu1 %v4459_v12  ;;  %4636 = vadd.xlane.f32.xlu0 %v5839_v30  ;;  %5844 = vpow2.f32 %v4622_v53  ;;  %v5841_v54 = vpop.eup %5840 }
 0xa1b   : > { %5846 = vpow2.f32 %v4624_v17  ;;  %v4477_v1 = vmul.f32 0.0, %v5841_v54  ;;  %v5843_v27 = vpop.eup %5842 }
 0xa1c   : > { %v4478_v38 = vmul.f32 0.0, %v5843_v27 }
 0xa1e   : > { %4608 = vadd.xlane.f32.xlu1 %v4606_v35  ;;  %4463 = vadd.xlane.f32.xlu0 %v4460_v20 }
 0xa22   : > { %4610 = vadd.xlane.f32.xlu0 %v4607_v51  ;;  %4340 = vadd.xlane.f32.xlu1 %v4339_v4 }
 0xa24   : > { %v5845_v41 = vpop.eup %5844 }
 0xa25   : > { %v5847_v56 = vpop.eup %5846 }
 0xa26   : > { %4343 = vadd.xlane.f32.xlu0 %v4342_v18 }
 0xa81   : > { %v4486_v10 = vpop.xlane.xlu1 %4485 }
 0xa82   : > { %v4489_v57 = vadd.f32 %v4486_v10, %v4477_v1 }
 0xa83   : > { %v4488_v52 = vpop.xlane.xlu0 %4487 }
 0xa84   : > { %v4490_v11 = vadd.f32 %v4488_v52, %v4478_v38  ;;  %v4626_v58 = vmul.f32 %v5845_v41, %v4489_v57 }
 0xa86   : > { %v4627_v63 = vmul.f32 %v5847_v56, %v4490_v11 }
 0xaa3   : > { %v4635_v22 = vpop.xlane.xlu1 %4634 }
 0xaa4   : > { %v4638_v5 = vadd.f32 %v4635_v22, %v4626_v58 }
 0xaa6   : > { %5848 = vlog2.f32 %v4638_v5 }
 0xaa7   : > { %v4637_v3 = vpop.xlane.xlu0 %4636  ;;  %v4462_v14 = vpop.xlane.xlu1 %4461 }
 0xaa8   : > { %v4639_v25 = vadd.f32 %v4637_v3, %v4627_v63 }
 0xaaa   : > { %5850 = vlog2.f32 %v4639_v25 }
 0xaab   : > { %v4464_v15 = vpop.xlane.xlu0 %4463  ;;  %v4609_v13 = vpop.xlane.xlu1 %4608 }
 0xaac   : > { %v4612_v44 = vadd.f32 %v4609_v13, %v4462_v14 }
 0xaaf   : > { %v4611_v33 = vpop.xlane.xlu0 %4610  ;;  %v4341_v43 = vpop.xlane.xlu1 %4340 }
 0xab0   : > { %v5849_v24 = vpop.eup %5848  ;;  %v4613_v48 = vadd.f32 %v4611_v33, %v4464_v15 }
 0xab1   : > { %v4641_v29 = vmul.f32 0.6931472, %v5849_v24 }
 0xab3   : > { %v4644_v49 = vadd.f32 %v4641_v29, %v7468_v50  ;;  %v4344_v62 = vpop.xlane.xlu0 %4343  ;;  %v4648_v50 = vld [vmem:[#allocation6] sm:$0x1] }
 0xab4   : > { %v5851_v46 = vpop.eup %5850 }
 0xab5   : > { %v4643_v8 = vmul.f32 0.6931472, %v5851_v46  ;;  %v4646_v45 = vsub.f32 %v4644_v49, %v4612_v44 }
 0xab7   : > { %v4645_v55 = vadd.f32 %v4643_v8, %v7472_v42  ;;  %v4649_v6 = vmul.f32 %v4646_v45, %v4341_v43 }
 0xab9   : > { %v4647_v59 = vsub.f32 %v4645_v55, %v4613_v48 }
 0xabb   : > { %v4650_v39 = vmul.f32 %v4647_v59, %v4344_v62 }
 0xabd   : > { %v4651_v60 = vadd.f32 %v4650_v39, %v4649_v6 }
 0xabf   : > { %v4652_v37 = vrot.slane %v4651_v60, 4 }
 0xac1   : > { %v4653_v7 = vadd.f32 %v4652_v37, %v4651_v60 }
 0xac3   : > { %v4654_v40 = vrot.slane %v4653_v7, 2 }
 0xac5   : > { %v4655_v28 = vadd.f32 %v4654_v40, %v4653_v7 }
 0xac7   : > { %v4656_v2 = vrot.slane %v4655_v28, 1  ;;  %4664 = sbr.rel (%p5022_p0) target bundleno = 2902 (0xb56), region = 145 }
 0xac9   : > { %v4657_v32 = vadd.f32 %v4656_v2, %v4655_v28 }
 0xacb   : > { %v4658_v26 = vadd.f32 %v4657_v32, %v4648_v50 }
 0xacd   : > { %4660 = vst.msk [vmem:[#allocation6] sm:$0x1] %vm4659_vm9, %v4658_v26 }
 0xad4   : > { %v5023_v42 = vld [vmem:[#allocation6] ss:$0 sm:$0xff] }
 0xad5   : > { %4672 = vperm.xlu0 %5852, %v5023_v42  }
 0xb54   : > { %v4673_v30 = vpop.permute.xlu0 %4672 }
 0xb55   : > { %4675 = vst [vmem:[%s6133_s12] sm:$0xff] %v4673_v30 }
 0xb56 PF: > { %s7628_s21 = sld [smem:[#allocation12_spill]]  ;;  %s7629_s20 = sld [smem:[#allocation9_spill]] }
 0xb57   : > { %s7631_s1 = sld [smem:[#allocation10_spill]]  ;;  %s7632_s22 = sld [smem:[#allocation11_spill]] }
 0xb58   : > { %s7633_s2 = sld [smem:[#allocation13_spill]]  ;;  %s7634_s23 = sld [smem:[#allocation14_spill]] }
 0xb5c   : > { %s31_s24 = sadd.s32 1, %s7628_s21   ;;  %s7630_s21 = sld [smem:[#allocation15_spill]] }
 0xb5d   : > { %p28_p1 = scmp.ge.s32.totalorder %s31_s24, 10  }
 0xb5f   :  { %30 = sbr.rel (!%p28_p1) target bundleno = 10 (0xa), region = 194 }

</bundles_post_ra>
